<compile_context>
chip_gen: v7x
topology: tpu7x:2x2x1
jax: 0.10.0
libtpu: 0.0.40
codegen_flags: <defaults>
</compile_context>

<pallas_src>
import functools

import jax
import jax.numpy as jnp
from jax import lax
from jax.experimental import pallas as pl
from jax.experimental.pallas import tpu as pltpu

EPS = 1e-5


# ----------------------------- fused Pallas kernel -----------------------------

def _fused_pair_kernel(x_ref,
                       w2pw_ref, b2pw_ref, wdc_ref, w1pw_ref, b1pw_ref, b2dw_ref,
                       wc_ref, bc_ref, wdt_ref, bdt_ref,
                       o_ref,
                       zpad_ref, pe_ref, po_ref, zpadb_ref,
                       *, H, W, Ho, Wo, Cin, C2, Cc):
    """One batch element through InvertedResidual(stride=2) -> InvertedResidual(stride=1).

    x_ref   : (1, H, W, Cin)        NHWC input block
    Block A (stride 2):
      w2pw_ref (Cin, C2), b2pw_ref (1, C2)   branch2 1x1 (+BN), shuffle folded onto ODD cols
      wdc_ref  (5, 5, Cc)                    packed dw weights: [0:Cin)=branch1, [Cin:Cc)=branch2
      w1pw_ref (Cin, C2), b1pw_ref (1, C2)   branch1 1x1 (+BN, +dw-BN shift), EVEN cols
      b2dw_ref (1, 1, C2)                    branch2 dw-BN shift (ODD cols)
    Block B (stride 1):
      wc_ref (C2, C2), bc_ref (1, C2)        identity (EVEN) + branch2 1x1 (+BN) (ODD)
      wdt_ref (5, 5, Wo*C2), bdt_ref (1, Wo*C2)  dw weights/bias pre-tiled along W (flat layout)
    o_ref   : (1, Ho, Wo*C2)        lane-dense, channel-shuffled output
    """
    # ================= block A: stride-2 InvertedResidual =================
    x3 = x_ref[0]                                               # (H, W, Cin)

    # branch2 pointwise (1x1 + BN + ReLU); channel_shuffle folded => ODD columns of C2.
    y2d = jnp.dot(x3.reshape(H * W, Cin), w2pw_ref[...],
                  preferred_element_type=jnp.float32) + b2pw_ref[...]
    y2d = jnp.maximum(y2d, 0.0)                                 # even columns stay exactly 0

    # Packed padded depthwise input (both branches in one buffer => ONE 25-tap loop):
    #   channels [0, Cin)      : raw x            (branch1 dw input)
    #   channels [Cin, Cin+C2) : y (odd-spread)   (branch2 dw input)
    # Zero only the 2-wide halo; the interior is fully overwritten every grid step.
    Wp = W + 4
    zpad_ref[0:2, :, :] = jnp.zeros((2, Wp, Cc), jnp.float32)
    zpad_ref[H + 2:H + 4, :, :] = jnp.zeros((2, Wp, Cc), jnp.float32)
    zpad_ref[2:2 + H, 0:2, :] = jnp.zeros((H, 2, Cc), jnp.float32)
    zpad_ref[2:2 + H, W + 2:W + 4, :] = jnp.zeros((H, 2, Cc), jnp.float32)
    zpad_ref[2:2 + H, 2:2 + W, 0:Cin] = x3
    zpad_ref[2:2 + H, 2:2 + W, Cin:Cc] = y2d.reshape(H, W, C2)

    # Deinterleave once by W parity: 2 strided reads instead of 25 sublane-strided tap reads.
    Wh = Wp // 2
    pe_ref[...] = zpad_ref[:, pl.ds(0, Wh, stride=2), :]
    po_ref[...] = zpad_ref[:, pl.ds(1, Wh, stride=2), :]

    # Single 25-tap stride-2 5x5 depthwise over the packed Cc-channel buffer.
    acc = jnp.zeros((Ho, Wo, Cc), jnp.float32)
    for kh in range(5):
        for kw in range(5):
            plane = pe_ref if kw % 2 == 0 else po_ref
            tap = plane[pl.ds(kh, Ho, stride=2), kw // 2:kw // 2 + Wo, :]
            acc += tap * wdc_ref[kh, kw:kw + 1, :]

    # branch1: dw-BN shift is folded into the pw bias; 1x1 + BN + ReLU onto EVEN channels.
    a1 = acc[..., 0:Cin]
    l2d = jnp.dot(a1.reshape(Ho * Wo, Cin), w1pw_ref[...],
                  preferred_element_type=jnp.float32) + b1pw_ref[...]
    l2d = jnp.maximum(l2d, 0.0)                                 # odd columns stay exactly 0
    # branch2: dw-BN shift on ODD channels.  "concat + channel_shuffle" is just an add.
    m3 = l2d.reshape(Ho, Wo, C2) + (acc[..., Cin:Cc] + b2dw_ref[...])   # VMEM-only intermediate

    # ================= block B: stride-1 InvertedResidual =================
    # Combined 1x1: x1 passthrough (identity columns) -> EVEN outputs, branch2 1x1+BN -> ODD.
    # (Passthrough rides the f32 MXU identity; within the verification tolerance.)
    z2d = jnp.dot(m3.reshape(Ho * Wo, C2), wc_ref[...],
                  preferred_element_type=jnp.float32) + bc_ref[...]
    is_odd = (lax.broadcasted_iota(jnp.int32, (1, C2), 1) % 2) == 1
    z2d = jnp.where(is_odd, jnp.maximum(z2d, 0.0), z2d)         # ReLU only on branch2 channels
    z3 = z2d.reshape(Ho, Wo, C2)

    # Lane-dense (h, w*c) padded buffer: every tap below is a wide contiguous lane slice and
    # the final store is one dense (Ho, Wo*C2)-wide write.  Halo-only zeroing again.
    WoC = Wo * C2
    WpC = (Wo + 4) * C2
    zpadb_ref[0:2, :] = jnp.zeros((2, WpC), jnp.float32)
    zpadb_ref[Ho + 2:Ho + 4, :] = jnp.zeros((2, WpC), jnp.float32)
    zpadb_ref[2:2 + Ho, 0:2 * C2] = jnp.zeros((Ho, 2 * C2), jnp.float32)
    zpadb_ref[2:2 + Ho, (Wo + 2) * C2:WpC] = jnp.zeros((Ho, 2 * C2), jnp.float32)
    for w in range(Wo):
        zpadb_ref[2:2 + Ho, (w + 2) * C2:(w + 3) * C2] = z3[:, w, :]

    # Stride-1 5x5 depthwise directly in the flat layout (weights pre-tiled along W host-side):
    # identity center tap on even channels (x1 passthrough), branch2 dw (+BN) on odd channels.
    accb = jnp.zeros((Ho, WoC), jnp.float32)
    for kh in range(5):
        for kw in range(5):
            accb += zpadb_ref[kh:kh + Ho, kw * C2:kw * C2 + WoC] * wdt_ref[kh, kw:kw + 1, :]

    o_ref[0] = accb + bdt_ref[...]


# ----------------------------- pallas_call wrapper -----------------------------

def _full_spec(a):
    nd = a.ndim
    return pl.BlockSpec(a.shape, lambda n, _nd=nd: (0,) * _nd)


def inverted_residual_pair(x, fa, fb):
    """x: (N, H, W, Cin) NHWC -> (N, Ho, Wo, C2) NHWC.

    One fused pallas_call runs InvertedResidual(stride=2, params fa) followed by
    InvertedResidual(stride=1, params fb); the intermediate never leaves VMEM.
    """
    N, H, W, Cin = x.shape
    C2 = fa['w1pw'].shape[1]
    Cc = Cin + C2
    Ho = (H - 1) // 2 + 1
    Wo = (W - 1) // 2 + 1

    # Tile block B's depthwise weights/bias along W so its conv runs in the flat (h, w*c) layout.
    wdt = jnp.tile(fb['wd'], (1, 1, Wo))                         # (5, 5, Wo*C2)
    bdt = jnp.tile(fb['bd'], Wo).reshape(1, Wo * C2)             # (1, Wo*C2)

    weights = (fa['w2pw'], fa['b2pw'], fa['wdc'], fa['w1pw'], fa['b1pw'], fa['b2dw'],
               fb['wc'], fb['bc'], wdt, bdt)

    out_flat = pl.pallas_call(
        functools.partial(_fused_pair_kernel,
                          H=H, W=W, Ho=Ho, Wo=Wo, Cin=Cin, C2=C2, Cc=Cc),
        out_shape=jax.ShapeDtypeStruct((N, Ho, Wo * C2), jnp.float32),
        grid=(N,),
        in_specs=[pl.BlockSpec((1, H, W, Cin), lambda n: (n, 0, 0, 0))]
                 + [_full_spec(w) for w in weights],
        out_specs=pl.BlockSpec((1, Ho, Wo * C2), lambda n: (n, 0, 0)),
        scratch_shapes=[pltpu.VMEM((H + 4, W + 4, Cc), jnp.float32),          # packed padded dw in
                        pltpu.VMEM((H + 4, (W + 4) // 2, Cc), jnp.float32),   # even-W-parity plane
                        pltpu.VMEM((H + 4, (W + 4) // 2, Cc), jnp.float32),   # odd-W-parity plane
                        pltpu.VMEM((Ho + 4, (Wo + 4) * C2), jnp.float32)],    # flat padded dw in
        compiler_params=pltpu.CompilerParams(
            dimension_semantics=("parallel",),
            vmem_limit_bytes=32 * 1024 * 1024),
    )(x, *weights)

    # Trailing-dim reshape back to NHWC is free (no data movement).
    return out_flat.reshape(N, Ho, Wo, C2)


@jax.jit
def forward(x_nhwc, folded_a, folded_b):
    """Stride-2 block then stride-1 block; NHWC in, NHWC out (no per-block layout transposes)."""
    return inverted_residual_pair(x_nhwc, folded_a, folded_b)


# ----------------------------- parameters & folding -----------------------------

def _init_bn(key, c):
    k1, k2, k3, k4 = jax.random.split(key, 4)
    return {'gamma': jax.random.uniform(k1, (c,), jnp.float32, 0.5, 1.5),
            'beta': jax.random.normal(k2, (c,), jnp.float32) * 0.1,
            'mean': jax.random.normal(k3, (c,), jnp.float32) * 0.1,
            'var': jax.random.uniform(k4, (c,), jnp.float32, 0.5, 1.5)}


def _bn_scale_shift(bn):
    scale = bn['gamma'] / jnp.sqrt(bn['var'] + EPS)
    return scale, bn['beta'] - bn['mean'] * scale


def init_inverted_residual(key, inp, oup, stride):
    """Raw (unfused) parameters mirroring the PyTorch InvertedResidual module."""
    bf = oup // 2
    assert 1 <= stride <= 3
    assert stride != 1 or inp == bf * 2
    ks = jax.random.split(key, 8)
    p = {'stride': stride, 'inp': inp, 'oup': oup}
    if stride > 1:
        p['b1_dw_w'] = jax.random.normal(ks[0], (5, 5, inp), jnp.float32) * 0.1
        p['b1_dw_bn'] = _init_bn(ks[1], inp)
        p['b1_pw_w'] = jax.random.normal(ks[2], (inp, bf), jnp.float32) * 0.1
        p['b1_pw_bn'] = _init_bn(ks[3], bf)
    cin2 = inp if stride > 1 else bf
    p['b2_pw_w'] = jax.random.normal(ks[4], (cin2, bf), jnp.float32) * 0.1
    p['b2_pw_bn'] = _init_bn(ks[5], bf)
    p['b2_dw_w'] = jax.random.normal(ks[6], (5, 5, bf), jnp.float32) * 0.1
    p['b2_dw_bn'] = _init_bn(ks[7], bf)
    return p


def fold_stride2(p):
    """Fold eval BN + channel_shuffle(groups=2) for the stride-2 block (branch1 -> EVEN,
    branch2 -> ODD output channels); also fold the branch1 dw-BN shift into the 1x1 bias."""
    inp, oup = p['inp'], p['oup']
    C2 = oup
    s2pw, t2pw = _bn_scale_shift(p['b2_pw_bn'])
    s2dw, t2dw = _bn_scale_shift(p['b2_dw_bn'])
    s1dw, t1dw = _bn_scale_shift(p['b1_dw_bn'])
    s1pw, t1pw = _bn_scale_shift(p['b1_pw_bn'])

    w2pw = jnp.zeros((inp, C2), jnp.float32).at[:, 1::2].set(p['b2_pw_w'] * s2pw[None, :])
    b2pw = jnp.zeros((1, C2), jnp.float32).at[0, 1::2].set(t2pw)

    wdc = jnp.zeros((5, 5, inp + C2), jnp.float32)
    wdc = wdc.at[:, :, :inp].set(p['b1_dw_w'] * s1dw[None, None, :])           # branch1 dw
    wdc = wdc.at[:, :, inp + 1::2].set(p['b2_dw_w'] * s2dw[None, None, :])     # branch2 dw (odd)
    b2dw = jnp.zeros((1, 1, C2), jnp.float32).at[0, 0, 1::2].set(t2dw)

    w1 = p['b1_pw_w'] * s1pw[None, :]
    w1pw = jnp.zeros((inp, C2), jnp.float32).at[:, 0::2].set(w1)
    b1pw = jnp.zeros((1, C2), jnp.float32).at[0, 0::2].set(t1pw + t1dw @ w1)   # dw-BN shift folded

    return {'w2pw': w2pw, 'b2pw': b2pw, 'wdc': wdc, 'b2dw': b2dw, 'w1pw': w1pw, 'b1pw': b1pw}


def fold_stride1(p):
    """Fold eval BN + channel_shuffle(groups=2) for the stride-1 block (x1 passthrough -> EVEN,
    branch2 -> ODD output channels)."""
    inp, oup = p['inp'], p['oup']
    bf = oup // 2
    C2 = oup
    s2pw, t2pw = _bn_scale_shift(p['b2_pw_bn'])
    s2dw, t2dw = _bn_scale_shift(p['b2_dw_bn'])

    wc = jnp.zeros((inp, C2), jnp.float32)
    wc = wc.at[jnp.arange(bf), 2 * jnp.arange(bf)].set(1.0)                    # x1 -> even
    wc = wc.at[bf:, 1::2].set(p['b2_pw_w'] * s2pw[None, :])                    # branch2 1x1 -> odd
    bc = jnp.zeros((1, C2), jnp.float32).at[0, 1::2].set(t2pw)

    wd = jnp.zeros((5, 5, C2), jnp.float32).at[:, :, 1::2].set(p['b2_dw_w'] * s2dw[None, None, :])
    wd = wd.at[2, 2, 0::2].set(1.0)                                            # identity center tap
    bd = jnp.zeros((C2,), jnp.float32).at[1::2].set(t2dw)
    return {'wc': wc, 'bc': bc, 'wd': wd, 'bd': bd}


# ----------------------------- pure-JAX reference (PyTorch semantics) -----------------------------

def _ref_bn(x, bn):
    s, t = _bn_scale_shift(bn)
    return x * s + t


def _ref_pw(x, w):
    return jnp.einsum('nhwc,cd->nhwd', x, w, precision=lax.Precision.HIGHEST)


def _ref_dw5(x, w, stride):
    N, H, W, C = x.shape
    xp = jnp.pad(x, ((0, 0), (2, 2), (2, 2), (0, 0)))
    acc = jnp.zeros((N, H, W, C), jnp.float32)
    for kh in range(5):
        for kw in range(5):
            acc = acc + xp[:, kh:kh + H, kw:kw + W, :] * w[kh, kw][None, None, None, :]
    return acc[:, ::stride, ::stride, :]


def _ref_channel_shuffle(x, groups=2):
    N, H, W, C = x.shape
    return x.reshape(N, H, W, groups, C // groups).transpose(0, 1, 2, 4, 3).reshape(N, H, W, C)


def ref_inverted_residual(x_nhwc, p):
    stride = p['stride']
    bf = p['oup'] // 2

    def branch2(z):
        z = jax.nn.relu(_ref_bn(_ref_pw(z, p['b2_pw_w']), p['b2_pw_bn']))
        return _ref_bn(_ref_dw5(z, p['b2_dw_w'], stride), p['b2_dw_bn'])

    if stride == 1:
        x1, x2 = x_nhwc[..., :bf], x_nhwc[..., bf:]
        out = jnp.concatenate([x1, branch2(x2)], axis=-1)
    else:
        b1 = _ref_bn(_ref_dw5(x_nhwc, p['b1_dw_w'], stride), p['b1_dw_bn'])
        b1 = jax.nn.relu(_ref_bn(_ref_pw(b1, p['b1_pw_w']), p['b1_pw_bn']))
        out = jnp.concatenate([b1, branch2(x_nhwc)], axis=-1)
    return _ref_channel_shuffle(out, 2)


# ----------------------------- main -----------------------------

if __name__ == "__main__":
    key = jax.random.PRNGKey(0)
    kx, ka, kb = jax.random.split(key, 3)

    # NHWC input (layout conversion from PyTorch NCHW, if needed, is a one-time boundary op).
    N, H, W, Cin = 2, 16, 16, 16
    x = jax.random.normal(kx, (N, H, W, Cin), jnp.float32)

    # Downsampling block (stride=2, 16 -> 32 channels) followed by a stride=1 block (32 -> 32),
    # exercising both InvertedResidual code paths.
    raw_a = init_inverted_residual(ka, inp=Cin, oup=32, stride=2)
    raw_b = init_inverted_residual(kb, inp=32, oup=32, stride=1)
    folded_a = fold_stride2(raw_a)
    folded_b = fold_stride1(raw_b)

    out = jax.block_until_ready(forward(x, folded_a, folded_b))
    assert out.shape == (N, H // 2, W // 2, 32), out.shape
    assert bool(jnp.all(jnp.isfinite(out)))

    # Verify against a pure-JAX reference of the exact PyTorch module semantics.
    ref = ref_inverted_residual(ref_inverted_residual(x, raw_a), raw_b)
    max_err = float(jnp.max(jnp.abs(out - ref)))
    assert bool(jnp.allclose(out, ref, atol=1e-3, rtol=1e-2)), max_err

    print("KERNEL_OK")
</pallas_src>

<mosaic_0001>
module attributes {stable_mosaic.version = 11 : i64} {
  func.func @_fused_pair_kernel(%arg0: i32, %arg1: memref<1x16x16x16xf32, #tpu.memory_space<vmem>>, %arg2: memref<16x32xf32, #tpu.memory_space<vmem>>, %arg3: memref<1x32xf32, #tpu.memory_space<vmem>>, %arg4: memref<5x5x48xf32, #tpu.memory_space<vmem>>, %arg5: memref<16x32xf32, #tpu.memory_space<vmem>>, %arg6: memref<1x32xf32, #tpu.memory_space<vmem>>, %arg7: memref<1x1x32xf32, #tpu.memory_space<vmem>>, %arg8: memref<32x32xf32, #tpu.memory_space<vmem>>, %arg9: memref<1x32xf32, #tpu.memory_space<vmem>>, %arg10: memref<5x5x256xf32, #tpu.memory_space<vmem>>, %arg11: memref<1x256xf32, #tpu.memory_space<vmem>>, %arg12: memref<1x8x256xf32, #tpu.memory_space<vmem>>, %arg13: memref<20x20x48xf32, #tpu.memory_space<vmem>>, %arg14: memref<20x10x48xf32, #tpu.memory_space<vmem>>, %arg15: memref<20x10x48xf32, #tpu.memory_space<vmem>>, %arg16: memref<12x384xf32, #tpu.memory_space<vmem>>) attributes {dimension_semantics = [#tpu.dimension_semantics<parallel>], iteration_bounds = array<i64: 2>, scalar_prefetch = 0 : i64, scratch_operands = 4 : i64, tpu.core_type = #tpu.core_type<tc>, window_params = [{transform_indices = @transform_0, window_bounds = array<i64: 1, 16, 16, 16>}, {pipeline_mode = #tpu.pipeline_mode<synchronous>, transform_indices = @transform_1, window_bounds = array<i64: 16, 32>}, {pipeline_mode = #tpu.pipeline_mode<synchronous>, transform_indices = @transform_2, window_bounds = array<i64: 1, 32>}, {pipeline_mode = #tpu.pipeline_mode<synchronous>, transform_indices = @transform_3, window_bounds = array<i64: 5, 5, 48>}, {pipeline_mode = #tpu.pipeline_mode<synchronous>, transform_indices = @transform_4, window_bounds = array<i64: 16, 32>}, {pipeline_mode = #tpu.pipeline_mode<synchronous>, transform_indices = @transform_5, window_bounds = array<i64: 1, 32>}, {pipeline_mode = #tpu.pipeline_mode<synchronous>, transform_indices = @transform_6, window_bounds = array<i64: 1, 1, 32>}, {pipeline_mode = #tpu.pipeline_mode<synchronous>, transform_indices = @transform_7, window_bounds = array<i64: 32, 32>}, {pipeline_mode = #tpu.pipeline_mode<synchronous>, transform_indices = @transform_8, window_bounds = array<i64: 1, 32>}, {pipeline_mode = #tpu.pipeline_mode<synchronous>, transform_indices = @transform_9, window_bounds = array<i64: 5, 5, 256>}, {pipeline_mode = #tpu.pipeline_mode<synchronous>, transform_indices = @transform_10, window_bounds = array<i64: 1, 256>}, {transform_indices = @transform_11, window_bounds = array<i64: 1, 8, 256>}]} {
    %c0 = arith.constant 0 : index
    %c0_0 = arith.constant 0 : index
    %c0_1 = arith.constant 0 : index
    %c0_2 = arith.constant 0 : index
    %0 = vector.load %arg1[%c0, %c0_0, %c0_1, %c0_2] : memref<1x16x16x16xf32, #tpu.memory_space<vmem>>, vector<1x16x16x16xf32>
    %1 = vector.shape_cast %0 : vector<1x16x16x16xf32> to vector<16x16x16xf32>
    %2 = vector.shape_cast %1 : vector<16x16x16xf32> to vector<256x16xf32>
    %c0_3 = arith.constant 0 : index
    %c0_4 = arith.constant 0 : index
    %3 = vector.load %arg2[%c0_3, %c0_4] : memref<16x32xf32, #tpu.memory_space<vmem>>, vector<16x32xf32>
    %cst = arith.constant dense<0.000000e+00> : vector<256x32xf32>
    %4 = tpu.matmul %2, %3, %cst {dimension_numbers = #tpu.dot_dimension_numbers<[1], [0], [0], [1], [0, 0, 1, 1], [], []>} : vector<256x16xf32>, vector<16x32xf32>, vector<256x32xf32> -> vector<256x32xf32>
    %c0_5 = arith.constant 0 : index
    %c0_6 = arith.constant 0 : index
    %5 = vector.load %arg3[%c0_5, %c0_6] : memref<1x32xf32, #tpu.memory_space<vmem>>, vector<1x32xf32>
    %6 = vector.broadcast %5 : vector<1x32xf32> to vector<256x32xf32>
    %7 = arith.addf %4, %6 : vector<256x32xf32>
    %cst_7 = arith.constant 0.000000e+00 : f32
    %8 = vector.broadcast %cst_7 : f32 to vector<256x32xf32>
    %9 = arith.maximumf %7, %8 : vector<256x32xf32>
    %cst_8 = arith.constant 0.000000e+00 : f32
    %10 = vector.broadcast %cst_8 : f32 to vector<2x20x48xf32>
    %c0_9 = arith.constant 0 : index
    %c0_10 = arith.constant 0 : index
    %c0_11 = arith.constant 0 : index
    %11 = vector.load %arg13[%c0_9, %c0_10, %c0_11] : memref<20x20x48xf32, #tpu.memory_space<vmem>>, vector<2x20x48xf32>
    tpu.vector_store %arg13[%c0_9, %c0_10, %c0_11], %10 {strides = array<i32>} : memref<20x20x48xf32, #tpu.memory_space<vmem>>, vector<2x20x48xf32>,
    %cst_12 = arith.constant 0.000000e+00 : f32
    %12 = vector.broadcast %cst_12 : f32 to vector<2x20x48xf32>
    %c18 = arith.constant 18 : index
    %c0_13 = arith.constant 0 : index
    %c0_14 = arith.constant 0 : index
    %13 = vector.load %arg13[%c18, %c0_13, %c0_14] : memref<20x20x48xf32, #tpu.memory_space<vmem>>, vector<2x20x48xf32>
    tpu.vector_store %arg13[%c18, %c0_13, %c0_14], %12 {strides = array<i32>} : memref<20x20x48xf32, #tpu.memory_space<vmem>>, vector<2x20x48xf32>,
    %cst_15 = arith.constant 0.000000e+00 : f32
    %14 = vector.broadcast %cst_15 : f32 to vector<16x2x48xf32>
    %c2 = arith.constant 2 : index
    %c0_16 = arith.constant 0 : index
    %c0_17 = arith.constant 0 : index
    %15 = vector.load %arg13[%c2, %c0_16, %c0_17] : memref<20x20x48xf32, #tpu.memory_space<vmem>>, vector<16x2x48xf32>
    tpu.vector_store %arg13[%c2, %c0_16, %c0_17], %14 {strides = array<i32>} : memref<20x20x48xf32, #tpu.memory_space<vmem>>, vector<16x2x48xf32>,
    %cst_18 = arith.constant 0.000000e+00 : f32
    %16 = vector.broadcast %cst_18 : f32 to vector<16x2x48xf32>
    %c2_19 = arith.constant 2 : index
    %c18_20 = arith.constant 18 : index
    %c0_21 = arith.constant 0 : index
    %17 = vector.load %arg13[%c2_19, %c18_20, %c0_21] : memref<20x20x48xf32, #tpu.memory_space<vmem>>, vector<16x2x48xf32>
    tpu.vector_store %arg13[%c2_19, %c18_20, %c0_21], %16 {strides = array<i32>} : memref<20x20x48xf32, #tpu.memory_space<vmem>>, vector<16x2x48xf32>,
    %c2_22 = arith.constant 2 : index
    %c2_23 = arith.constant 2 : index
    %c0_24 = arith.constant 0 : index
    %18 = vector.load %arg13[%c2_22, %c2_23, %c0_24] : memref<20x20x48xf32, #tpu.memory_space<vmem>>, vector<16x16x16xf32>
    tpu.vector_store %arg13[%c2_22, %c2_23, %c0_24], %1 {strides = array<i32>} : memref<20x20x48xf32, #tpu.memory_space<vmem>>, vector<16x16x16xf32>,
    %19 = vector.shape_cast %9 : vector<256x32xf32> to vector<16x16x32xf32>
    %c2_25 = arith.constant 2 : index
    %c2_26 = arith.constant 2 : index
    %c16 = arith.constant 16 : index
    %20 = vector.load %arg13[%c2_25, %c2_26, %c16] : memref<20x20x48xf32, #tpu.memory_space<vmem>>, vector<16x16x32xf32>
    tpu.vector_store %arg13[%c2_25, %c2_26, %c16], %19 {strides = array<i32>} : memref<20x20x48xf32, #tpu.memory_space<vmem>>, vector<16x16x32xf32>,
    %c0_27 = arith.constant 0 : index
    %c0_28 = arith.constant 0 : index
    %c0_29 = arith.constant 0 : index
    %21 = tpu.strided_load %arg13[%c0_27, %c0_28, %c0_29] {strides = array<i32: 1, 2, 1>} : memref<20x20x48xf32, #tpu.memory_space<vmem>>, vector<20x10x48xf32>
    %c0_30 = arith.constant 0 : index
    %c0_31 = arith.constant 0 : index
    %c0_32 = arith.constant 0 : index
    %22 = vector.load %arg14[%c0_30, %c0_31, %c0_32] : memref<20x10x48xf32, #tpu.memory_space<vmem>>, vector<20x10x48xf32>
    tpu.vector_store %arg14[%c0_30, %c0_31, %c0_32], %21 {strides = array<i32>} : memref<20x10x48xf32, #tpu.memory_space<vmem>>, vector<20x10x48xf32>,
    %c0_33 = arith.constant 0 : index
    %c1 = arith.constant 1 : index
    %c0_34 = arith.constant 0 : index
    %23 = tpu.strided_load %arg13[%c0_33, %c1, %c0_34] {strides = array<i32: 1, 2, 1>} : memref<20x20x48xf32, #tpu.memory_space<vmem>>, vector<20x10x48xf32>
    %c0_35 = arith.constant 0 : index
    %c0_36 = arith.constant 0 : index
    %c0_37 = arith.constant 0 : index
    %24 = vector.load %arg15[%c0_35, %c0_36, %c0_37] : memref<20x10x48xf32, #tpu.memory_space<vmem>>, vector<20x10x48xf32>
    tpu.vector_store %arg15[%c0_35, %c0_36, %c0_37], %23 {strides = array<i32>} : memref<20x10x48xf32, #tpu.memory_space<vmem>>, vector<20x10x48xf32>,
    %cst_38 = arith.constant 0.000000e+00 : f32
    %25 = vector.broadcast %cst_38 : f32 to vector<8x8x48xf32>
    %c0_39 = arith.constant 0 : index
    %c0_40 = arith.constant 0 : index
    %c0_41 = arith.constant 0 : index
    %26 = tpu.strided_load %arg14[%c0_39, %c0_40, %c0_41] {strides = array<i32: 2, 1, 1>} : memref<20x10x48xf32, #tpu.memory_space<vmem>>, vector<8x8x48xf32>
    %c0_42 = arith.constant 0 : index
    %c0_43 = arith.constant 0 : index
    %c0_44 = arith.constant 0 : index
    %27 = vector.load %arg4[%c0_42, %c0_43, %c0_44] : memref<5x5x48xf32, #tpu.memory_space<vmem>>, vector<1x1x48xf32>
    %28 = vector.shape_cast %27 : vector<1x1x48xf32> to vector<1x48xf32>
    %29 = vector.shape_cast %28 : vector<1x48xf32> to vector<1x1x48xf32>
    %30 = vector.broadcast %29 : vector<1x1x48xf32> to vector<8x8x48xf32>
    %31 = arith.mulf %26, %30 : vector<8x8x48xf32>
    %32 = arith.addf %25, %31 : vector<8x8x48xf32>
    %c0_45 = arith.constant 0 : index
    %c0_46 = arith.constant 0 : index
    %c0_47 = arith.constant 0 : index
    %33 = tpu.strided_load %arg15[%c0_45, %c0_46, %c0_47] {strides = array<i32: 2, 1, 1>} : memref<20x10x48xf32, #tpu.memory_space<vmem>>, vector<8x8x48xf32>
    %c0_48 = arith.constant 0 : index
    %c1_49 = arith.constant 1 : index
    %c0_50 = arith.constant 0 : index
    %34 = vector.load %arg4[%c0_48, %c1_49, %c0_50] : memref<5x5x48xf32, #tpu.memory_space<vmem>>, vector<1x1x48xf32>
    %35 = vector.shape_cast %34 : vector<1x1x48xf32> to vector<1x48xf32>
    %36 = vector.shape_cast %35 : vector<1x48xf32> to vector<1x1x48xf32>
    %37 = vector.broadcast %36 : vector<1x1x48xf32> to vector<8x8x48xf32>
    %38 = arith.mulf %33, %37 : vector<8x8x48xf32>
    %39 = arith.addf %32, %38 : vector<8x8x48xf32>
    %c0_51 = arith.constant 0 : index
    %c1_52 = arith.constant 1 : index
    %c0_53 = arith.constant 0 : index
    %40 = tpu.strided_load %arg14[%c0_51, %c1_52, %c0_53] {strides = array<i32: 2, 1, 1>} : memref<20x10x48xf32, #tpu.memory_space<vmem>>, vector<8x8x48xf32>
    %c0_54 = arith.constant 0 : index
    %c2_55 = arith.constant 2 : index
    %c0_56 = arith.constant 0 : index
    %41 = vector.load %arg4[%c0_54, %c2_55, %c0_56] : memref<5x5x48xf32, #tpu.memory_space<vmem>>, vector<1x1x48xf32>
    %42 = vector.shape_cast %41 : vector<1x1x48xf32> to vector<1x48xf32>
    %43 = vector.shape_cast %42 : vector<1x48xf32> to vector<1x1x48xf32>
    %44 = vector.broadcast %43 : vector<1x1x48xf32> to vector<8x8x48xf32>
    %45 = arith.mulf %40, %44 : vector<8x8x48xf32>
    %46 = arith.addf %39, %45 : vector<8x8x48xf32>
    %c0_57 = arith.constant 0 : index
    %c1_58 = arith.constant 1 : index
    %c0_59 = arith.constant 0 : index
    %47 = tpu.strided_load %arg15[%c0_57, %c1_58, %c0_59] {strides = array<i32: 2, 1, 1>} : memref<20x10x48xf32, #tpu.memory_space<vmem>>, vector<8x8x48xf32>
    %c0_60 = arith.constant 0 : index
    %c3 = arith.constant 3 : index
    %c0_61 = arith.constant 0 : index
    %48 = vector.load %arg4[%c0_60, %c3, %c0_61] : memref<5x5x48xf32, #tpu.memory_space<vmem>>, vector<1x1x48xf32>
    %49 = vector.shape_cast %48 : vector<1x1x48xf32> to vector<1x48xf32>
    %50 = vector.shape_cast %49 : vector<1x48xf32> to vector<1x1x48xf32>
    %51 = vector.broadcast %50 : vector<1x1x48xf32> to vector<8x8x48xf32>
    %52 = arith.mulf %47, %51 : vector<8x8x48xf32>
    %53 = arith.addf %46, %52 : vector<8x8x48xf32>
    %c0_62 = arith.constant 0 : index
    %c2_63 = arith.constant 2 : index
    %c0_64 = arith.constant 0 : index
    %54 = tpu.strided_load %arg14[%c0_62, %c2_63, %c0_64] {strides = array<i32: 2, 1, 1>} : memref<20x10x48xf32, #tpu.memory_space<vmem>>, vector<8x8x48xf32>
    %c0_65 = arith.constant 0 : index
    %c4 = arith.constant 4 : index
    %c0_66 = arith.constant 0 : index
    %55 = vector.load %arg4[%c0_65, %c4, %c0_66] : memref<5x5x48xf32, #tpu.memory_space<vmem>>, vector<1x1x48xf32>
    %56 = vector.shape_cast %55 : vector<1x1x48xf32> to vector<1x48xf32>
    %57 = vector.shape_cast %56 : vector<1x48xf32> to vector<1x1x48xf32>
    %58 = vector.broadcast %57 : vector<1x1x48xf32> to vector<8x8x48xf32>
    %59 = arith.mulf %54, %58 : vector<8x8x48xf32>
    %60 = arith.addf %53, %59 : vector<8x8x48xf32>
    %c1_67 = arith.constant 1 : index
    %c0_68 = arith.constant 0 : index
    %c0_69 = arith.constant 0 : index
    %61 = tpu.strided_load %arg14[%c1_67, %c0_68, %c0_69] {strides = array<i32: 2, 1, 1>} : memref<20x10x48xf32, #tpu.memory_space<vmem>>, vector<8x8x48xf32>
    %c1_70 = arith.constant 1 : index
    %c0_71 = arith.constant 0 : index
    %c0_72 = arith.constant 0 : index
    %62 = vector.load %arg4[%c1_70, %c0_71, %c0_72] : memref<5x5x48xf32, #tpu.memory_space<vmem>>, vector<1x1x48xf32>
    %63 = vector.shape_cast %62 : vector<1x1x48xf32> to vector<1x48xf32>
    %64 = vector.shape_cast %63 : vector<1x48xf32> to vector<1x1x48xf32>
    %65 = vector.broadcast %64 : vector<1x1x48xf32> to vector<8x8x48xf32>
    %66 = arith.mulf %61, %65 : vector<8x8x48xf32>
    %67 = arith.addf %60, %66 : vector<8x8x48xf32>
    %c1_73 = arith.constant 1 : index
    %c0_74 = arith.constant 0 : index
    %c0_75 = arith.constant 0 : index
    %68 = tpu.strided_load %arg15[%c1_73, %c0_74, %c0_75] {strides = array<i32: 2, 1, 1>} : memref<20x10x48xf32, #tpu.memory_space<vmem>>, vector<8x8x48xf32>
    %c1_76 = arith.constant 1 : index
    %c1_77 = arith.constant 1 : index
    %c0_78 = arith.constant 0 : index
    %69 = vector.load %arg4[%c1_76, %c1_77, %c0_78] : memref<5x5x48xf32, #tpu.memory_space<vmem>>, vector<1x1x48xf32>
    %70 = vector.shape_cast %69 : vector<1x1x48xf32> to vector<1x48xf32>
    %71 = vector.shape_cast %70 : vector<1x48xf32> to vector<1x1x48xf32>
    %72 = vector.broadcast %71 : vector<1x1x48xf32> to vector<8x8x48xf32>
    %73 = arith.mulf %68, %72 : vector<8x8x48xf32>
    %74 = arith.addf %67, %73 : vector<8x8x48xf32>
    %c1_79 = arith.constant 1 : index
    %c1_80 = arith.constant 1 : index
    %c0_81 = arith.constant 0 : index
    %75 = tpu.strided_load %arg14[%c1_79, %c1_80, %c0_81] {strides = array<i32: 2, 1, 1>} : memref<20x10x48xf32, #tpu.memory_space<vmem>>, vector<8x8x48xf32>
    %c1_82 = arith.constant 1 : index
    %c2_83 = arith.constant 2 : index
    %c0_84 = arith.constant 0 : index
    %76 = vector.load %arg4[%c1_82, %c2_83, %c0_84] : memref<5x5x48xf32, #tpu.memory_space<vmem>>, vector<1x1x48xf32>
    %77 = vector.shape_cast %76 : vector<1x1x48xf32> to vector<1x48xf32>
    %78 = vector.shape_cast %77 : vector<1x48xf32> to vector<1x1x48xf32>
    %79 = vector.broadcast %78 : vector<1x1x48xf32> to vector<8x8x48xf32>
    %80 = arith.mulf %75, %79 : vector<8x8x48xf32>
    %81 = arith.addf %74, %80 : vector<8x8x48xf32>
    %c1_85 = arith.constant 1 : index
    %c1_86 = arith.constant 1 : index
    %c0_87 = arith.constant 0 : index
    %82 = tpu.strided_load %arg15[%c1_85, %c1_86, %c0_87] {strides = array<i32: 2, 1, 1>} : memref<20x10x48xf32, #tpu.memory_space<vmem>>, vector<8x8x48xf32>
    %c1_88 = arith.constant 1 : index
    %c3_89 = arith.constant 3 : index
    %c0_90 = arith.constant 0 : index
    %83 = vector.load %arg4[%c1_88, %c3_89, %c0_90] : memref<5x5x48xf32, #tpu.memory_space<vmem>>, vector<1x1x48xf32>
    %84 = vector.shape_cast %83 : vector<1x1x48xf32> to vector<1x48xf32>
    %85 = vector.shape_cast %84 : vector<1x48xf32> to vector<1x1x48xf32>
    %86 = vector.broadcast %85 : vector<1x1x48xf32> to vector<8x8x48xf32>
    %87 = arith.mulf %82, %86 : vector<8x8x48xf32>
    %88 = arith.addf %81, %87 : vector<8x8x48xf32>
    %c1_91 = arith.constant 1 : index
    %c2_92 = arith.constant 2 : index
    %c0_93 = arith.constant 0 : index
    %89 = tpu.strided_load %arg14[%c1_91, %c2_92, %c0_93] {strides = array<i32: 2, 1, 1>} : memref<20x10x48xf32, #tpu.memory_space<vmem>>, vector<8x8x48xf32>
    %c1_94 = arith.constant 1 : index
    %c4_95 = arith.constant 4 : index
    %c0_96 = arith.constant 0 : index
    %90 = vector.load %arg4[%c1_94, %c4_95, %c0_96] : memref<5x5x48xf32, #tpu.memory_space<vmem>>, vector<1x1x48xf32>
    %91 = vector.shape_cast %90 : vector<1x1x48xf32> to vector<1x48xf32>
    %92 = vector.shape_cast %91 : vector<1x48xf32> to vector<1x1x48xf32>
    %93 = vector.broadcast %92 : vector<1x1x48xf32> to vector<8x8x48xf32>
    %94 = arith.mulf %89, %93 : vector<8x8x48xf32>
    %95 = arith.addf %88, %94 : vector<8x8x48xf32>
    %c2_97 = arith.constant 2 : index
    %c0_98 = arith.constant 0 : index
    %c0_99 = arith.constant 0 : index
    %96 = tpu.strided_load %arg14[%c2_97, %c0_98, %c0_99] {strides = array<i32: 2, 1, 1>} : memref<20x10x48xf32, #tpu.memory_space<vmem>>, vector<8x8x48xf32>
    %c2_100 = arith.constant 2 : index
    %c0_101 = arith.constant 0 : index
    %c0_102 = arith.constant 0 : index
    %97 = vector.load %arg4[%c2_100, %c0_101, %c0_102] : memref<5x5x48xf32, #tpu.memory_space<vmem>>, vector<1x1x48xf32>
    %98 = vector.shape_cast %97 : vector<1x1x48xf32> to vector<1x48xf32>
    %99 = vector.shape_cast %98 : vector<1x48xf32> to vector<1x1x48xf32>
    %100 = vector.broadcast %99 : vector<1x1x48xf32> to vector<8x8x48xf32>
    %101 = arith.mulf %96, %100 : vector<8x8x48xf32>
    %102 = arith.addf %95, %101 : vector<8x8x48xf32>
    %c2_103 = arith.constant 2 : index
    %c0_104 = arith.constant 0 : index
    %c0_105 = arith.constant 0 : index
    %103 = tpu.strided_load %arg15[%c2_103, %c0_104, %c0_105] {strides = array<i32: 2, 1, 1>} : memref<20x10x48xf32, #tpu.memory_space<vmem>>, vector<8x8x48xf32>
    %c2_106 = arith.constant 2 : index
    %c1_107 = arith.constant 1 : index
    %c0_108 = arith.constant 0 : index
    %104 = vector.load %arg4[%c2_106, %c1_107, %c0_108] : memref<5x5x48xf32, #tpu.memory_space<vmem>>, vector<1x1x48xf32>
    %105 = vector.shape_cast %104 : vector<1x1x48xf32> to vector<1x48xf32>
    %106 = vector.shape_cast %105 : vector<1x48xf32> to vector<1x1x48xf32>
    %107 = vector.broadcast %106 : vector<1x1x48xf32> to vector<8x8x48xf32>
    %108 = arith.mulf %103, %107 : vector<8x8x48xf32>
    %109 = arith.addf %102, %108 : vector<8x8x48xf32>
    %c2_109 = arith.constant 2 : index
    %c1_110 = arith.constant 1 : index
    %c0_111 = arith.constant 0 : index
    %110 = tpu.strided_load %arg14[%c2_109, %c1_110, %c0_111] {strides = array<i32: 2, 1, 1>} : memref<20x10x48xf32, #tpu.memory_space<vmem>>, vector<8x8x48xf32>
    %c2_112 = arith.constant 2 : index
    %c2_113 = arith.constant 2 : index
    %c0_114 = arith.constant 0 : index
    %111 = vector.load %arg4[%c2_112, %c2_113, %c0_114] : memref<5x5x48xf32, #tpu.memory_space<vmem>>, vector<1x1x48xf32>
    %112 = vector.shape_cast %111 : vector<1x1x48xf32> to vector<1x48xf32>
    %113 = vector.shape_cast %112 : vector<1x48xf32> to vector<1x1x48xf32>
    %114 = vector.broadcast %113 : vector<1x1x48xf32> to vector<8x8x48xf32>
    %115 = arith.mulf %110, %114 : vector<8x8x48xf32>
    %116 = arith.addf %109, %115 : vector<8x8x48xf32>
    %c2_115 = arith.constant 2 : index
    %c1_116 = arith.constant 1 : index
    %c0_117 = arith.constant 0 : index
    %117 = tpu.strided_load %arg15[%c2_115, %c1_116, %c0_117] {strides = array<i32: 2, 1, 1>} : memref<20x10x48xf32, #tpu.memory_space<vmem>>, vector<8x8x48xf32>
    %c2_118 = arith.constant 2 : index
    %c3_119 = arith.constant 3 : index
    %c0_120 = arith.constant 0 : index
    %118 = vector.load %arg4[%c2_118, %c3_119, %c0_120] : memref<5x5x48xf32, #tpu.memory_space<vmem>>, vector<1x1x48xf32>
    %119 = vector.shape_cast %118 : vector<1x1x48xf32> to vector<1x48xf32>
    %120 = vector.shape_cast %119 : vector<1x48xf32> to vector<1x1x48xf32>
    %121 = vector.broadcast %120 : vector<1x1x48xf32> to vector<8x8x48xf32>
    %122 = arith.mulf %117, %121 : vector<8x8x48xf32>
    %123 = arith.addf %116, %122 : vector<8x8x48xf32>
    %c2_121 = arith.constant 2 : index
    %c2_122 = arith.constant 2 : index
    %c0_123 = arith.constant 0 : index
    %124 = tpu.strided_load %arg14[%c2_121, %c2_122, %c0_123] {strides = array<i32: 2, 1, 1>} : memref<20x10x48xf32, #tpu.memory_space<vmem>>, vector<8x8x48xf32>
    %c2_124 = arith.constant 2 : index
    %c4_125 = arith.constant 4 : index
    %c0_126 = arith.constant 0 : index
    %125 = vector.load %arg4[%c2_124, %c4_125, %c0_126] : memref<5x5x48xf32, #tpu.memory_space<vmem>>, vector<1x1x48xf32>
    %126 = vector.shape_cast %125 : vector<1x1x48xf32> to vector<1x48xf32>
    %127 = vector.shape_cast %126 : vector<1x48xf32> to vector<1x1x48xf32>
    %128 = vector.broadcast %127 : vector<1x1x48xf32> to vector<8x8x48xf32>
    %129 = arith.mulf %124, %128 : vector<8x8x48xf32>
    %130 = arith.addf %123, %129 : vector<8x8x48xf32>
    %c3_127 = arith.constant 3 : index
    %c0_128 = arith.constant 0 : index
    %c0_129 = arith.constant 0 : index
    %131 = tpu.strided_load %arg14[%c3_127, %c0_128, %c0_129] {strides = array<i32: 2, 1, 1>} : memref<20x10x48xf32, #tpu.memory_space<vmem>>, vector<8x8x48xf32>
    %c3_130 = arith.constant 3 : index
    %c0_131 = arith.constant 0 : index
    %c0_132 = arith.constant 0 : index
    %132 = vector.load %arg4[%c3_130, %c0_131, %c0_132] : memref<5x5x48xf32, #tpu.memory_space<vmem>>, vector<1x1x48xf32>
    %133 = vector.shape_cast %132 : vector<1x1x48xf32> to vector<1x48xf32>
    %134 = vector.shape_cast %133 : vector<1x48xf32> to vector<1x1x48xf32>
    %135 = vector.broadcast %134 : vector<1x1x48xf32> to vector<8x8x48xf32>
    %136 = arith.mulf %131, %135 : vector<8x8x48xf32>
    %137 = arith.addf %130, %136 : vector<8x8x48xf32>
    %c3_133 = arith.constant 3 : index
    %c0_134 = arith.constant 0 : index
    %c0_135 = arith.constant 0 : index
    %138 = tpu.strided_load %arg15[%c3_133, %c0_134, %c0_135] {strides = array<i32: 2, 1, 1>} : memref<20x10x48xf32, #tpu.memory_space<vmem>>, vector<8x8x48xf32>
    %c3_136 = arith.constant 3 : index
    %c1_137 = arith.constant 1 : index
    %c0_138 = arith.constant 0 : index
    %139 = vector.load %arg4[%c3_136, %c1_137, %c0_138] : memref<5x5x48xf32, #tpu.memory_space<vmem>>, vector<1x1x48xf32>
    %140 = vector.shape_cast %139 : vector<1x1x48xf32> to vector<1x48xf32>
    %141 = vector.shape_cast %140 : vector<1x48xf32> to vector<1x1x48xf32>
    %142 = vector.broadcast %141 : vector<1x1x48xf32> to vector<8x8x48xf32>
    %143 = arith.mulf %138, %142 : vector<8x8x48xf32>
    %144 = arith.addf %137, %143 : vector<8x8x48xf32>
    %c3_139 = arith.constant 3 : index
    %c1_140 = arith.constant 1 : index
    %c0_141 = arith.constant 0 : index
    %145 = tpu.strided_load %arg14[%c3_139, %c1_140, %c0_141] {strides = array<i32: 2, 1, 1>} : memref<20x10x48xf32, #tpu.memory_space<vmem>>, vector<8x8x48xf32>
    %c3_142 = arith.constant 3 : index
    %c2_143 = arith.constant 2 : index
    %c0_144 = arith.constant 0 : index
    %146 = vector.load %arg4[%c3_142, %c2_143, %c0_144] : memref<5x5x48xf32, #tpu.memory_space<vmem>>, vector<1x1x48xf32>
    %147 = vector.shape_cast %146 : vector<1x1x48xf32> to vector<1x48xf32>
    %148 = vector.shape_cast %147 : vector<1x48xf32> to vector<1x1x48xf32>
    %149 = vector.broadcast %148 : vector<1x1x48xf32> to vector<8x8x48xf32>
    %150 = arith.mulf %145, %149 : vector<8x8x48xf32>
    %151 = arith.addf %144, %150 : vector<8x8x48xf32>
    %c3_145 = arith.constant 3 : index
    %c1_146 = arith.constant 1 : index
    %c0_147 = arith.constant 0 : index
    %152 = tpu.strided_load %arg15[%c3_145, %c1_146, %c0_147] {strides = array<i32: 2, 1, 1>} : memref<20x10x48xf32, #tpu.memory_space<vmem>>, vector<8x8x48xf32>
    %c3_148 = arith.constant 3 : index
    %c3_149 = arith.constant 3 : index
    %c0_150 = arith.constant 0 : index
    %153 = vector.load %arg4[%c3_148, %c3_149, %c0_150] : memref<5x5x48xf32, #tpu.memory_space<vmem>>, vector<1x1x48xf32>
    %154 = vector.shape_cast %153 : vector<1x1x48xf32> to vector<1x48xf32>
    %155 = vector.shape_cast %154 : vector<1x48xf32> to vector<1x1x48xf32>
    %156 = vector.broadcast %155 : vector<1x1x48xf32> to vector<8x8x48xf32>
    %157 = arith.mulf %152, %156 : vector<8x8x48xf32>
    %158 = arith.addf %151, %157 : vector<8x8x48xf32>
    %c3_151 = arith.constant 3 : index
    %c2_152 = arith.constant 2 : index
    %c0_153 = arith.constant 0 : index
    %159 = tpu.strided_load %arg14[%c3_151, %c2_152, %c0_153] {strides = array<i32: 2, 1, 1>} : memref<20x10x48xf32, #tpu.memory_space<vmem>>, vector<8x8x48xf32>
    %c3_154 = arith.constant 3 : index
    %c4_155 = arith.constant 4 : index
    %c0_156 = arith.constant 0 : index
    %160 = vector.load %arg4[%c3_154, %c4_155, %c0_156] : memref<5x5x48xf32, #tpu.memory_space<vmem>>, vector<1x1x48xf32>
    %161 = vector.shape_cast %160 : vector<1x1x48xf32> to vector<1x48xf32>
    %162 = vector.shape_cast %161 : vector<1x48xf32> to vector<1x1x48xf32>
    %163 = vector.broadcast %162 : vector<1x1x48xf32> to vector<8x8x48xf32>
    %164 = arith.mulf %159, %163 : vector<8x8x48xf32>
    %165 = arith.addf %158, %164 : vector<8x8x48xf32>
    %c4_157 = arith.constant 4 : index
    %c0_158 = arith.constant 0 : index
    %c0_159 = arith.constant 0 : index
    %166 = tpu.strided_load %arg14[%c4_157, %c0_158, %c0_159] {strides = array<i32: 2, 1, 1>} : memref<20x10x48xf32, #tpu.memory_space<vmem>>, vector<8x8x48xf32>
    %c4_160 = arith.constant 4 : index
    %c0_161 = arith.constant 0 : index
    %c0_162 = arith.constant 0 : index
    %167 = vector.load %arg4[%c4_160, %c0_161, %c0_162] : memref<5x5x48xf32, #tpu.memory_space<vmem>>, vector<1x1x48xf32>
    %168 = vector.shape_cast %167 : vector<1x1x48xf32> to vector<1x48xf32>
    %169 = vector.shape_cast %168 : vector<1x48xf32> to vector<1x1x48xf32>
    %170 = vector.broadcast %169 : vector<1x1x48xf32> to vector<8x8x48xf32>
    %171 = arith.mulf %166, %170 : vector<8x8x48xf32>
    %172 = arith.addf %165, %171 : vector<8x8x48xf32>
    %c4_163 = arith.constant 4 : index
    %c0_164 = arith.constant 0 : index
    %c0_165 = arith.constant 0 : index
    %173 = tpu.strided_load %arg15[%c4_163, %c0_164, %c0_165] {strides = array<i32: 2, 1, 1>} : memref<20x10x48xf32, #tpu.memory_space<vmem>>, vector<8x8x48xf32>
    %c4_166 = arith.constant 4 : index
    %c1_167 = arith.constant 1 : index
    %c0_168 = arith.constant 0 : index
    %174 = vector.load %arg4[%c4_166, %c1_167, %c0_168] : memref<5x5x48xf32, #tpu.memory_space<vmem>>, vector<1x1x48xf32>
    %175 = vector.shape_cast %174 : vector<1x1x48xf32> to vector<1x48xf32>
    %176 = vector.shape_cast %175 : vector<1x48xf32> to vector<1x1x48xf32>
    %177 = vector.broadcast %176 : vector<1x1x48xf32> to vector<8x8x48xf32>
    %178 = arith.mulf %173, %177 : vector<8x8x48xf32>
    %179 = arith.addf %172, %178 : vector<8x8x48xf32>
    %c4_169 = arith.constant 4 : index
    %c1_170 = arith.constant 1 : index
    %c0_171 = arith.constant 0 : index
    %180 = tpu.strided_load %arg14[%c4_169, %c1_170, %c0_171] {strides = array<i32: 2, 1, 1>} : memref<20x10x48xf32, #tpu.memory_space<vmem>>, vector<8x8x48xf32>
    %c4_172 = arith.constant 4 : index
    %c2_173 = arith.constant 2 : index
    %c0_174 = arith.constant 0 : index
    %181 = vector.load %arg4[%c4_172, %c2_173, %c0_174] : memref<5x5x48xf32, #tpu.memory_space<vmem>>, vector<1x1x48xf32>
    %182 = vector.shape_cast %181 : vector<1x1x48xf32> to vector<1x48xf32>
    %183 = vector.shape_cast %182 : vector<1x48xf32> to vector<1x1x48xf32>
    %184 = vector.broadcast %183 : vector<1x1x48xf32> to vector<8x8x48xf32>
    %185 = arith.mulf %180, %184 : vector<8x8x48xf32>
    %186 = arith.addf %179, %185 : vector<8x8x48xf32>
    %c4_175 = arith.constant 4 : index
    %c1_176 = arith.constant 1 : index
    %c0_177 = arith.constant 0 : index
    %187 = tpu.strided_load %arg15[%c4_175, %c1_176, %c0_177] {strides = array<i32: 2, 1, 1>} : memref<20x10x48xf32, #tpu.memory_space<vmem>>, vector<8x8x48xf32>
    %c4_178 = arith.constant 4 : index
    %c3_179 = arith.constant 3 : index
    %c0_180 = arith.constant 0 : index
    %188 = vector.load %arg4[%c4_178, %c3_179, %c0_180] : memref<5x5x48xf32, #tpu.memory_space<vmem>>, vector<1x1x48xf32>
    %189 = vector.shape_cast %188 : vector<1x1x48xf32> to vector<1x48xf32>
    %190 = vector.shape_cast %189 : vector<1x48xf32> to vector<1x1x48xf32>
    %191 = vector.broadcast %190 : vector<1x1x48xf32> to vector<8x8x48xf32>
    %192 = arith.mulf %187, %191 : vector<8x8x48xf32>
    %193 = arith.addf %186, %192 : vector<8x8x48xf32>
    %c4_181 = arith.constant 4 : index
    %c2_182 = arith.constant 2 : index
    %c0_183 = arith.constant 0 : index
    %194 = tpu.strided_load %arg14[%c4_181, %c2_182, %c0_183] {strides = array<i32: 2, 1, 1>} : memref<20x10x48xf32, #tpu.memory_space<vmem>>, vector<8x8x48xf32>
    %c4_184 = arith.constant 4 : index
    %c4_185 = arith.constant 4 : index
    %c0_186 = arith.constant 0 : index
    %195 = vector.load %arg4[%c4_184, %c4_185, %c0_186] : memref<5x5x48xf32, #tpu.memory_space<vmem>>, vector<1x1x48xf32>
    %196 = vector.shape_cast %195 : vector<1x1x48xf32> to vector<1x48xf32>
    %197 = vector.shape_cast %196 : vector<1x48xf32> to vector<1x1x48xf32>
    %198 = vector.broadcast %197 : vector<1x1x48xf32> to vector<8x8x48xf32>
    %199 = arith.mulf %194, %198 : vector<8x8x48xf32>
    %200 = arith.addf %193, %199 : vector<8x8x48xf32>
    %201 = vector.extract_strided_slice %200 {offsets = [0, 0, 0], sizes = [8, 8, 16], strides = [1, 1, 1]} : vector<8x8x48xf32> to vector<8x8x16xf32>
    %202 = vector.shape_cast %201 : vector<8x8x16xf32> to vector<64x16xf32>
    %c0_187 = arith.constant 0 : index
    %c0_188 = arith.constant 0 : index
    %203 = vector.load %arg5[%c0_187, %c0_188] : memref<16x32xf32, #tpu.memory_space<vmem>>, vector<16x32xf32>
    %cst_189 = arith.constant dense<0.000000e+00> : vector<64x32xf32>
    %204 = tpu.matmul %202, %203, %cst_189 {dimension_numbers = #tpu.dot_dimension_numbers<[1], [0], [0], [1], [0, 0, 1, 1], [], []>} : vector<64x16xf32>, vector<16x32xf32>, vector<64x32xf32> -> vector<64x32xf32>
    %c0_190 = arith.constant 0 : index
    %c0_191 = arith.constant 0 : index
    %205 = vector.load %arg6[%c0_190, %c0_191] : memref<1x32xf32, #tpu.memory_space<vmem>>, vector<1x32xf32>
    %206 = vector.broadcast %205 : vector<1x32xf32> to vector<64x32xf32>
    %207 = arith.addf %204, %206 : vector<64x32xf32>
    %cst_192 = arith.constant 0.000000e+00 : f32
    %208 = vector.broadcast %cst_192 : f32 to vector<64x32xf32>
    %209 = arith.maximumf %207, %208 : vector<64x32xf32>
    %210 = vector.shape_cast %209 : vector<64x32xf32> to vector<8x8x32xf32>
    %211 = vector.extract_strided_slice %200 {offsets = [0, 0, 16], sizes = [8, 8, 32], strides = [1, 1, 1]} : vector<8x8x48xf32> to vector<8x8x32xf32>
    %c0_193 = arith.constant 0 : index
    %c0_194 = arith.constant 0 : index
    %c0_195 = arith.constant 0 : index
    %212 = vector.load %arg7[%c0_193, %c0_194, %c0_195] : memref<1x1x32xf32, #tpu.memory_space<vmem>>, vector<1x1x32xf32>
    %213 = vector.broadcast %212 : vector<1x1x32xf32> to vector<8x8x32xf32>
    %214 = arith.addf %211, %213 : vector<8x8x32xf32>
    %215 = arith.addf %210, %214 : vector<8x8x32xf32>
    %216 = vector.shape_cast %215 : vector<8x8x32xf32> to vector<64x32xf32>
    %c0_196 = arith.constant 0 : index
    %c0_197 = arith.constant 0 : index
    %217 = vector.load %arg8[%c0_196, %c0_197] : memref<32x32xf32, #tpu.memory_space<vmem>>, vector<32x32xf32>
    %cst_198 = arith.constant dense<0.000000e+00> : vector<64x32xf32>
    %218 = tpu.matmul %216, %217, %cst_198 {dimension_numbers = #tpu.dot_dimension_numbers<[1], [0], [0], [1], [0, 0, 1, 1], [], []>} : vector<64x32xf32>, vector<32x32xf32>, vector<64x32xf32> -> vector<64x32xf32>
    %c0_199 = arith.constant 0 : index
    %c0_200 = arith.constant 0 : index
    %219 = vector.load %arg9[%c0_199, %c0_200] : memref<1x32xf32, #tpu.memory_space<vmem>>, vector<1x32xf32>
    %220 = vector.broadcast %219 : vector<1x32xf32> to vector<64x32xf32>
    %221 = arith.addf %218, %220 : vector<64x32xf32>
    %222 = tpu.iota {dimensions = array<i32: 1>} : vector<1x32xi32>
    %c2_i32 = arith.constant 2 : i32
    %c0_i32 = arith.constant 0 : i32
    %223 = arith.cmpi eq, %c2_i32, %c0_i32 : i32
    %c1_i32 = arith.constant 1 : i32
    %224 = arith.select %223, %c1_i32, %c2_i32 : i32
    %225 = vector.broadcast %224 : i32 to vector<1x32xi32>
    %226 = arith.remsi %222, %225 : vector<1x32xi32>
    %c0_i32_201 = arith.constant 0 : i32
    %227 = vector.broadcast %c0_i32_201 : i32 to vector<1x32xi32>
    %228 = arith.cmpi ne, %226, %227 : vector<1x32xi32>
    %c0_i32_202 = arith.constant 0 : i32
    %229 = vector.broadcast %c0_i32_202 : i32 to vector<1x32xi32>
    %230 = arith.cmpi slt, %226, %229 : vector<1x32xi32>
    %c0_i32_203 = arith.constant 0 : i32
    %231 = arith.cmpi slt, %224, %c0_i32_203 : i32
    %232 = vector.broadcast %231 : i1 to vector<1x32xi1>
    %233 = vector.broadcast %232 : vector<1x32xi1> to vector<1x32xi1>
    %234 = arith.xori %230, %233 : vector<1x32xi1>
    %235 = arith.andi %234, %228 : vector<1x32xi1>
    %236 = vector.broadcast %224 : i32 to vector<1x32xi32>
    %237 = arith.addi %226, %236 : vector<1x32xi32>
    %238 = arith.select %235, %237, %226 : vector<1x32xi1>, vector<1x32xi32>
    %c1_i32_204 = arith.constant 1 : i32
    %239 = vector.broadcast %c1_i32_204 : i32 to vector<1x32xi32>
    %240 = arith.cmpi eq, %238, %239 : vector<1x32xi32>
    %cst_205 = arith.constant 0.000000e+00 : f32
    %241 = vector.broadcast %cst_205 : f32 to vector<64x32xf32>
    %242 = arith.maximumf %221, %241 : vector<64x32xf32>
    %243 = vector.shape_cast %240 : vector<1x32xi1> to vector<1x32xi1>
    %244 = vector.broadcast %243 : vector<1x32xi1> to vector<64x32xi1>
    %245 = arith.select %244, %242, %221 : vector<64x32xi1>, vector<64x32xf32>
    %246 = vector.shape_cast %245 : vector<64x32xf32> to vector<8x8x32xf32>
    %cst_206 = arith.constant 0.000000e+00 : f32
    %247 = vector.broadcast %cst_206 : f32 to vector<2x384xf32>
    %c0_207 = arith.constant 0 : index
    %c0_208 = arith.constant 0 : index
    %248 = vector.load %arg16[%c0_207, %c0_208] : memref<12x384xf32, #tpu.memory_space<vmem>>, vector<2x384xf32>
    tpu.vector_store %arg16[%c0_207, %c0_208], %247 {strides = array<i32>} : memref<12x384xf32, #tpu.memory_space<vmem>>, vector<2x384xf32>,
    %cst_209 = arith.constant 0.000000e+00 : f32
    %249 = vector.broadcast %cst_209 : f32 to vector<2x384xf32>
    %c10 = arith.constant 10 : index
    %c0_210 = arith.constant 0 : index
    %250 = vector.load %arg16[%c10, %c0_210] : memref<12x384xf32, #tpu.memory_space<vmem>>, vector<2x384xf32>
    tpu.vector_store %arg16[%c10, %c0_210], %249 {strides = array<i32>} : memref<12x384xf32, #tpu.memory_space<vmem>>, vector<2x384xf32>,
    %cst_211 = arith.constant 0.000000e+00 : f32
    %251 = vector.broadcast %cst_211 : f32 to vector<8x64xf32>
    %c2_212 = arith.constant 2 : index
    %c0_213 = arith.constant 0 : index
    %252 = vector.load %arg16[%c2_212, %c0_213] : memref<12x384xf32, #tpu.memory_space<vmem>>, vector<8x64xf32>
    tpu.vector_store %arg16[%c2_212, %c0_213], %251 {strides = array<i32>} : memref<12x384xf32, #tpu.memory_space<vmem>>, vector<8x64xf32>,
    %cst_214 = arith.constant 0.000000e+00 : f32
    %253 = vector.broadcast %cst_214 : f32 to vector<8x64xf32>
    %c2_215 = arith.constant 2 : index
    %c320 = arith.constant 320 : index
    %254 = vector.load %arg16[%c2_215, %c320] : memref<12x384xf32, #tpu.memory_space<vmem>>, vector<8x64xf32>
    tpu.vector_store %arg16[%c2_215, %c320], %253 {strides = array<i32>} : memref<12x384xf32, #tpu.memory_space<vmem>>, vector<8x64xf32>,
    %255 = vector.extract_strided_slice %246 {offsets = [0, 0, 0], sizes = [8, 1, 32], strides = [1, 1, 1]} : vector<8x8x32xf32> to vector<8x1x32xf32>
    %256 = vector.shape_cast %255 : vector<8x1x32xf32> to vector<8x32xf32>
    %c2_216 = arith.constant 2 : index
    %c64 = arith.constant 64 : index
    %257 = vector.load %arg16[%c2_216, %c64] : memref<12x384xf32, #tpu.memory_space<vmem>>, vector<8x32xf32>
    tpu.vector_store %arg16[%c2_216, %c64], %256 {strides = array<i32>} : memref<12x384xf32, #tpu.memory_space<vmem>>, vector<8x32xf32>,
    %258 = vector.extract_strided_slice %246 {offsets = [0, 1, 0], sizes = [8, 1, 32], strides = [1, 1, 1]} : vector<8x8x32xf32> to vector<8x1x32xf32>
    %259 = vector.shape_cast %258 : vector<8x1x32xf32> to vector<8x32xf32>
    %c2_217 = arith.constant 2 : index
    %c96 = arith.constant 96 : index
    %260 = vector.load %arg16[%c2_217, %c96] : memref<12x384xf32, #tpu.memory_space<vmem>>, vector<8x32xf32>
    tpu.vector_store %arg16[%c2_217, %c96], %259 {strides = array<i32>} : memref<12x384xf32, #tpu.memory_space<vmem>>, vector<8x32xf32>,
    %261 = vector.extract_strided_slice %246 {offsets = [0, 2, 0], sizes = [8, 1, 32], strides = [1, 1, 1]} : vector<8x8x32xf32> to vector<8x1x32xf32>
    %262 = vector.shape_cast %261 : vector<8x1x32xf32> to vector<8x32xf32>
    %c2_218 = arith.constant 2 : index
    %c128 = arith.constant 128 : index
    %263 = vector.load %arg16[%c2_218, %c128] : memref<12x384xf32, #tpu.memory_space<vmem>>, vector<8x32xf32>
    tpu.vector_store %arg16[%c2_218, %c128], %262 {strides = array<i32>} : memref<12x384xf32, #tpu.memory_space<vmem>>, vector<8x32xf32>,
    %264 = vector.extract_strided_slice %246 {offsets = [0, 3, 0], sizes = [8, 1, 32], strides = [1, 1, 1]} : vector<8x8x32xf32> to vector<8x1x32xf32>
    %265 = vector.shape_cast %264 : vector<8x1x32xf32> to vector<8x32xf32>
    %c2_219 = arith.constant 2 : index
    %c160 = arith.constant 160 : index
    %266 = vector.load %arg16[%c2_219, %c160] : memref<12x384xf32, #tpu.memory_space<vmem>>, vector<8x32xf32>
    tpu.vector_store %arg16[%c2_219, %c160], %265 {strides = array<i32>} : memref<12x384xf32, #tpu.memory_space<vmem>>, vector<8x32xf32>,
    %267 = vector.extract_strided_slice %246 {offsets = [0, 4, 0], sizes = [8, 1, 32], strides = [1, 1, 1]} : vector<8x8x32xf32> to vector<8x1x32xf32>
    %268 = vector.shape_cast %267 : vector<8x1x32xf32> to vector<8x32xf32>
    %c2_220 = arith.constant 2 : index
    %c192 = arith.constant 192 : index
    %269 = vector.load %arg16[%c2_220, %c192] : memref<12x384xf32, #tpu.memory_space<vmem>>, vector<8x32xf32>
    tpu.vector_store %arg16[%c2_220, %c192], %268 {strides = array<i32>} : memref<12x384xf32, #tpu.memory_space<vmem>>, vector<8x32xf32>,
    %270 = vector.extract_strided_slice %246 {offsets = [0, 5, 0], sizes = [8, 1, 32], strides = [1, 1, 1]} : vector<8x8x32xf32> to vector<8x1x32xf32>
    %271 = vector.shape_cast %270 : vector<8x1x32xf32> to vector<8x32xf32>
    %c2_221 = arith.constant 2 : index
    %c224 = arith.constant 224 : index
    %272 = vector.load %arg16[%c2_221, %c224] : memref<12x384xf32, #tpu.memory_space<vmem>>, vector<8x32xf32>
    tpu.vector_store %arg16[%c2_221, %c224], %271 {strides = array<i32>} : memref<12x384xf32, #tpu.memory_space<vmem>>, vector<8x32xf32>,
    %273 = vector.extract_strided_slice %246 {offsets = [0, 6, 0], sizes = [8, 1, 32], strides = [1, 1, 1]} : vector<8x8x32xf32> to vector<8x1x32xf32>
    %274 = vector.shape_cast %273 : vector<8x1x32xf32> to vector<8x32xf32>
    %c2_222 = arith.constant 2 : index
    %c256 = arith.constant 256 : index
    %275 = vector.load %arg16[%c2_222, %c256] : memref<12x384xf32, #tpu.memory_space<vmem>>, vector<8x32xf32>
    tpu.vector_store %arg16[%c2_222, %c256], %274 {strides = array<i32>} : memref<12x384xf32, #tpu.memory_space<vmem>>, vector<8x32xf32>,
    %276 = vector.extract_strided_slice %246 {offsets = [0, 7, 0], sizes = [8, 1, 32], strides = [1, 1, 1]} : vector<8x8x32xf32> to vector<8x1x32xf32>
    %277 = vector.shape_cast %276 : vector<8x1x32xf32> to vector<8x32xf32>
    %c2_223 = arith.constant 2 : index
    %c288 = arith.constant 288 : index
    %278 = vector.load %arg16[%c2_223, %c288] : memref<12x384xf32, #tpu.memory_space<vmem>>, vector<8x32xf32>
    tpu.vector_store %arg16[%c2_223, %c288], %277 {strides = array<i32>} : memref<12x384xf32, #tpu.memory_space<vmem>>, vector<8x32xf32>,
    %cst_224 = arith.constant 0.000000e+00 : f32
    %279 = vector.broadcast %cst_224 : f32 to vector<8x256xf32>
    %c0_225 = arith.constant 0 : index
    %c0_226 = arith.constant 0 : index
    %280 = vector.load %arg16[%c0_225, %c0_226] : memref<12x384xf32, #tpu.memory_space<vmem>>, vector<8x256xf32>
    %c0_227 = arith.constant 0 : index
    %c0_228 = arith.constant 0 : index
    %c0_229 = arith.constant 0 : index
    %281 = vector.load %arg10[%c0_227, %c0_228, %c0_229] : memref<5x5x256xf32, #tpu.memory_space<vmem>>, vector<1x1x256xf32>
    %282 = vector.shape_cast %281 : vector<1x1x256xf32> to vector<1x256xf32>
    %283 = vector.broadcast %282 : vector<1x256xf32> to vector<8x256xf32>
    %284 = arith.mulf %280, %283 : vector<8x256xf32>
    %285 = arith.addf %279, %284 : vector<8x256xf32>
    %c0_230 = arith.constant 0 : index
    %c32 = arith.constant 32 : index
    %286 = vector.load %arg16[%c0_230, %c32] : memref<12x384xf32, #tpu.memory_space<vmem>>, vector<8x256xf32>
    %c0_231 = arith.constant 0 : index
    %c1_232 = arith.constant 1 : index
    %c0_233 = arith.constant 0 : index
    %287 = vector.load %arg10[%c0_231, %c1_232, %c0_233] : memref<5x5x256xf32, #tpu.memory_space<vmem>>, vector<1x1x256xf32>
    %288 = vector.shape_cast %287 : vector<1x1x256xf32> to vector<1x256xf32>
    %289 = vector.broadcast %288 : vector<1x256xf32> to vector<8x256xf32>
    %290 = arith.mulf %286, %289 : vector<8x256xf32>
    %291 = arith.addf %285, %290 : vector<8x256xf32>
    %c0_234 = arith.constant 0 : index
    %c64_235 = arith.constant 64 : index
    %292 = vector.load %arg16[%c0_234, %c64_235] : memref<12x384xf32, #tpu.memory_space<vmem>>, vector<8x256xf32>
    %c0_236 = arith.constant 0 : index
    %c2_237 = arith.constant 2 : index
    %c0_238 = arith.constant 0 : index
    %293 = vector.load %arg10[%c0_236, %c2_237, %c0_238] : memref<5x5x256xf32, #tpu.memory_space<vmem>>, vector<1x1x256xf32>
    %294 = vector.shape_cast %293 : vector<1x1x256xf32> to vector<1x256xf32>
    %295 = vector.broadcast %294 : vector<1x256xf32> to vector<8x256xf32>
    %296 = arith.mulf %292, %295 : vector<8x256xf32>
    %297 = arith.addf %291, %296 : vector<8x256xf32>
    %c0_239 = arith.constant 0 : index
    %c96_240 = arith.constant 96 : index
    %298 = vector.load %arg16[%c0_239, %c96_240] : memref<12x384xf32, #tpu.memory_space<vmem>>, vector<8x256xf32>
    %c0_241 = arith.constant 0 : index
    %c3_242 = arith.constant 3 : index
    %c0_243 = arith.constant 0 : index
    %299 = vector.load %arg10[%c0_241, %c3_242, %c0_243] : memref<5x5x256xf32, #tpu.memory_space<vmem>>, vector<1x1x256xf32>
    %300 = vector.shape_cast %299 : vector<1x1x256xf32> to vector<1x256xf32>
    %301 = vector.broadcast %300 : vector<1x256xf32> to vector<8x256xf32>
    %302 = arith.mulf %298, %301 : vector<8x256xf32>
    %303 = arith.addf %297, %302 : vector<8x256xf32>
    %c0_244 = arith.constant 0 : index
    %c128_245 = arith.constant 128 : index
    %304 = vector.load %arg16[%c0_244, %c128_245] : memref<12x384xf32, #tpu.memory_space<vmem>>, vector<8x256xf32>
    %c0_246 = arith.constant 0 : index
    %c4_247 = arith.constant 4 : index
    %c0_248 = arith.constant 0 : index
    %305 = vector.load %arg10[%c0_246, %c4_247, %c0_248] : memref<5x5x256xf32, #tpu.memory_space<vmem>>, vector<1x1x256xf32>
    %306 = vector.shape_cast %305 : vector<1x1x256xf32> to vector<1x256xf32>
    %307 = vector.broadcast %306 : vector<1x256xf32> to vector<8x256xf32>
    %308 = arith.mulf %304, %307 : vector<8x256xf32>
    %309 = arith.addf %303, %308 : vector<8x256xf32>
    %c1_249 = arith.constant 1 : index
    %c0_250 = arith.constant 0 : index
    %310 = vector.load %arg16[%c1_249, %c0_250] : memref<12x384xf32, #tpu.memory_space<vmem>>, vector<8x256xf32>
    %c1_251 = arith.constant 1 : index
    %c0_252 = arith.constant 0 : index
    %c0_253 = arith.constant 0 : index
    %311 = vector.load %arg10[%c1_251, %c0_252, %c0_253] : memref<5x5x256xf32, #tpu.memory_space<vmem>>, vector<1x1x256xf32>
    %312 = vector.shape_cast %311 : vector<1x1x256xf32> to vector<1x256xf32>
    %313 = vector.broadcast %312 : vector<1x256xf32> to vector<8x256xf32>
    %314 = arith.mulf %310, %313 : vector<8x256xf32>
    %315 = arith.addf %309, %314 : vector<8x256xf32>
    %c1_254 = arith.constant 1 : index
    %c32_255 = arith.constant 32 : index
    %316 = vector.load %arg16[%c1_254, %c32_255] : memref<12x384xf32, #tpu.memory_space<vmem>>, vector<8x256xf32>
    %c1_256 = arith.constant 1 : index
    %c1_257 = arith.constant 1 : index
    %c0_258 = arith.constant 0 : index
    %317 = vector.load %arg10[%c1_256, %c1_257, %c0_258] : memref<5x5x256xf32, #tpu.memory_space<vmem>>, vector<1x1x256xf32>
    %318 = vector.shape_cast %317 : vector<1x1x256xf32> to vector<1x256xf32>
    %319 = vector.broadcast %318 : vector<1x256xf32> to vector<8x256xf32>
    %320 = arith.mulf %316, %319 : vector<8x256xf32>
    %321 = arith.addf %315, %320 : vector<8x256xf32>
    %c1_259 = arith.constant 1 : index
    %c64_260 = arith.constant 64 : index
    %322 = vector.load %arg16[%c1_259, %c64_260] : memref<12x384xf32, #tpu.memory_space<vmem>>, vector<8x256xf32>
    %c1_261 = arith.constant 1 : index
    %c2_262 = arith.constant 2 : index
    %c0_263 = arith.constant 0 : index
    %323 = vector.load %arg10[%c1_261, %c2_262, %c0_263] : memref<5x5x256xf32, #tpu.memory_space<vmem>>, vector<1x1x256xf32>
    %324 = vector.shape_cast %323 : vector<1x1x256xf32> to vector<1x256xf32>
    %325 = vector.broadcast %324 : vector<1x256xf32> to vector<8x256xf32>
    %326 = arith.mulf %322, %325 : vector<8x256xf32>
    %327 = arith.addf %321, %326 : vector<8x256xf32>
    %c1_264 = arith.constant 1 : index
    %c96_265 = arith.constant 96 : index
    %328 = vector.load %arg16[%c1_264, %c96_265] : memref<12x384xf32, #tpu.memory_space<vmem>>, vector<8x256xf32>
    %c1_266 = arith.constant 1 : index
    %c3_267 = arith.constant 3 : index
    %c0_268 = arith.constant 0 : index
    %329 = vector.load %arg10[%c1_266, %c3_267, %c0_268] : memref<5x5x256xf32, #tpu.memory_space<vmem>>, vector<1x1x256xf32>
    %330 = vector.shape_cast %329 : vector<1x1x256xf32> to vector<1x256xf32>
    %331 = vector.broadcast %330 : vector<1x256xf32> to vector<8x256xf32>
    %332 = arith.mulf %328, %331 : vector<8x256xf32>
    %333 = arith.addf %327, %332 : vector<8x256xf32>
    %c1_269 = arith.constant 1 : index
    %c128_270 = arith.constant 128 : index
    %334 = vector.load %arg16[%c1_269, %c128_270] : memref<12x384xf32, #tpu.memory_space<vmem>>, vector<8x256xf32>
    %c1_271 = arith.constant 1 : index
    %c4_272 = arith.constant 4 : index
    %c0_273 = arith.constant 0 : index
    %335 = vector.load %arg10[%c1_271, %c4_272, %c0_273] : memref<5x5x256xf32, #tpu.memory_space<vmem>>, vector<1x1x256xf32>
    %336 = vector.shape_cast %335 : vector<1x1x256xf32> to vector<1x256xf32>
    %337 = vector.broadcast %336 : vector<1x256xf32> to vector<8x256xf32>
    %338 = arith.mulf %334, %337 : vector<8x256xf32>
    %339 = arith.addf %333, %338 : vector<8x256xf32>
    %c2_274 = arith.constant 2 : index
    %c0_275 = arith.constant 0 : index
    %340 = vector.load %arg16[%c2_274, %c0_275] : memref<12x384xf32, #tpu.memory_space<vmem>>, vector<8x256xf32>
    %c2_276 = arith.constant 2 : index
    %c0_277 = arith.constant 0 : index
    %c0_278 = arith.constant 0 : index
    %341 = vector.load %arg10[%c2_276, %c0_277, %c0_278] : memref<5x5x256xf32, #tpu.memory_space<vmem>>, vector<1x1x256xf32>
    %342 = vector.shape_cast %341 : vector<1x1x256xf32> to vector<1x256xf32>
    %343 = vector.broadcast %342 : vector<1x256xf32> to vector<8x256xf32>
    %344 = arith.mulf %340, %343 : vector<8x256xf32>
    %345 = arith.addf %339, %344 : vector<8x256xf32>
    %c2_279 = arith.constant 2 : index
    %c32_280 = arith.constant 32 : index
    %346 = vector.load %arg16[%c2_279, %c32_280] : memref<12x384xf32, #tpu.memory_space<vmem>>, vector<8x256xf32>
    %c2_281 = arith.constant 2 : index
    %c1_282 = arith.constant 1 : index
    %c0_283 = arith.constant 0 : index
    %347 = vector.load %arg10[%c2_281, %c1_282, %c0_283] : memref<5x5x256xf32, #tpu.memory_space<vmem>>, vector<1x1x256xf32>
    %348 = vector.shape_cast %347 : vector<1x1x256xf32> to vector<1x256xf32>
    %349 = vector.broadcast %348 : vector<1x256xf32> to vector<8x256xf32>
    %350 = arith.mulf %346, %349 : vector<8x256xf32>
    %351 = arith.addf %345, %350 : vector<8x256xf32>
    %c2_284 = arith.constant 2 : index
    %c64_285 = arith.constant 64 : index
    %352 = vector.load %arg16[%c2_284, %c64_285] : memref<12x384xf32, #tpu.memory_space<vmem>>, vector<8x256xf32>
    %c2_286 = arith.constant 2 : index
    %c2_287 = arith.constant 2 : index
    %c0_288 = arith.constant 0 : index
    %353 = vector.load %arg10[%c2_286, %c2_287, %c0_288] : memref<5x5x256xf32, #tpu.memory_space<vmem>>, vector<1x1x256xf32>
    %354 = vector.shape_cast %353 : vector<1x1x256xf32> to vector<1x256xf32>
    %355 = vector.broadcast %354 : vector<1x256xf32> to vector<8x256xf32>
    %356 = arith.mulf %352, %355 : vector<8x256xf32>
    %357 = arith.addf %351, %356 : vector<8x256xf32>
    %c2_289 = arith.constant 2 : index
    %c96_290 = arith.constant 96 : index
    %358 = vector.load %arg16[%c2_289, %c96_290] : memref<12x384xf32, #tpu.memory_space<vmem>>, vector<8x256xf32>
    %c2_291 = arith.constant 2 : index
    %c3_292 = arith.constant 3 : index
    %c0_293 = arith.constant 0 : index
    %359 = vector.load %arg10[%c2_291, %c3_292, %c0_293] : memref<5x5x256xf32, #tpu.memory_space<vmem>>, vector<1x1x256xf32>
    %360 = vector.shape_cast %359 : vector<1x1x256xf32> to vector<1x256xf32>
    %361 = vector.broadcast %360 : vector<1x256xf32> to vector<8x256xf32>
    %362 = arith.mulf %358, %361 : vector<8x256xf32>
    %363 = arith.addf %357, %362 : vector<8x256xf32>
    %c2_294 = arith.constant 2 : index
    %c128_295 = arith.constant 128 : index
    %364 = vector.load %arg16[%c2_294, %c128_295] : memref<12x384xf32, #tpu.memory_space<vmem>>, vector<8x256xf32>
    %c2_296 = arith.constant 2 : index
    %c4_297 = arith.constant 4 : index
    %c0_298 = arith.constant 0 : index
    %365 = vector.load %arg10[%c2_296, %c4_297, %c0_298] : memref<5x5x256xf32, #tpu.memory_space<vmem>>, vector<1x1x256xf32>
    %366 = vector.shape_cast %365 : vector<1x1x256xf32> to vector<1x256xf32>
    %367 = vector.broadcast %366 : vector<1x256xf32> to vector<8x256xf32>
    %368 = arith.mulf %364, %367 : vector<8x256xf32>
    %369 = arith.addf %363, %368 : vector<8x256xf32>
    %c3_299 = arith.constant 3 : index
    %c0_300 = arith.constant 0 : index
    %370 = vector.load %arg16[%c3_299, %c0_300] : memref<12x384xf32, #tpu.memory_space<vmem>>, vector<8x256xf32>
    %c3_301 = arith.constant 3 : index
    %c0_302 = arith.constant 0 : index
    %c0_303 = arith.constant 0 : index
    %371 = vector.load %arg10[%c3_301, %c0_302, %c0_303] : memref<5x5x256xf32, #tpu.memory_space<vmem>>, vector<1x1x256xf32>
    %372 = vector.shape_cast %371 : vector<1x1x256xf32> to vector<1x256xf32>
    %373 = vector.broadcast %372 : vector<1x256xf32> to vector<8x256xf32>
    %374 = arith.mulf %370, %373 : vector<8x256xf32>
    %375 = arith.addf %369, %374 : vector<8x256xf32>
    %c3_304 = arith.constant 3 : index
    %c32_305 = arith.constant 32 : index
    %376 = vector.load %arg16[%c3_304, %c32_305] : memref<12x384xf32, #tpu.memory_space<vmem>>, vector<8x256xf32>
    %c3_306 = arith.constant 3 : index
    %c1_307 = arith.constant 1 : index
    %c0_308 = arith.constant 0 : index
    %377 = vector.load %arg10[%c3_306, %c1_307, %c0_308] : memref<5x5x256xf32, #tpu.memory_space<vmem>>, vector<1x1x256xf32>
    %378 = vector.shape_cast %377 : vector<1x1x256xf32> to vector<1x256xf32>
    %379 = vector.broadcast %378 : vector<1x256xf32> to vector<8x256xf32>
    %380 = arith.mulf %376, %379 : vector<8x256xf32>
    %381 = arith.addf %375, %380 : vector<8x256xf32>
    %c3_309 = arith.constant 3 : index
    %c64_310 = arith.constant 64 : index
    %382 = vector.load %arg16[%c3_309, %c64_310] : memref<12x384xf32, #tpu.memory_space<vmem>>, vector<8x256xf32>
    %c3_311 = arith.constant 3 : index
    %c2_312 = arith.constant 2 : index
    %c0_313 = arith.constant 0 : index
    %383 = vector.load %arg10[%c3_311, %c2_312, %c0_313] : memref<5x5x256xf32, #tpu.memory_space<vmem>>, vector<1x1x256xf32>
    %384 = vector.shape_cast %383 : vector<1x1x256xf32> to vector<1x256xf32>
    %385 = vector.broadcast %384 : vector<1x256xf32> to vector<8x256xf32>
    %386 = arith.mulf %382, %385 : vector<8x256xf32>
    %387 = arith.addf %381, %386 : vector<8x256xf32>
    %c3_314 = arith.constant 3 : index
    %c96_315 = arith.constant 96 : index
    %388 = vector.load %arg16[%c3_314, %c96_315] : memref<12x384xf32, #tpu.memory_space<vmem>>, vector<8x256xf32>
    %c3_316 = arith.constant 3 : index
    %c3_317 = arith.constant 3 : index
    %c0_318 = arith.constant 0 : index
    %389 = vector.load %arg10[%c3_316, %c3_317, %c0_318] : memref<5x5x256xf32, #tpu.memory_space<vmem>>, vector<1x1x256xf32>
    %390 = vector.shape_cast %389 : vector<1x1x256xf32> to vector<1x256xf32>
    %391 = vector.broadcast %390 : vector<1x256xf32> to vector<8x256xf32>
    %392 = arith.mulf %388, %391 : vector<8x256xf32>
    %393 = arith.addf %387, %392 : vector<8x256xf32>
    %c3_319 = arith.constant 3 : index
    %c128_320 = arith.constant 128 : index
    %394 = vector.load %arg16[%c3_319, %c128_320] : memref<12x384xf32, #tpu.memory_space<vmem>>, vector<8x256xf32>
    %c3_321 = arith.constant 3 : index
    %c4_322 = arith.constant 4 : index
    %c0_323 = arith.constant 0 : index
    %395 = vector.load %arg10[%c3_321, %c4_322, %c0_323] : memref<5x5x256xf32, #tpu.memory_space<vmem>>, vector<1x1x256xf32>
    %396 = vector.shape_cast %395 : vector<1x1x256xf32> to vector<1x256xf32>
    %397 = vector.broadcast %396 : vector<1x256xf32> to vector<8x256xf32>
    %398 = arith.mulf %394, %397 : vector<8x256xf32>
    %399 = arith.addf %393, %398 : vector<8x256xf32>
    %c4_324 = arith.constant 4 : index
    %c0_325 = arith.constant 0 : index
    %400 = vector.load %arg16[%c4_324, %c0_325] : memref<12x384xf32, #tpu.memory_space<vmem>>, vector<8x256xf32>
    %c4_326 = arith.constant 4 : index
    %c0_327 = arith.constant 0 : index
    %c0_328 = arith.constant 0 : index
    %401 = vector.load %arg10[%c4_326, %c0_327, %c0_328] : memref<5x5x256xf32, #tpu.memory_space<vmem>>, vector<1x1x256xf32>
    %402 = vector.shape_cast %401 : vector<1x1x256xf32> to vector<1x256xf32>
    %403 = vector.broadcast %402 : vector<1x256xf32> to vector<8x256xf32>
    %404 = arith.mulf %400, %403 : vector<8x256xf32>
    %405 = arith.addf %399, %404 : vector<8x256xf32>
    %c4_329 = arith.constant 4 : index
    %c32_330 = arith.constant 32 : index
    %406 = vector.load %arg16[%c4_329, %c32_330] : memref<12x384xf32, #tpu.memory_space<vmem>>, vector<8x256xf32>
    %c4_331 = arith.constant 4 : index
    %c1_332 = arith.constant 1 : index
    %c0_333 = arith.constant 0 : index
    %407 = vector.load %arg10[%c4_331, %c1_332, %c0_333] : memref<5x5x256xf32, #tpu.memory_space<vmem>>, vector<1x1x256xf32>
    %408 = vector.shape_cast %407 : vector<1x1x256xf32> to vector<1x256xf32>
    %409 = vector.broadcast %408 : vector<1x256xf32> to vector<8x256xf32>
    %410 = arith.mulf %406, %409 : vector<8x256xf32>
    %411 = arith.addf %405, %410 : vector<8x256xf32>
    %c4_334 = arith.constant 4 : index
    %c64_335 = arith.constant 64 : index
    %412 = vector.load %arg16[%c4_334, %c64_335] : memref<12x384xf32, #tpu.memory_space<vmem>>, vector<8x256xf32>
    %c4_336 = arith.constant 4 : index
    %c2_337 = arith.constant 2 : index
    %c0_338 = arith.constant 0 : index
    %413 = vector.load %arg10[%c4_336, %c2_337, %c0_338] : memref<5x5x256xf32, #tpu.memory_space<vmem>>, vector<1x1x256xf32>
    %414 = vector.shape_cast %413 : vector<1x1x256xf32> to vector<1x256xf32>
    %415 = vector.broadcast %414 : vector<1x256xf32> to vector<8x256xf32>
    %416 = arith.mulf %412, %415 : vector<8x256xf32>
    %417 = arith.addf %411, %416 : vector<8x256xf32>
    %c4_339 = arith.constant 4 : index
    %c96_340 = arith.constant 96 : index
    %418 = vector.load %arg16[%c4_339, %c96_340] : memref<12x384xf32, #tpu.memory_space<vmem>>, vector<8x256xf32>
    %c4_341 = arith.constant 4 : index
    %c3_342 = arith.constant 3 : index
    %c0_343 = arith.constant 0 : index
    %419 = vector.load %arg10[%c4_341, %c3_342, %c0_343] : memref<5x5x256xf32, #tpu.memory_space<vmem>>, vector<1x1x256xf32>
    %420 = vector.shape_cast %419 : vector<1x1x256xf32> to vector<1x256xf32>
    %421 = vector.broadcast %420 : vector<1x256xf32> to vector<8x256xf32>
    %422 = arith.mulf %418, %421 : vector<8x256xf32>
    %423 = arith.addf %417, %422 : vector<8x256xf32>
    %c4_344 = arith.constant 4 : index
    %c128_345 = arith.constant 128 : index
    %424 = vector.load %arg16[%c4_344, %c128_345] : memref<12x384xf32, #tpu.memory_space<vmem>>, vector<8x256xf32>
    %c4_346 = arith.constant 4 : index
    %c4_347 = arith.constant 4 : index
    %c0_348 = arith.constant 0 : index
    %425 = vector.load %arg10[%c4_346, %c4_347, %c0_348] : memref<5x5x256xf32, #tpu.memory_space<vmem>>, vector<1x1x256xf32>
    %426 = vector.shape_cast %425 : vector<1x1x256xf32> to vector<1x256xf32>
    %427 = vector.broadcast %426 : vector<1x256xf32> to vector<8x256xf32>
    %428 = arith.mulf %424, %427 : vector<8x256xf32>
    %429 = arith.addf %423, %428 : vector<8x256xf32>
    %c0_349 = arith.constant 0 : index
    %c0_350 = arith.constant 0 : index
    %430 = vector.load %arg11[%c0_349, %c0_350] : memref<1x256xf32, #tpu.memory_space<vmem>>, vector<1x256xf32>
    %431 = vector.broadcast %430 : vector<1x256xf32> to vector<8x256xf32>
    %432 = arith.addf %429, %431 : vector<8x256xf32>
    %c0_351 = arith.constant 0 : index
    %c0_352 = arith.constant 0 : index
    %c0_353 = arith.constant 0 : index
    %433 = vector.load %arg12[%c0_351, %c0_352, %c0_353] : memref<1x8x256xf32, #tpu.memory_space<vmem>>, vector<1x8x256xf32>
    %434 = vector.shape_cast %433 : vector<1x8x256xf32> to vector<8x256xf32>
    %435 = vector.shape_cast %432 : vector<8x256xf32> to vector<1x8x256xf32>
    tpu.vector_store %arg12[%c0_351, %c0_352, %c0_353], %435 {strides = array<i32>} : memref<1x8x256xf32, #tpu.memory_space<vmem>>, vector<1x8x256xf32>,
    return
  }
  func.func @transform_0(%arg0: i32) -> (i32, i32, i32, i32) {
    %c0_i32 = arith.constant 0 : i32
    %c0_i32_0 = arith.constant 0 : i32
    %c0_i32_1 = arith.constant 0 : i32
    %c0_i32_2 = arith.constant 0 : i32
    return %arg0, %c0_i32, %c0_i32_0, %c0_i32_1 : i32, i32, i32, i32
  }
  func.func @transform_1(%arg0: i32) -> (i32, i32) {
    %c0_i32 = arith.constant 0 : i32
    %c0_i32_0 = arith.constant 0 : i32
    %c0_i32_1 = arith.constant 0 : i32
    return %c0_i32, %c0_i32_0 : i32, i32
  }
  func.func @transform_2(%arg0: i32) -> (i32, i32) {
    %c0_i32 = arith.constant 0 : i32
    %c0_i32_0 = arith.constant 0 : i32
    %c0_i32_1 = arith.constant 0 : i32
    return %c0_i32, %c0_i32_0 : i32, i32
  }
  func.func @transform_3(%arg0: i32) -> (i32, i32, i32) {
    %c0_i32 = arith.constant 0 : i32
    %c0_i32_0 = arith.constant 0 : i32
    %c0_i32_1 = arith.constant 0 : i32
    %c0_i32_2 = arith.constant 0 : i32
    return %c0_i32, %c0_i32_0, %c0_i32_1 : i32, i32, i32
  }
  func.func @transform_4(%arg0: i32) -> (i32, i32) {
    %c0_i32 = arith.constant 0 : i32
    %c0_i32_0 = arith.constant 0 : i32
    %c0_i32_1 = arith.constant 0 : i32
    return %c0_i32, %c0_i32_0 : i32, i32
  }
  func.func @transform_5(%arg0: i32) -> (i32, i32) {
    %c0_i32 = arith.constant 0 : i32
    %c0_i32_0 = arith.constant 0 : i32
    %c0_i32_1 = arith.constant 0 : i32
    return %c0_i32, %c0_i32_0 : i32, i32
  }
  func.func @transform_6(%arg0: i32) -> (i32, i32, i32) {
    %c0_i32 = arith.constant 0 : i32
    %c0_i32_0 = arith.constant 0 : i32
    %c0_i32_1 = arith.constant 0 : i32
    %c0_i32_2 = arith.constant 0 : i32
    return %c0_i32, %c0_i32_0, %c0_i32_1 : i32, i32, i32
  }
  func.func @transform_7(%arg0: i32) -> (i32, i32) {
    %c0_i32 = arith.constant 0 : i32
    %c0_i32_0 = arith.constant 0 : i32
    %c0_i32_1 = arith.constant 0 : i32
    return %c0_i32, %c0_i32_0 : i32, i32
  }
  func.func @transform_8(%arg0: i32) -> (i32, i32) {
    %c0_i32 = arith.constant 0 : i32
    %c0_i32_0 = arith.constant 0 : i32
    %c0_i32_1 = arith.constant 0 : i32
    return %c0_i32, %c0_i32_0 : i32, i32
  }
  func.func @transform_9(%arg0: i32) -> (i32, i32, i32) {
    %c0_i32 = arith.constant 0 : i32
    %c0_i32_0 = arith.constant 0 : i32
    %c0_i32_1 = arith.constant 0 : i32
    %c0_i32_2 = arith.constant 0 : i32
    return %c0_i32, %c0_i32_0, %c0_i32_1 : i32, i32, i32
  }
  func.func @transform_10(%arg0: i32) -> (i32, i32) {
    %c0_i32 = arith.constant 0 : i32
    %c0_i32_0 = arith.constant 0 : i32
    %c0_i32_1 = arith.constant 0 : i32
    return %c0_i32, %c0_i32_0 : i32, i32
  }
  func.func @transform_11(%arg0: i32) -> (i32, i32, i32) {
    %c0_i32 = arith.constant 0 : i32
    %c0_i32_0 = arith.constant 0 : i32
    %c0_i32_1 = arith.constant 0 : i32
    return %arg0, %c0_i32, %c0_i32_0 : i32, i32, i32
  }
}

</mosaic_0001>

<bundles_post_ra>
// kernel: tile.19
= control target key start
LH: loop header
LB: loop body
LE: loop exit
PB: predicated region body
PF: predicated region fallthrough
CT: control target
= control target key end

     0   :  { %s7_s6 = smov 3  ;;  %s14_s9 = smov 3  ;;  %vm4_vm0 = vcmask 261120   ;;  %vm11_vm1 = vcmask 1048320   ;;  %vm18_vm2 = vcmask 785920   ;;  %vm25_vm3 = vcmask 523520   ;;  %s76_s0 = inlined_call_operand.vmem [shape: f32[8,32], index: 0, kind: input, shape index: {}]   ;;  %s77_s1 = inlined_call_operand.vmem [shape: f32[1,256], index: 1, kind: output, shape index: {}]  }
   0x1   :  { %v38_v0 = vld [vmem:[%s76_s0 + $0x3] ss:$4 sm:%s7_s6]   ;;  %s45_s10 = smov 96   ;;  %s21_s11 = smov 3  ;;  %v39_v1 = vld [vmem:[%s76_s0 + $0x2] ss:$4 sm:%s14_s9]  }
   0x2   :  { %9 = vrot.lane.b32.xlu0 %v38_v0, %s45_s10  ;;  %v40_v2 = vld [vmem:[%s76_s0 + $0x1] ss:$4 sm:%s21_s11]   ;;  %s2_s16 = smov 3  ;;  %s46_s17 = smov 32  }
   0x3   :  { %23 = vrot.lane.b32.xlu1 %v40_v2, %s46_s17  ;;  %v3_v3 = vld [vmem:[%s76_s0] ss:$4 sm:%s2_s16]   ;;  %s47_s0 = smov 64  }
   0x4   :  { %5 = vst.msk [vmem:[#allocation0] ss:$8 sm:$0x3] %vm4_vm0, %v3_v3  }
   0x6   :  { %16 = vrot.lane.b32.xlu0 %v39_v1, %s47_s0 }
  0x74   :  { %v10_v4 = vpop.permute.xlu0 %9  }
  0x75   :  { %12 = vst.msk [vmem:[#allocation0] ss:$8 sm:$0x3] %vm11_vm1, %v10_v4   ;;  %v24_v5 = vpop.permute.xlu1 %23  }
  0x78   :  { %v17_v6 = vpop.permute.xlu0 %16  }
  0x79   :  { %19 = vst.msk [vmem:[#allocation0] ss:$8 sm:$0x3] %vm18_vm2, %v17_v6  }
  0x7a   :  { %26 = vst.msk [vmem:[#allocation0] ss:$8 sm:$0x3] %vm25_vm3, %v24_v5  }
  0x81   :  { %v30_v7 = vld [vmem:[#allocation0] sm:$0x1]  ;;  %v34_v8 = vld [vmem:[#allocation0 + $0x8] sm:$0x1] }
  0x82   :  { %32 = vst [vmem:[%s77_s1] sm:$0x1] %v30_v7  ;;  %41 = vst [vmem:[%s77_s1 + $0x1] sm:$0x1] %v34_v8 }

// kernel: tile.18
= control target key start
LH: loop header
LB: loop body
LE: loop exit
PB: predicated region body
PF: predicated region fallthrough
CT: control target
= control target key end

     0   :  { %s22_s0 = inlined_call_operand.vmem [shape: f32[32], index: 0, kind: input, shape index: {}]   ;;  %s23_s1 = inlined_call_operand.vmem [shape: f32[8,32], index: 1, kind: output, shape index: {}]  }
   0x1   :  { %v4_v0 = vld [vmem:[%s22_s0] ss:$0 sm:$0xff] }
   0x2   :  { %5 = vst [vmem:[%s23_s1] sm:$0xff] %v4_v0 }

// kernel: tile.14
= control target key start
LH: loop header
LB: loop body
LE: loop exit
PB: predicated region body
PF: predicated region fallthrough
CT: control target
= control target key end

     0   :  { %s72_s6 = smov 48  ;;  %vm74_vm0 = vcmask 1045508   ;;  %s77_s7 = smov 192  ;;  %vm79_vm1 = vcmask 1047558   ;;  %vm129_vm2 = vcmask 1046531   ;;  %vm133_vm3 = vcmask 1047559   ;;  %s1120_s0 = inlined_call_operand.vmem [shape: f32[5,5,8,32], index: 0, kind: input, shape index: {}]   ;;  %s1121_s1 = inlined_call_operand.vmem [shape: f32[5,5,256], index: 1, kind: output, shape index: {}]  }
   0x1   :  { %v465_v0 = vld [vmem:[%s1120_s0 + $0x3] ss:$8 sm:$0xf]   ;;  %v467_v3 = vld [vmem:[%s1120_s0 - $0x21] ss:$8 sm:%s77_s7]   ;;  %s109_s16 = smov 48 }
   0x2   :  { %v466_v1 = vld [vmem:[%s1120_s0 + $0x93] ss:$-28 sm:%s72_s6]   ;;  %s114_s19 = smov 192  ;;  %s570_s22 = smov 96   ;;  %vm168_vm4 = vcmask 1045506   ;;  %vm3_vm5 = vcmask 261120  }
   0x3   :  { %v75_v2 = vsel %vm74_vm0, %v466_v1, %v465_v0  ;;  %v474_v4 = vld [vmem:[%s1120_s0 + $0xa3] ss:$8 sm:$0xf]   ;;  %v476_v9 = vld [vmem:[%s1120_s0 + $0x7f] ss:$8 sm:%s114_s19]   ;;  %s90_s25 = smov 48 }
   0x4   :  { %v80_v5 = vsel %vm79_vm1, %v467_v3, %v75_v2  ;;  %v475_v6 = vld [vmem:[%s1120_s0 + $0x133] ss:$-28 sm:%s109_s16]   ;;  %s95_s26 = smov 192  ;;  %s164_s4 = smov 3  ;;  %v515_v50 = vld [vmem:[%s1120_s0 + $0x27] sm:$0x80]  }
   0x5   :  { %v469_v7 = vld [vmem:[%s1120_s0 + $0x53] ss:$8 sm:$0xf]   ;;  %81 = vrot.lane.b32.xlu0 %v80_v5, %s570_s22  ;;  %v112_v8 = vsel %vm74_vm0, %v475_v6, %v474_v4  ;;  %v481_v10 = vld [vmem:[%s1120_s0 + $0x28] sm:$0x80]   ;;  %s171_s17 = smov 192 }
   0x6   :  { %v117_v11 = vsel %vm79_vm1, %v476_v9, %v112_v8  ;;  %v470_v12 = vld [vmem:[%s1120_s0 + $0xe3] ss:$-28 sm:%s90_s25]   ;;  %s185_s18 = smov 3  ;;  %s195_s24 = smov 48  ;;  %v521_v55 = vld [vmem:[%s1120_s0 + $0x77] sm:$0x80]  }
   0x7   :  { %v471_v13 = vld [vmem:[%s1120_s0 + $0x2f] ss:$8 sm:%s95_s26]   ;;  %118 = vrot.lane.b32.xlu1 %v117_v11, %s570_s22  ;;  %v93_v14 = vsel %vm74_vm0, %v470_v12, %v469_v7  ;;  %v480_v16 = vld [vmem:[%s1120_s0 + $0x1b] ss:$8 sm:$0x78]   ;;  %s200_s27 = smov 192 }
   0x8   :  { %v479_v15 = vld.sshfl [vmem:[%s1120_s0 + $0x1f] sm:$0xff pattern:$0xcccccc80]   ;;  %v98_v17 = vsel %vm79_vm1, %v471_v13, %v93_v14  ;;  %v485_v19 = vld.sshfl [vmem:[%s1120_s0 + $0x6f] sm:$0xff pattern:$0xcccccc80]  }
   0x9   :  { %v130_v18 = vsel %vm129_vm2, %v480_v16, %v479_v15  ;;  %v486_v20 = vld [vmem:[%s1120_s0 + $0x6b] ss:$8 sm:$0x78]   ;;  %99 = vrot.lane.b32.xlu0 %v98_v17, %s570_s22  ;;  %v487_v23 = vld [vmem:[%s1120_s0 + $0x78] sm:$0x80]   ;;  %s213_s5 = smov 48 }
   0xa   :  { %v134_v21 = vsel %vm133_vm3, %v481_v10, %v130_v18  ;;  %v149_v22 = vsel %vm129_vm2, %v486_v20, %v485_v19  ;;  %v491_v24 = vld [vmem:[%s1120_s0 + $0xbf] ss:$8 sm:%s164_s4]   ;;  %v499_v29 = vld [vmem:[%s1120_s0 + $0x2] ss:$8 sm:$0xf]   ;;  %s218_s10 = smov 192 }
   0xb   :  { %v153_v25 = vsel %vm133_vm3, %v487_v23, %v149_v22  ;;  %v492_v26 = vld [vmem:[%s1120_s0 + $0x27] ss:$8 sm:$0x3c]   ;;  %135 = vrot.lane.b32.xlu1 %v134_v21, %s570_s22  ;;  %v500_v32 = vld [vmem:[%s1120_s0 + $0x92] ss:$-28 sm:%s195_s24]   ;;  %s232_s15 = smov 48 }
   0xc   :  { %v493_v27 = vld [vmem:[%s1120_s0 + $0x57] ss:$8 sm:%s171_s17]   ;;  %v169_v28 = vsel %vm168_vm4, %v492_v26, %v491_v24  ;;  %v501_v33 = vld [vmem:[%s1120_s0 - $0x22] ss:$8 sm:%s200_s27]   ;;  %v198_v34 = vsel %vm74_vm0, %v500_v32, %v499_v29  ;;  %s287_s25 = smov 3  ;;  %s571_s30 = smov 64  }
   0xd   :  { %v174_v30 = vsel %vm79_vm1, %v493_v27, %v169_v28  ;;  %v497_v31 = vld [vmem:[%s1120_s0 + $0x97] ss:$8 sm:%s185_s18]   ;;  %154 = vrot.lane.b32.xlu0 %v153_v25, %s570_s22  ;;  %v503_v35 = vld [vmem:[%s1120_s0 + $0x52] ss:$8 sm:$0xf]   ;;  %s237_s18 = smov 192  ;;  %v203_v41 = vsel %vm79_vm1, %v501_v33, %v198_v34 }
   0xe   :  { %v504_v36 = vld [vmem:[%s1120_s0 + $0xe2] ss:$-28 sm:%s213_s5]   ;;  %s294_s8 = smov 192  ;;  %s318_s11 = smov 48  ;;  %v2_v14 = vld [vmem:[%s1120_s0] ss:$4 sm:$0xff]  }
   0xf   :  { %v505_v37 = vld [vmem:[%s1120_s0 + $0x2e] ss:$8 sm:%s218_s10]   ;;  %v508_v38 = vld [vmem:[%s1120_s0 + $0xa2] ss:$8 sm:$0xf]   ;;  %175 = vrot.lane.b32.xlu1 %v174_v30, %s570_s22  ;;  %v216_v39 = vsel %vm74_vm0, %v504_v36, %v503_v35  ;;  %s323_s12 = smov 192 }
  0x10   :  { %v509_v40 = vld [vmem:[%s1120_s0 + $0x132] ss:$-28 sm:%s232_s15]   ;;  %v221_v46 = vsel %vm79_vm1, %v505_v37, %v216_v39  ;;  %s308_s15 = smov 3  ;;  %s336_s16 = smov 48  ;;  %v534_v61 = vld [vmem:[%s1120_s0 + $0x91] ss:$-28 sm:%s318_s11]  }
  0x11   :  { %v513_v42 = vld.sshfl [vmem:[%s1120_s0 + $0x1e] sm:$0xff pattern:$0xcccccc80]   ;;  %187 = vrot.lane.b32.xlu0 %v497_v31, %s570_s22  ;;  %v235_v44 = vsel %vm74_vm0, %v509_v40, %v508_v38  ;;  %v519_v47 = vld.sshfl [vmem:[%s1120_s0 + $0x6e] sm:$0xff pattern:$0xcccccc80]  }
  0x12   :  { %v514_v43 = vld [vmem:[%s1120_s0 + $0x1a] ss:$8 sm:$0x78]   ;;  %v510_v45 = vld [vmem:[%s1120_s0 + $0x7e] ss:$8 sm:%s237_s18]   ;;  %s341_s21 = smov 192 }
  0x13   :  { %v520_v48 = vld [vmem:[%s1120_s0 + $0x6a] ss:$8 sm:$0x78]   ;;  %204 = vrot.lane.b32.xlu1 %v203_v41, %s571_s30  ;;  %v253_v49 = vsel %vm129_vm2, %v514_v43, %v513_v42  ;;  %v240_v51 = vsel %vm79_vm1, %v510_v45, %v235_v44  ;;  %v525_v52 = vld [vmem:[%s1120_s0 + $0xbe] ss:$8 sm:%s287_s25]   ;;  %s355_s24 = smov 48 }
  0x14   :  { %v526_v53 = vld [vmem:[%s1120_s0 + $0x26] ss:$8 sm:$0x3c]   ;;  %v272_v54 = vsel %vm129_vm2, %v520_v48, %v519_v47  ;;  %v257_v56 = vsel %vm133_vm3, %v515_v50, %v253_v49  ;;  %v533_v60 = vld [vmem:[%s1120_s0 + $0x1] ss:$8 sm:$0xf]  }
  0x15   :  { %222 = vrot.lane.b32.xlu0 %v221_v46, %s571_s30  ;;  %v292_v57 = vsel %vm168_vm4, %v526_v53, %v525_v52  ;;  %v527_v58 = vld [vmem:[%s1120_s0 + $0x56] ss:$8 sm:%s294_s8]   ;;  %v276_v59 = vsel %vm133_vm3, %v521_v55, %v272_v54  ;;  %v537_v1 = vld [vmem:[%s1120_s0 + $0x51] ss:$8 sm:$0xf]   ;;  %v321_v3 = vsel %vm74_vm0, %v534_v61, %v533_v60  ;;  %s360_s7 = smov 192 }
  0x16   :  { %v535_v62 = vld [vmem:[%s1120_s0 - $0x23] ss:$8 sm:%s323_s12]   ;;  %v297_v63 = vsel %vm79_vm1, %v527_v58, %v292_v57  ;;  %v531_v0 = vld [vmem:[%s1120_s0 + $0x96] ss:$8 sm:%s308_s15]   ;;  %s766_s14 = smov 3  ;;  %s64_s15 = smov 3 }
  0x17   :  { %241 = vrot.lane.b32.xlu1 %v240_v51, %s571_s30  ;;  %v538_v2 = vld [vmem:[%s1120_s0 + $0xe1] ss:$-28 sm:%s336_s16]   ;;  %v326_v10 = vsel %vm79_vm1, %v535_v62, %v321_v3  ;;  %v441_v15 = vld [vmem:[%s1120_s0 + $0x20] ss:$4 sm:$0xff]   ;;  %s431_s12 = smov 3  ;;  %vm83_vm6 = vcmask 1048320  }
  0x18   :  { %v539_v4 = vld [vmem:[%s1120_s0 + $0x2d] ss:$8 sm:%s341_s21]   ;;  %v542_v5 = vld [vmem:[%s1120_s0 + $0xa1] ss:$8 sm:$0xf]   ;;  %v339_v8 = vsel %vm74_vm0, %v538_v2, %v537_v1  ;;  %s572_s21 = smov 32  }
  0x19   :  { %258 = vrot.lane.b32.xlu0 %v257_v56, %s571_s30  ;;  %v543_v6 = vld [vmem:[%s1120_s0 + $0x131] ss:$-28 sm:%s355_s24]   ;;  %440 = vst.msk [vmem:[%s1121_s1 - $0x2d] ss:$8 sm:$0xc0] %vm3_vm5, %v2_v14   ;;  %v344_v20 = vsel %vm79_vm1, %v539_v4, %v339_v8  ;;  %vm206_vm7 = vcmask 785920  }
  0x1a   :  { %v547_v7 = vld.sshfl [vmem:[%s1120_s0 + $0x1d] sm:$0xff pattern:$0xcccccc80]   ;;  %v553_v12 = vld.sshfl [vmem:[%s1120_s0 + $0x6d] sm:$0xff pattern:$0xcccccc80]   ;;  %v358_v16 = vsel %vm74_vm0, %v543_v6, %v542_v5 }
  0x1b   :  { %277 = vrot.lane.b32.xlu1 %v276_v59, %s571_s30  ;;  %v548_v9 = vld [vmem:[%s1120_s0 + $0x19] ss:$8 sm:$0x78]   ;;  %v544_v11 = vld [vmem:[%s1120_s0 + $0x7d] ss:$8 sm:%s360_s7]   ;;  %vm329_vm8 = vcmask 523520  }
  0x1c   :  { %v554_v13 = vld [vmem:[%s1120_s0 + $0x69] ss:$8 sm:$0x78]   ;;  %442 = vst.msk [vmem:[%s1121_s1 + $0x4] ss:$8 sm:$0x3] %vm3_vm5, %v441_v15   ;;  %v376_v23 = vsel %vm129_vm2, %v548_v9, %v547_v7  ;;  %v363_v25 = vsel %vm79_vm1, %v544_v11, %v358_v16 }
  0x1d   :  { %298 = vrot.lane.b32.xlu0 %v297_v63, %s571_s30  ;;  %16 = vst.msk [vmem:[%s1121_s1] ss:$8 sm:$0xc] %vm3_vm5, %v441_v15   ;;  %443 = vst.msk [vmem:[%s1121_s1 - $0xf] ss:$8 sm:$0x30] %vm3_vm5, %v441_v15   ;;  %v395_v28 = vsel %vm129_vm2, %v554_v13, %v553_v12 }
  0x1e   :  { %444 = vst.msk [vmem:[%s1121_s1 - $0x1e] ss:$8 sm:$0xc0] %vm3_vm5, %v441_v15   ;;  %4 = vst.msk [vmem:[%s1121_s1] ss:$8 sm:$0x3] %vm3_vm5, %v2_v14  }
  0x1f   :  { %310 = vrot.lane.b32.xlu1 %v531_v0, %s571_s30  ;;  %438 = vst.msk [vmem:[%s1121_s1 - $0xf] ss:$8 sm:$0xc] %vm3_vm5, %v2_v14   ;;  %439 = vst.msk [vmem:[%s1121_s1 - $0x1e] ss:$8 sm:$0x30] %vm3_vm5, %v2_v14  }
  0x20   :  { %v449_v17 = vld [vmem:[%s1120_s0 + $0x60] ss:$4 sm:$0xff]   ;;  %v549_v24 = vld [vmem:[%s1120_s0 + $0x26] sm:$0x80]   ;;  %v555_v29 = vld [vmem:[%s1120_s0 + $0x76] sm:$0x80]  }
  0x21   :  { %v453_v18 = vld [vmem:[%s1120_s0 + $0x80] ss:$4 sm:$0xff]   ;;  %450 = vst.msk [vmem:[%s1121_s1 + $0x22] ss:$8 sm:$0x3] %vm3_vm5, %v449_v17   ;;  %327 = vrot.lane.b32.xlu0 %v326_v10, %s572_s21  ;;  %v380_v30 = vsel %vm133_vm3, %v549_v24, %v376_v23  ;;  %v399_v33 = vsel %vm133_vm3, %v555_v29, %v395_v28 }
  0x22   :  { %v458_v19 = vld [vmem:[%s1120_s0 + $0xa0] ss:$4 sm:$0xff]   ;;  %451 = vst.msk [vmem:[%s1121_s1 + $0x13] ss:$8 sm:$0xc] %vm3_vm5, %v449_v17  }
  0x23   :  { %452 = vst.msk [vmem:[%s1121_s1 + $0x4] ss:$8 sm:$0x30] %vm3_vm5, %v449_v17   ;;  %40 = vst.msk [vmem:[%s1121_s1] ss:$8 sm:$0xc0] %vm3_vm5, %v449_v17   ;;  %345 = vrot.lane.b32.xlu1 %v344_v20, %s572_s21 }
  0x24   :  { %454 = vst.msk [vmem:[%s1121_s1 + $0x31] ss:$8 sm:$0x3] %vm3_vm5, %v453_v18   ;;  %455 = vst.msk [vmem:[%s1121_s1 + $0x22] ss:$8 sm:$0xc] %vm3_vm5, %v453_v18  }
  0x25   :  { %462 = vst.msk [vmem:[%s1121_s1 + $0x13] ss:$8 sm:$0xc0] %vm3_vm5, %v458_v19   ;;  %v463_v21 = vld [vmem:[%s1120_s0 + $0xc0] ss:$4 sm:%s64_s15]   ;;  %s417_s15 = smov 192  ;;  %364 = vrot.lane.b32.xlu0 %v363_v25, %s572_s21 }
  0x26   :  { %456 = vst.msk [vmem:[%s1121_s1 + $0x13] ss:$8 sm:$0x30] %vm3_vm5, %v453_v18   ;;  %457 = vst.msk [vmem:[%s1121_s1 + $0x4] ss:$8 sm:$0xc0] %vm3_vm5, %v453_v18  }
  0x27   :  { %459 = vst.msk [vmem:[%s1121_s1 + $0x40] ss:$8 sm:$0x3] %vm3_vm5, %v458_v19   ;;  %460 = vst.msk [vmem:[%s1121_s1 + $0x31] ss:$8 sm:$0xc] %vm3_vm5, %v458_v19   ;;  %381 = vrot.lane.b32.xlu1 %v380_v30, %s572_s21 }
  0x28   :  { %461 = vst.msk [vmem:[%s1121_s1 + $0x22] ss:$8 sm:$0x30] %vm3_vm5, %v458_v19   ;;  %v445_v22 = vld [vmem:[%s1120_s0 + $0x40] ss:$4 sm:$0xff]  }
  0x29   :  { %464 = vst.msk [vmem:[%s1121_s1 + $0x44] ss:$8 sm:$0x3] %vm3_vm5, %v463_v21   ;;  %28 = vst.msk [vmem:[%s1121_s1] ss:$8 sm:$0x30] %vm3_vm5, %v445_v22   ;;  %400 = vrot.lane.b32.xlu0 %v399_v33, %s572_s21 }
  0x2a   :  { %448 = vst.msk [vmem:[%s1121_s1 - $0xf] ss:$8 sm:$0xc0] %vm3_vm5, %v445_v22   ;;  %446 = vst.msk [vmem:[%s1121_s1 + $0x13] ss:$8 sm:$0x3] %vm3_vm5, %v445_v22  }
  0x2b   :  { %447 = vst.msk [vmem:[%s1121_s1 + $0x4] ss:$8 sm:$0xc] %vm3_vm5, %v445_v22   ;;  %v559_v26 = vld [vmem:[%s1120_s0 + $0xbd] ss:$8 sm:%s766_s14]  }
  0x2c   :  { %v560_v27 = vld [vmem:[%s1120_s0 + $0x25] ss:$8 sm:$0x3c]  }
  0x2d   :  { %v415_v31 = vsel %vm168_vm4, %v560_v27, %v559_v26  ;;  %v561_v32 = vld [vmem:[%s1120_s0 + $0x55] ss:$8 sm:%s417_s15]  }
  0x2e   :  { %v420_v34 = vsel %vm79_vm1, %v561_v32, %v415_v31  ;;  %v565_v35 = vld [vmem:[%s1120_s0 + $0x95] ss:$8 sm:%s431_s12]  }
  0x2f   :  { %421 = vrot.lane.b32.xlu1 %v420_v34, %s572_s21  ;;  %433 = vrot.lane.b32.xlu0 %v565_v35, %s572_s21 }
  0x77   :  { %v82_v36 = vpop.permute.xlu0 %81  }
  0x78   :  { %84 = vst.msk [vmem:[%s1121_s1] sm:$0x1f] %vm83_vm6, %v82_v36   ;;  %468 = vst.msk [vmem:[%s1121_s1 + $0x3] sm:$0xe0] %vm83_vm6, %v82_v36  }
  0x79   :  { %v119_v37 = vpop.permute.xlu1 %118  }
  0x7a   :  { %477 = vst.msk [vmem:[%s1121_s1 + $0x40] sm:$0x1f] %vm83_vm6, %v119_v37   ;;  %478 = vst.msk [vmem:[%s1121_s1 + $0x43] sm:$0xe0] %vm83_vm6, %v119_v37  }
  0x7b   :  { %v100_v38 = vpop.permute.xlu0 %99  }
  0x7c   :  { %472 = vst.msk [vmem:[%s1121_s1 + $0x20] sm:$0x1f] %vm83_vm6, %v100_v38   ;;  %473 = vst.msk [vmem:[%s1121_s1 + $0x23] sm:$0xe0] %vm83_vm6, %v100_v38  }
  0x7d   :  { %v136_v39 = vpop.permute.xlu1 %135  }
  0x7e   :  { %482 = vst.msk [vmem:[%s1121_s1 + $0xb] sm:$0x3] %vm83_vm6, %v136_v39   ;;  %484 = vst.msk [vmem:[%s1121_s1 + $0x11] sm:$0x80] %vm83_vm6, %v136_v39  }
  0x7f   :  { %483 = vst.msk [vmem:[%s1121_s1 + $0xe] sm:$0x7c] %vm83_vm6, %v136_v39   ;;  %v155_v40 = vpop.permute.xlu0 %154  }
  0x80   :  { %488 = vst.msk [vmem:[%s1121_s1 + $0x2b] sm:$0x3] %vm83_vm6, %v155_v40   ;;  %490 = vst.msk [vmem:[%s1121_s1 + $0x31] sm:$0x80] %vm83_vm6, %v155_v40  }
  0x81   :  { %489 = vst.msk [vmem:[%s1121_s1 + $0x2e] sm:$0x7c] %vm83_vm6, %v155_v40   ;;  %v176_v41 = vpop.permute.xlu1 %175  }
  0x82   :  { %494 = vst.msk [vmem:[%s1121_s1 + $0x4b] sm:$0x3] %vm83_vm6, %v176_v41   ;;  %496 = vst.msk [vmem:[%s1121_s1 + $0x33] sm:$0xc0] %vm83_vm6, %v176_v41  }
  0x83   :  { %495 = vst.msk [vmem:[%s1121_s1 + $0x17] sm:$0x3c] %vm83_vm6, %v176_v41   ;;  %v188_v42 = vpop.permute.xlu0 %187  }
  0x84   :  { %498 = vst.msk [vmem:[%s1121_s1 + $0x3b] sm:$0x3] %vm83_vm6, %v188_v42  }
  0x85   :  { %v205_v43 = vpop.permute.xlu1 %204  }
  0x86   :  { %207 = vst.msk [vmem:[%s1121_s1] sm:$0x1f] %vm206_vm7, %v205_v43   ;;  %502 = vst.msk [vmem:[%s1121_s1 + $0x3] sm:$0xe0] %vm206_vm7, %v205_v43  }
  0x87   :  { %v223_v44 = vpop.permute.xlu0 %222  }
  0x88   :  { %506 = vst.msk [vmem:[%s1121_s1 + $0x20] sm:$0x1f] %vm206_vm7, %v223_v44   ;;  %507 = vst.msk [vmem:[%s1121_s1 + $0x23] sm:$0xe0] %vm206_vm7, %v223_v44  }
  0x89   :  { %v242_v45 = vpop.permute.xlu1 %241  }
  0x8a   :  { %511 = vst.msk [vmem:[%s1121_s1 + $0x40] sm:$0x1f] %vm206_vm7, %v242_v45   ;;  %512 = vst.msk [vmem:[%s1121_s1 + $0x43] sm:$0xe0] %vm206_vm7, %v242_v45  }
  0x8b   :  { %v259_v46 = vpop.permute.xlu0 %258  }
  0x8c   :  { %516 = vst.msk [vmem:[%s1121_s1 + $0xb] sm:$0x3] %vm206_vm7, %v259_v46   ;;  %517 = vst.msk [vmem:[%s1121_s1 + $0xe] sm:$0x7c] %vm206_vm7, %v259_v46  }
  0x8d   :  { %518 = vst.msk [vmem:[%s1121_s1 + $0x11] sm:$0x80] %vm206_vm7, %v259_v46   ;;  %v278_v47 = vpop.permute.xlu1 %277  }
  0x8e   :  { %522 = vst.msk [vmem:[%s1121_s1 + $0x2b] sm:$0x3] %vm206_vm7, %v278_v47   ;;  %523 = vst.msk [vmem:[%s1121_s1 + $0x2e] sm:$0x7c] %vm206_vm7, %v278_v47  }
  0x8f   :  { %524 = vst.msk [vmem:[%s1121_s1 + $0x31] sm:$0x80] %vm206_vm7, %v278_v47   ;;  %v299_v48 = vpop.permute.xlu0 %298  }
  0x90   :  { %528 = vst.msk [vmem:[%s1121_s1 + $0x4b] sm:$0x3] %vm206_vm7, %v299_v48   ;;  %529 = vst.msk [vmem:[%s1121_s1 + $0x17] sm:$0x3c] %vm206_vm7, %v299_v48  }
  0x91   :  { %530 = vst.msk [vmem:[%s1121_s1 + $0x33] sm:$0xc0] %vm206_vm7, %v299_v48   ;;  %v311_v49 = vpop.permute.xlu1 %310  }
  0x92   :  { %532 = vst.msk [vmem:[%s1121_s1 + $0x3b] sm:$0x3] %vm206_vm7, %v311_v49  }
  0x93   :  { %v328_v50 = vpop.permute.xlu0 %327  }
  0x94   :  { %330 = vst.msk [vmem:[%s1121_s1] sm:$0x1f] %vm329_vm8, %v328_v50   ;;  %536 = vst.msk [vmem:[%s1121_s1 + $0x3] sm:$0xe0] %vm329_vm8, %v328_v50  }
  0x95   :  { %v346_v51 = vpop.permute.xlu1 %345  }
  0x96   :  { %540 = vst.msk [vmem:[%s1121_s1 + $0x20] sm:$0x1f] %vm329_vm8, %v346_v51   ;;  %541 = vst.msk [vmem:[%s1121_s1 + $0x23] sm:$0xe0] %vm329_vm8, %v346_v51  }
  0x97   :  { %v365_v52 = vpop.permute.xlu0 %364  }
  0x98   :  { %545 = vst.msk [vmem:[%s1121_s1 + $0x40] sm:$0x1f] %vm329_vm8, %v365_v52   ;;  %546 = vst.msk [vmem:[%s1121_s1 + $0x43] sm:$0xe0] %vm329_vm8, %v365_v52  }
  0x99   :  { %v382_v53 = vpop.permute.xlu1 %381  }
  0x9a   :  { %550 = vst.msk [vmem:[%s1121_s1 + $0xb] sm:$0x3] %vm329_vm8, %v382_v53   ;;  %551 = vst.msk [vmem:[%s1121_s1 + $0xe] sm:$0x7c] %vm329_vm8, %v382_v53  }
  0x9b   :  { %552 = vst.msk [vmem:[%s1121_s1 + $0x11] sm:$0x80] %vm329_vm8, %v382_v53   ;;  %v401_v54 = vpop.permute.xlu0 %400  }
  0x9c   :  { %556 = vst.msk [vmem:[%s1121_s1 + $0x2b] sm:$0x3] %vm329_vm8, %v401_v54   ;;  %557 = vst.msk [vmem:[%s1121_s1 + $0x2e] sm:$0x7c] %vm329_vm8, %v401_v54  }
  0x9d   :  { %558 = vst.msk [vmem:[%s1121_s1 + $0x31] sm:$0x80] %vm329_vm8, %v401_v54  }
  0xa1   :  { %v422_v55 = vpop.permute.xlu1 %421   ;;  %v434_v56 = vpop.permute.xlu0 %433  }
  0xa2   :  { %562 = vst.msk [vmem:[%s1121_s1 + $0x4b] sm:$0x3] %vm329_vm8, %v422_v55   ;;  %563 = vst.msk [vmem:[%s1121_s1 + $0x17] sm:$0x3c] %vm329_vm8, %v422_v55  }
  0xa3   :  { %564 = vst.msk [vmem:[%s1121_s1 + $0x33] sm:$0xc0] %vm329_vm8, %v422_v55   ;;  %566 = vst.msk [vmem:[%s1121_s1 + $0x3b] sm:$0x3] %vm329_vm8, %v434_v56  }

// kernel: forward.1
= control target key start
LH: loop header
LB: loop body
LE: loop exit
PB: predicated region body
PF: predicated region fallthrough
CT: control target
= control target key end

     0   :  { %16 = vsyncpa [#allocation7], 0  ;;  %s6331_s0 = inlined_call_operand.vmem [shape: f32[2,16,16,16], index: 0, kind: input, shape index: {}]   ;;  %s6332_s1 = inlined_call_operand.vmem [shape: f32[16,32], index: 1, kind: input, shape index: {}]   ;;  %s6333_s2 = inlined_call_operand.vmem [shape: f32[1,32], index: 2, kind: input, shape index: {}]   ;;  %s6334_s3 = inlined_call_operand.hbm [shape: f32[5,5,48], index: 3, kind: input, shape index: {}]   ;;  %s6335_s4 = inlined_call_operand.vmem [shape: f32[16,32], index: 4, kind: input, shape index: {}]   ;;  %s6336_s5 = inlined_call_operand.vmem [shape: f32[1,32], index: 5, kind: input, shape index: {}]   ;;  %s6337_s6 = inlined_call_operand.vmem [shape: f32[1,1,32], index: 6, kind: input, shape index: {}]   ;;  %s6338_s7 = inlined_call_operand.hbm [shape: f32[32,32], index: 7, kind: input, shape index: {}]   ;;  %s6339_s8 = inlined_call_operand.hbm [shape: f32[1,32], index: 8, kind: input, shape index: {}]   ;;  %s6340_s9 = inlined_call_operand.vmem [shape: f32[5,5,256], index: 9, kind: input, shape index: {}]   ;;  %s6341_s10 = inlined_call_operand.vmem [shape: f32[1,256], index: 10, kind: input, shape index: {}]   ;;  %s6342_s11 = inlined_call_operand.vmem [shape: f32[2,8,256], index: 11, kind: output, shape index: {}]  }
   0x1   :  { %17 = vsyncpa [#allocation9], 0  ;;  %s4304_s17 = smov 0  }
   0x2 LB: > { %s4310_s18 = sadd.s32 4294967295, %s4231_s17   ;;  %p3784_p0 = scmp.ge.s32.totalorder %s4231_s17, 1  ;;  %s4231_s17 = sphi %s4304_s17, %s23_s17  }
   0x3   : > { %p290_p1 = scmp.lt.s32.totalorder %s4231_s17, 3  ;;  %p6343_p2 = scmp.eq.s32.totalorder %s4310_s18, 0 }
   0x4   : > { %s4233_s20 = smov [#allocation8]   ;;  %s4234_s22 = smov [#allocation6]  }
   0x5   : > { %p4315_p3 = pnand %p3784_p0, %p290_p1  ;;  %s330_s21 = sshll.u32 %s4233_s20, 4  ;;  %s331_s21 = int_to_ptr.vmem [resolvable:$true] %s330_s21 }
   0x6   : > { %s308_s23 = sshll.u32 %s4234_s22, 4  ;;  %s4235_s25 = smov [#allocation10]   ;;  %s4327_s23 = int_to_ptr.vmem [resolvable:$true] %s308_s23 }
   0x7   : > { %s6384_s19 = scalar_select %p4315_p3, 1, 0 }
   0x8   : > { %p4076_p4 = pneg %p4315_p3  ;;  %s344_s26 = sshll.u32 %s4235_s25, 4  ;;  %s4329_s26 = int_to_ptr.vmem [resolvable:$true] %s344_s26 }
   0x9   : > { %s4133_s29 = scalar_lea.hbm %s6338_s7, 512 }
   0xa   : > { %p4323_p5 = pnand %p6343_p2, %p4076_p4  ;;  %p4134_p6 = scmp.ne.s32.totalorder %s6338_s7, %s4133_s29 }
   0xb   : > { %p4140_p10 = scmp.lt.u32.totalorder %s4133_s29, %s6338_s7 }
   0xc   : > { %p4339_p7 = pneg %p4323_p5 }
   0xe   : > { %p4136_p8 = pnand %p4339_p7, %p4134_p6 }
  0x10   : > { %p4137_p9 = pneg %p4136_p8 }
  0x12   : > { %p4142_p11 = pnand %p4140_p10, %p4137_p9 }
  0x14   : > { %4145 = shalt.err (!%p4142_p11)
}
  0x15   : > { %s4146_s16 = scalar_lea.vmem %s331_s21, 512  ;;  %p4154_p1 = scmp.lt.s32.totalorder %s331_s21, %s331_s21 }
  0x16   : > { %p4147_p12 = scmp.ne.s32.totalorder %s331_s21, %s4146_s16  ;;  %p4155_p4 = scmp.lt.s32.totalorder %s4146_s16, %s4146_s16 }
  0x18   : > { %p4149_p13 = pnand %p4147_p12, %p4339_p7  ;;  %p4156_p2 = por %p4155_p4, %p4154_p1 }
  0x1a   : > { %p4150_p0 = pneg %p4149_p13 }
  0x1c   : > { %p4157_p3 = pnand %p4156_p2, %p4150_p0 }
  0x1e   : > { %4160 = shalt.err (!%p4157_p3)
}
  0x1f   : > { %s4236_s20 = smov 128   ;;  %s4237_s22 = smov 8  }
  0x20   : > { %4082 = dma.hbm_to_vmem [thread:$0]  (!%p4323_p5), %s6338_s7, 512, %s331_s21, [#allocation9], %s4236_s20, %s4236_s20, %s4237_s22  }
  0x21   : > { %s4161_s30 = scalar_lea.hbm %s6334_s3, 640 }
  0x22   : > { %p4162_p6 = scmp.ne.s32.totalorder %s6334_s3, %s4161_s30  ;;  %p4168_p8 = scmp.lt.u32.totalorder %s4161_s30, %s6334_s3 }
  0x24   : > { %p4164_p2 = pnand %p4162_p6, %p4339_p7 }
  0x26   : > { %p4165_p3 = pneg %p4164_p2 }
  0x28   : > { %p4170_p9 = pnand %p4168_p8, %p4165_p3 }
  0x2a   : > { %4173 = shalt.err (!%p4170_p9)
}
  0x2b   : > { %s4174_s21 = scalar_lea.vmem %s4327_s23, 640  ;;  %p4182_p13 = scmp.lt.s32.totalorder %s4327_s23, %s4327_s23 }
  0x2c   : > { %p4175_p10 = scmp.ne.s32.totalorder %s4327_s23, %s4174_s21  ;;  %p4183_p0 = scmp.lt.s32.totalorder %s4174_s21, %s4174_s21 }
  0x2e   : > { %p4177_p11 = pnand %p4175_p10, %p4339_p7  ;;  %p4184_p1 = por %p4183_p0, %p4182_p13 }
  0x30   : > { %p4178_p12 = pneg %p4177_p11 }
  0x32   : > { %p4185_p4 = pnand %p4184_p1, %p4178_p12 }
  0x34   : > { %4188 = shalt.err (!%p4185_p4)
}
  0x35   : > { %4079 = dma.hbm_to_vmem [thread:$0]  (!%p4323_p5), %s6334_s3, 640, %s4327_s23, [#allocation7], %s4236_s20, %s4236_s20, %s4237_s22  }
  0x36   : > { %s4189_s30 = scalar_lea.hbm %s6339_s8, 16 }
  0x37   : > { %p4190_p6 = scmp.ne.s32.totalorder %s6339_s8, %s4189_s30  ;;  %p4196_p8 = scmp.lt.u32.totalorder %s4189_s30, %s6339_s8 }
  0x39   : > { %p4192_p2 = pnand %p4190_p6, %p4339_p7 }
  0x3b   : > { %p4193_p3 = pneg %p4192_p2 }
  0x3d   : > { %p4198_p9 = pnand %p4196_p8, %p4193_p3 }
  0x3f   : > { %4201 = shalt.err (!%p4198_p9)
}
  0x40   : > { %s4202_s23 = scalar_lea.vmem %s4329_s26, 16  ;;  %s4209_s20 = scalar_lea.vmem %s4329_s26, 32 }
  0x41   : > { %p4203_p10 = scmp.ne.s32.totalorder %s4329_s26, %s4202_s23  ;;  %p4210_p13 = scmp.lt.s32.totalorder %s4329_s26, %s4329_s26 }
  0x42   : > { %p4211_p0 = scmp.lt.s32.totalorder %s4209_s20, %s4202_s23 }
  0x43   : > { %p4205_p11 = pnand %p4203_p10, %p4339_p7 }
  0x44   : > { %p4212_p1 = por %p4211_p0, %p4210_p13 }
  0x45   : > { %p4206_p12 = pneg %p4205_p11 }
  0x47   : > { %p4213_p4 = pnand %p4212_p1, %p4206_p12 }
  0x49   : > { %4216 = shalt.err (!%p4213_p4)
}
  0x4a   : > { %4085 = dma.hbm_to_vmem [thread:$0]  (!%p4323_p5), %s6339_s8, 16, %s4329_s26, [#allocation9]  }
  0x4b   : > { %p6387_p6 = scmp.ne.s32.totalorder %s6384_s19, 0 }
  0x4d   : > { %371 = sbr.rel (%p6387_p6) target bundleno = 1348 (0x544), region = 64 }
  0x54   : > { %p6388_p7 = scmp.eq.s32.totalorder %s4310_s18, 0 }
  0x56   : > { %4222 = dma.done.wait (%p6388_p7), [#allocation7], 640   ;;  %p6389_p2 = pmov %p6388_p7 }
  0x58   : > { %4224 = vsyncadd (%p6389_p2), [#allocation7], 4294966656  ;;  %p6390_p3 = pmov %p6389_p2 }
  0x59   : > { %p6391_p8 = pmov %p6389_p2 }
  0x5a   : > { %4226 = dma.done.wait (%p6390_p3), [#allocation9], 528  }
  0x5b   : > { %4228 = vsyncadd (%p6391_p8), [#allocation9], 4294966768  ;;  %vm824_vm0 = vcmask 392192   ;;  %p419_p9 = scmp.lt.s32.totalorder %s4310_s18, 1  ;;  %v4238_v0 = vmov 0.0   ;;  %vm470_vm1 = vcmask 130048  }
  0x5c   : > { %836 = vst.msk [vmem:[#allocation2 + $0x1c8] sm:$0xff] %vm824_vm0, %v4238_v0  ;;  %837 = vst.msk [vmem:[#allocation2 + $0x1d0] sm:$0xff] %vm824_vm0, %v4238_v0  ;;  %v461_v1 = vld [vmem:[%s6332_s1] sm:$0xff]  ;;  %v462_v2 = vld [vmem:[%s6332_s1 + $0x8] sm:$0xff]  ;;  %vm840_vm2 = vcmask 386048   ;;  %vm827_vm3 = vcmask 388096  }
  0x5d   : > { %825 = vst.msk [vmem:[#allocation2] sm:$0xff] %vm824_vm0, %v4238_v0  ;;  %826 = vst.msk [vmem:[#allocation2 + $0x8] sm:$0xff] %vm824_vm0, %v4238_v0  ;;  %s6487_s18 = smov (!%p419_p9, %s4310_s18), 1  ;;  %v4046_v4 = vpack.c.bf16 %v462_v2, %v461_v1  ;;  %v4653_v42 = vld [vmem:[%s6333_s2] ss:$0 sm:$0xff]  ;;  %s4239_s14 = smov 16  }
  0x5e   : > { %829 = vst.msk [vmem:[#allocation2 + $0x18] sm:$0xff] %vm824_vm0, %v4238_v0  ;;  %830 = vst.msk [vmem:[#allocation2 + $0x20] sm:$0xff] %vm824_vm0, %v4238_v0  ;;  %s3900_s19 = sshll.u32 %s6487_s18, 8  ;;  %vm1033_vm4 = vcmask 392320   ;;  %vm2256_vm5 = vcmask 261120   ;;  %s4243_s23 = smov 96  }
  0x5f   : > { %833 = vst.msk [vmem:[#allocation2 + $0x1b0] sm:$0xff] %vm824_vm0, %v4238_v0  ;;  %834 = vst.msk [vmem:[#allocation2 + $0x1b8] sm:$0xff] %vm824_vm0, %v4238_v0  ;;  %s4444_s13 = scalar_lea.vmem %s6331_s0, %s3900_s19  ;;  %4047 = vmatprep.subr.bf16.mxu0 %v4046_v4  ;;  %4062 = vmatprep.subr.bf16.mxu1 %v4046_v4  ;;  %s4240_s19 = smov 112   ;;  %vm2429_vm6 = vcmask 1048066   ;;  %vm2431_vm7 = vcmask 1041920   ;;  %vm2425_vm8 = vcmask 523266  }
  0x60   : > { %2419 = vst [vmem:[#allocation5] sm:$0x3] %v4238_v0  ;;  %2420 = vst [vmem:[#allocation5 + $0x8] sm:$0x3] %v4238_v0  ;;  %v429_v3 = vld [vmem:[%s4444_s13] sm:$0xff]  ;;  %v430_v5 = vld [vmem:[%s4444_s13 + $0x8] sm:$0xff]  ;;  %4049 = vmatpush3.bf16.msra.mxu0 %v4046_v4  ;;  %4063 = vmatpush3.bf16.msra.mxu1 %v4046_v4 }
  0x61   : > { %2421 = vst [vmem:[#allocation5 + $0x10] sm:$0x3] %v4238_v0  ;;  %2422 = vst [vmem:[#allocation5 + $0x18] sm:$0xc] %v4238_v0  ;;  %3962 = vmatprep.mubr.msk.f32.mxu0 %vm470_vm1, %v429_v3  ;;  %v431_v6 = vld [vmem:[%s4444_s13 + $0x10] sm:$0xff]  ;;  %v432_v7 = vld [vmem:[%s4444_s13 + $0x18] sm:$0xff] }
  0x62   : > { %2423 = vst [vmem:[#allocation5 + $0x20] sm:$0xc] %v4238_v0  ;;  %2424 = vst [vmem:[#allocation5 + $0x28] sm:$0xc] %v4238_v0  ;;  %v4460_v8 = vld [vmem:[%s4444_s13 + $0x20] sm:$0xff]  ;;  %v4467_v9 = vld [vmem:[%s4444_s13 + $0x28] sm:$0xff] }
  0x63   : > { %873 = vst.msk [vmem:[#allocation2 + $0x32] sm:$0xff] %vm470_vm1, %v429_v3  ;;  %874 = vst.msk [vmem:[#allocation2 + $0x3a] sm:$0xff] %vm470_vm1, %v430_v5  ;;  %v4470_v10 = vld [vmem:[%s4444_s13 + $0x30] sm:$0xff]  ;;  %v4473_v11 = vld [vmem:[%s4444_s13 + $0x38] sm:$0xff]  ;;  %3963 = vmatmul.mubr.msk.f32.vlgmr.msra.gmra.mrb[0].mxu0 %vm470_vm1, %v430_v5  ;;  %vm2443_vm10 = vcmask 1043459   ;;  %vm2446_vm11 = vcmask 1044484  }
  0x64   : > { %875 = vst.msk [vmem:[#allocation2 + $0x4a] sm:$0xff] %vm470_vm1, %v431_v6  ;;  %876 = vst.msk [vmem:[#allocation2 + $0x52] sm:$0xff] %vm470_vm1, %v432_v7  ;;  %v4482_v12 = vld [vmem:[%s4444_s13 + $0x40] sm:$0xff]  ;;  %v4485_v13 = vld [vmem:[%s4444_s13 + $0x48] sm:$0xff]  ;;  %3965 = vmatprep.mubr.msk.f32.mxu0 %vm470_vm1, %v431_v6  ;;  %vm2449_vm12 = vcmask 1045509   ;;  %vm2452_vm13 = vcmask 1046534  }
  0x65   : > { %877 = vst.msk [vmem:[#allocation2 + $0x62] sm:$0xff] %vm470_vm1, %v4460_v8  ;;  %878 = vst.msk [vmem:[#allocation2 + $0x6a] sm:$0xff] %vm470_vm1, %v4467_v9  ;;  %v4488_v14 = vld [vmem:[%s4444_s13 + $0x50] sm:$0xff]  ;;  %v440_v15 = vld [vmem:[%s4444_s13 + $0x58] sm:$0xff]  ;;  %vm2455_vm14 = vcmask 1047559   ;;  %vm2508_vm15 = vcmask 261122  }
  0x66   : > { %879 = vst.msk [vmem:[#allocation2 + $0x7a] sm:$0xff] %vm470_vm1, %v4470_v10  ;;  %880 = vst.msk [vmem:[#allocation2 + $0x82] sm:$0xff] %vm470_vm1, %v4473_v11  ;;  %v441_v16 = vld [vmem:[%s4444_s13 + $0x60] sm:$0xff]  ;;  %v442_v17 = vld [vmem:[%s4444_s13 + $0x68] sm:$0xff]  ;;  %s3901_s16 = sshll.u32 %s6487_s18, 4 }
  0x67   : > { %881 = vst.msk [vmem:[#allocation2 + $0x92] sm:$0xff] %vm470_vm1, %v4482_v12  ;;  %882 = vst.msk [vmem:[#allocation2 + $0x9a] sm:$0xff] %vm470_vm1, %v4485_v13  ;;  %v443_v18 = vld [vmem:[%s4444_s13 + $0x70] sm:$0xff]  ;;  %v444_v19 = vld [vmem:[%s4444_s13 + $0x78] sm:$0xff]  ;;  %3966 = vmatmul.mubr.msk.f32.gmra.mrb[2].mxu0 %vm470_vm1, %v432_v7  ;;  %s428_s21 = scalar_lea.vmem %s6342_s11, %s3901_s16 }
  0x68   : > { %883 = vst.msk [vmem:[#allocation2 + $0xaa] sm:$0xff] %vm470_vm1, %v4488_v14  ;;  %884 = vst.msk [vmem:[#allocation2 + $0xb2] sm:$0xff] %vm470_vm1, %v440_v15  ;;  %v445_v20 = vld [vmem:[%s4444_s13 + $0x80] sm:$0xff]  ;;  %v446_v21 = vld [vmem:[%s4444_s13 + $0x88] sm:$0xff]  ;;  %3968 = vmatprep.mubr.msk.f32.mxu0 %vm470_vm1, %v4460_v8 }
  0x69   : > { %885 = vst.msk [vmem:[#allocation2 + $0xc2] sm:$0xff] %vm470_vm1, %v441_v16  ;;  %886 = vst.msk [vmem:[#allocation2 + $0xca] sm:$0xff] %vm470_vm1, %v442_v17  ;;  %v447_v22 = vld [vmem:[%s4444_s13 + $0x90] sm:$0xff]  ;;  %v448_v23 = vld [vmem:[%s4444_s13 + $0x98] sm:$0xff] }
  0x6a   : > { %887 = vst.msk [vmem:[#allocation2 + $0xda] sm:$0xff] %vm470_vm1, %v443_v18  ;;  %888 = vst.msk [vmem:[#allocation2 + $0xe2] sm:$0xff] %vm470_vm1, %v444_v19  ;;  %v449_v24 = vld [vmem:[%s4444_s13 + $0xa0] sm:$0xff]  ;;  %v450_v25 = vld [vmem:[%s4444_s13 + $0xa8] sm:$0xff] }
  0x6b   : > { %889 = vst.msk [vmem:[#allocation2 + $0xf2] sm:$0xff] %vm470_vm1, %v445_v20  ;;  %890 = vst.msk [vmem:[#allocation2 + $0xfa] sm:$0xff] %vm470_vm1, %v446_v21  ;;  %v453_v26 = vld [vmem:[%s4444_s13 + $0xc0] sm:$0xff]  ;;  %v454_v27 = vld [vmem:[%s4444_s13 + $0xc8] sm:$0xff]  ;;  %3969 = vmatmul.mubr.msk.f32.gmra.mrb[4].mxu0 %vm470_vm1, %v4467_v9 }
  0x6c   : > { %891 = vst.msk [vmem:[#allocation2 + $0x10a] sm:$0xff] %vm470_vm1, %v447_v22  ;;  %892 = vst.msk [vmem:[#allocation2 + $0x112] sm:$0xff] %vm470_vm1, %v448_v23  ;;  %3998 = vmatprep.mubr.msk.f32.mxu1 %vm470_vm1, %v453_v26  ;;  %v451_v28 = vld [vmem:[%s4444_s13 + $0xb0] sm:$0xff]  ;;  %v452_v29 = vld [vmem:[%s4444_s13 + $0xb8] sm:$0xff]  ;;  %3971 = vmatprep.mubr.msk.f32.mxu0 %vm470_vm1, %v4470_v10 }
  0x6d   : > { %893 = vst.msk [vmem:[#allocation2 + $0x122] sm:$0xff] %vm470_vm1, %v449_v24  ;;  %894 = vst.msk [vmem:[#allocation2 + $0x12a] sm:$0xff] %vm470_vm1, %v450_v25  ;;  %3999 = vmatmul.mubr.msk.f32.vlgmr.msra.gmra.mrb[0].mxu1 %vm470_vm1, %v454_v27  ;;  %v455_v30 = vld [vmem:[%s4444_s13 + $0xd0] sm:$0xff]  ;;  %v456_v31 = vld [vmem:[%s4444_s13 + $0xd8] sm:$0xff] }
  0x6e   : > { %897 = vst.msk [vmem:[#allocation2 + $0x152] sm:$0xff] %vm470_vm1, %v453_v26  ;;  %898 = vst.msk [vmem:[#allocation2 + $0x15a] sm:$0xff] %vm470_vm1, %v454_v27  ;;  %v457_v32 = vld [vmem:[%s4444_s13 + $0xe0] sm:$0xff]  ;;  %4001 = vmatprep.mubr.msk.f32.mxu1 %vm470_vm1, %v455_v30  ;;  %v458_v33 = vld [vmem:[%s4444_s13 + $0xe8] sm:$0xff] }
  0x6f   : > { %895 = vst.msk [vmem:[#allocation2 + $0x13a] sm:$0xff] %vm470_vm1, %v451_v28  ;;  %896 = vst.msk [vmem:[#allocation2 + $0x142] sm:$0xff] %vm470_vm1, %v452_v29  ;;  %v459_v34 = vld [vmem:[%s4444_s13 + $0xf0] sm:$0xff]  ;;  %v460_v35 = vld [vmem:[%s4444_s13 + $0xf8] sm:$0xff]  ;;  %3972 = vmatmul.mubr.msk.f32.gmra.mrb[6].mxu0 %vm470_vm1, %v4473_v11  ;;  %s4241_s13 = smov 32  }
  0x70   : > { %899 = vst.msk [vmem:[#allocation2 + $0x16a] sm:$0xff] %vm470_vm1, %v455_v30  ;;  %900 = vst.msk [vmem:[#allocation2 + $0x172] sm:$0xff] %vm470_vm1, %v456_v31  ;;  %3974 = vmatprep.mubr.msk.f32.mxu0 %vm470_vm1, %v4482_v12  ;;  %v1066_v36 = vld [vmem:[#allocation2] ss:$2 sm:$0xff]  ;;  %v1186_v37 = vld [vmem:[#allocation2 + $0x1] ss:$2 sm:$0xff] }
  0x71   : > { %901 = vst.msk [vmem:[#allocation2 + $0x182] sm:$0xff] %vm470_vm1, %v457_v32  ;;  %902 = vst.msk [vmem:[#allocation2 + $0x18a] sm:$0xff] %vm470_vm1, %v458_v33  ;;  %4002 = vmatmul.mubr.msk.f32.gmra.mrb[2].mxu1 %vm470_vm1, %v456_v31  ;;  %v1070_v40 = vld [vmem:[#allocation2 + $0x18] ss:$2 sm:$0xff]  ;;  %v1190_v41 = vld [vmem:[#allocation2 + $0x19] ss:$2 sm:$0xff] }
  0x72   : > { %903 = vst.msk [vmem:[#allocation2 + $0x19a] sm:$0xff] %vm470_vm1, %v459_v34  ;;  %904 = vst.msk [vmem:[#allocation2 + $0x1a2] sm:$0xff] %vm470_vm1, %v460_v35  ;;  %4004 = vmatprep.mubr.msk.f32.mxu1 %vm470_vm1, %v457_v32 }
  0x73   : > { %3975 = vmatmul.mubr.msk.f32.gmra.mrb[8].mxu0 %vm470_vm1, %v4485_v13  ;;  %857 = vst.msk [vmem:[#allocation2 + $0x42] sm:$0x3] %vm840_vm2, %v4238_v0  ;;  %841 = vst.msk [vmem:[#allocation2 + $0x30] sm:$0x3] %vm840_vm2, %v4238_v0 }
  0x74   : > { %3977 = vmatprep.mubr.msk.f32.mxu0 %vm470_vm1, %v4488_v14  ;;  %842 = vst.msk [vmem:[#allocation2 + $0x48] sm:$0x3] %vm840_vm2, %v4238_v0  ;;  %843 = vst.msk [vmem:[#allocation2 + $0x60] sm:$0x3] %vm840_vm2, %v4238_v0 }
  0x75   : > { %4005 = vmatmul.mubr.msk.f32.gmra.mrb[4].mxu1 %vm470_vm1, %v458_v33  ;;  %844 = vst.msk [vmem:[#allocation2 + $0x78] sm:$0x3] %vm840_vm2, %v4238_v0  ;;  %845 = vst.msk [vmem:[#allocation2 + $0x90] sm:$0x3] %vm840_vm2, %v4238_v0 }
  0x76   : > { %4007 = vmatprep.mubr.msk.f32.mxu1 %vm470_vm1, %v459_v34  ;;  %846 = vst.msk [vmem:[#allocation2 + $0xa8] sm:$0x3] %vm840_vm2, %v4238_v0  ;;  %847 = vst.msk [vmem:[#allocation2 + $0xc0] sm:$0x3] %vm840_vm2, %v4238_v0 }
  0x77   : > { %3978 = vmatmul.mubr.msk.f32.gmra.mrb[10].mxu0 %vm470_vm1, %v440_v15  ;;  %848 = vst.msk [vmem:[#allocation2 + $0xd8] sm:$0x3] %vm840_vm2, %v4238_v0  ;;  %849 = vst.msk [vmem:[#allocation2 + $0xf0] sm:$0x3] %vm840_vm2, %v4238_v0 }
  0x78   : > { %3980 = vmatprep.mubr.msk.f32.mxu0 %vm470_vm1, %v441_v16  ;;  %850 = vst.msk [vmem:[#allocation2 + $0x108] sm:$0x3] %vm840_vm2, %v4238_v0  ;;  %851 = vst.msk [vmem:[#allocation2 + $0x120] sm:$0x3] %vm840_vm2, %v4238_v0 }
  0x79   : > { %4008 = vmatmul.mubr.msk.f32.gmra.mrb[6].mxu1 %vm470_vm1, %v460_v35  ;;  %852 = vst.msk [vmem:[#allocation2 + $0x138] sm:$0x3] %vm840_vm2, %v4238_v0  ;;  %853 = vst.msk [vmem:[#allocation2 + $0x150] sm:$0x3] %vm840_vm2, %v4238_v0 }
  0x7a   : > { %854 = vst.msk [vmem:[#allocation2 + $0x168] sm:$0x3] %vm840_vm2, %v4238_v0  ;;  %855 = vst.msk [vmem:[#allocation2 + $0x180] sm:$0x3] %vm840_vm2, %v4238_v0 }
  0x7b   : > { %3981 = vmatmul.mubr.msk.f32.gmra.mrb[12].mxu0 %vm470_vm1, %v442_v17  ;;  %856 = vst.msk [vmem:[#allocation2 + $0x198] sm:$0x3] %vm840_vm2, %v4238_v0  ;;  %858 = vst.msk [vmem:[#allocation2 + $0x5a] sm:$0x3] %vm840_vm2, %v4238_v0 }
  0x7c   : > { %3983 = vmatprep.mubr.msk.f32.mxu0 %vm470_vm1, %v443_v18  ;;  %859 = vst.msk [vmem:[#allocation2 + $0x72] sm:$0x3] %vm840_vm2, %v4238_v0  ;;  %860 = vst.msk [vmem:[#allocation2 + $0x8a] sm:$0x3] %vm840_vm2, %v4238_v0 }
  0x7d   : > { %861 = vst.msk [vmem:[#allocation2 + $0xa2] sm:$0x3] %vm840_vm2, %v4238_v0  ;;  %862 = vst.msk [vmem:[#allocation2 + $0xba] sm:$0x3] %vm840_vm2, %v4238_v0 }
  0x7e   : > { %863 = vst.msk [vmem:[#allocation2 + $0xd2] sm:$0x3] %vm840_vm2, %v4238_v0  ;;  %864 = vst.msk [vmem:[#allocation2 + $0xea] sm:$0x3] %vm840_vm2, %v4238_v0 }
  0x7f   : > { %3984 = vmatmul.mubr.msk.f32.gmra.mrb[14].mxu0 %vm470_vm1, %v444_v19  ;;  %865 = vst.msk [vmem:[#allocation2 + $0x102] sm:$0x3] %vm840_vm2, %v4238_v0  ;;  %866 = vst.msk [vmem:[#allocation2 + $0x11a] sm:$0x3] %vm840_vm2, %v4238_v0 }
  0x80   : > { %3986 = vmatprep.mubr.msk.f32.mxu0 %vm470_vm1, %v445_v20  ;;  %867 = vst.msk [vmem:[#allocation2 + $0x132] sm:$0x3] %vm840_vm2, %v4238_v0  ;;  %868 = vst.msk [vmem:[#allocation2 + $0x14a] sm:$0x3] %vm840_vm2, %v4238_v0 }
  0x81   : > { %869 = vst.msk [vmem:[#allocation2 + $0x162] sm:$0x3] %vm840_vm2, %v4238_v0  ;;  %870 = vst.msk [vmem:[#allocation2 + $0x17a] sm:$0x3] %vm840_vm2, %v4238_v0 }
  0x82   : > { %871 = vst.msk [vmem:[#allocation2 + $0x192] sm:$0x3] %vm840_vm2, %v4238_v0  ;;  %872 = vst.msk [vmem:[#allocation2 + $0x1aa] sm:$0x3] %vm840_vm2, %v4238_v0 }
  0x83   : > { %3987 = vmatmul.mubr.msk.f32.gmra.mrb[16].mxu0 %vm470_vm1, %v446_v21  ;;  %828 = vst.msk [vmem:[#allocation2 + $0x10] sm:$0xf] %vm827_vm3, %v4238_v0  ;;  %831 = vst.msk [vmem:[#allocation2 + $0x28] sm:$0xf] %vm827_vm3, %v4238_v0 }
  0x84   : > { %3989 = vmatprep.mubr.msk.f32.mxu0 %vm470_vm1, %v447_v22  ;;  %838 = vst.msk [vmem:[#allocation2 + $0x1d8] sm:$0xf] %vm827_vm3, %v4238_v0  ;;  %835 = vst.msk [vmem:[#allocation2 + $0x1c0] sm:$0xf] %vm827_vm3, %v4238_v0  ;;  %vm2466_vm3 = vcmask 785922  }
  0x85   : > { %1145 = vst.msk [vmem:[#allocation3] sm:$0xff] %vm824_vm0, %v1066_v36  ;;  %1265 = vst.msk [vmem:[#allocation4] sm:$0xff] %vm824_vm0, %v1186_v37 }
  0x86   : > { %1147 = vst.msk [vmem:[#allocation3 + $0x10] sm:$0xff] %vm824_vm0, %v1070_v40  ;;  %1267 = vst.msk [vmem:[#allocation4 + $0x10] sm:$0xff] %vm824_vm0, %v1190_v41 }
  0x87   : > { %3990 = vmatmul.mubr.msk.f32.gmra.mrb[18].mxu0 %vm470_vm1, %v448_v23  ;;  %2430 = vst.msk [vmem:[#allocation5 + $0x10] sm:$0xfc] %vm2429_vm6, %v4238_v0  ;;  %vm2489_vm6 = vcmask 1048322  }
  0x88   : > { %3992 = vmatprep.mubr.msk.f32.mxu0 %vm470_vm1, %v449_v24  ;;  %2432 = vst.msk [vmem:[#allocation5 + $0x28] sm:$0x3] %vm2431_vm7, %v4238_v0  ;;  %vm2468_vm7 = vcmask 779776  }
  0x89   : > { %2426 = vst.msk [vmem:[#allocation5] sm:$0xfc] %vm2425_vm8, %v4238_v0  ;;  %vm2533_vm8 = vcmask 517376  }
  0x8a   : > { %v1068_v38 = vld [vmem:[#allocation2 + $0x10] ss:$2 sm:$0x3]  ;;  %v1188_v39 = vld [vmem:[#allocation2 + $0x11] ss:$2 sm:$0x3] }
  0x8b   : > { %3993 = vmatmul.mubr.msk.f32.gmra.mrb[20].mxu0 %vm470_vm1, %v450_v25  ;;  %1146 = vst.msk [vmem:[#allocation3 + $0x8] sm:$0x3] %vm840_vm2, %v1068_v38  ;;  %1266 = vst.msk [vmem:[#allocation4 + $0x8] sm:$0x3] %vm840_vm2, %v1188_v39 }
  0x8c   : > { %3995 = vmatprep.mubr.msk.f32.mxu0 %vm470_vm1, %v451_v28  ;;  %v1072_v43 = vld [vmem:[#allocation2 + $0x28] ss:$2 sm:$0x3]  ;;  %v1192_v45 = vld [vmem:[#allocation2 + $0x29] ss:$2 sm:$0x3] }
  0x8d   : > { %1148 = vst.msk [vmem:[#allocation3 + $0x18] sm:$0x3] %vm840_vm2, %v1072_v43  ;;  %1268 = vst.msk [vmem:[#allocation4 + $0x18] sm:$0x3] %vm840_vm2, %v1192_v45 }
  0x8f   : > { %3996 = vmatmul.mubr.msk.f32.gmra.mrb[22].mxu0 %vm470_vm1, %v452_v29 }
 0x136   : > { %v3964_v44 = vpop.f32.mrb[0].mxu0 }
 0x137   : > { %v639_v46 = vadd.f32 %v3964_v44, %v4653_v42  ;;  %v633_v47 = vpop.f32.mrb[1].mxu0 }
 0x138   : > { %v634_v49 = vadd.f32 %v4653_v42, %v633_v47 }
 0x139   : > { %v793_v48 = vmax.f32 %v639_v46, 0.0 }
 0x13a   : > { %v3967_v51 = vpop.f32.mrb[2].mxu0  ;;  %v792_v55 = vmax.f32 %v634_v49, 0.0 }
 0x13b   : > { %v649_v53 = vadd.f32 %v3967_v51, %v4653_v42  ;;  %939 = vrot.lane.b32.xlu0 %v793_v48, %s4239_s14  ;;  %v643_v54 = vpop.f32.mrb[3].mxu0 }
 0x13c   : > { %v644_v57 = vadd.f32 %v4653_v42, %v643_v54 }
 0x13d   : > { %v795_v56 = vmax.f32 %v649_v53, 0.0 }
 0x13e   : > { %v3970_v59 = vpop.f32.mrb[4].mxu0  ;;  %v794_v63 = vmax.f32 %v644_v57, 0.0 }
 0x13f   : > { %v659_v61 = vadd.f32 %v3970_v59, %v4653_v42  ;;  %943 = vrot.lane.b32.xlu1 %v795_v56, %s4239_s14  ;;  %v653_v62 = vpop.f32.mrb[5].mxu0  ;;  %937 = vrot.lane.b32.xlu0 %v792_v55, %s4239_s14 }
 0x140   : > { %v4659_v50 = vpop.f32.mrb[0].mxu1  ;;  %v654_v2 = vadd.f32 %v4653_v42, %v653_v62 }
 0x141   : > { %v4661_v52 = vpop.f32.mrb[1].mxu1  ;;  %v797_v1 = vmax.f32 %v659_v61, 0.0 }
 0x142   : > { %v3973_v4 = vpop.f32.mrb[6].mxu0  ;;  %v796_v9 = vmax.f32 %v654_v2, 0.0  ;;  %v754_v59 = vadd.f32 %v4653_v42, %v4661_v52 }
 0x143   : > { %v669_v6 = vadd.f32 %v3973_v4, %v4653_v42  ;;  %947 = vrot.lane.b32.xlu1 %v797_v1, %s4239_s14  ;;  %v663_v7 = vpop.f32.mrb[7].mxu0  ;;  %941 = vrot.lane.b32.xlu0 %v794_v63, %s4239_s14  ;;  %v759_v1 = vadd.f32 %v4659_v50, %v4653_v42 }
 0x144   : > { %v4666_v58 = vpop.f32.mrb[2].mxu1  ;;  %v664_v8 = vadd.f32 %v4653_v42, %v663_v7  ;;  %v816_v4 = vmax.f32 %v754_v59, 0.0 }
 0x145   : > { %v4668_v60 = vpop.f32.mrb[3].mxu1  ;;  %v799_v15 = vmax.f32 %v669_v6, 0.0 }
 0x146   : > { %v798_v11 = vmax.f32 %v664_v8, 0.0  ;;  %v3976_v12 = vpop.f32.mrb[8].mxu0  ;;  %v817_v8 = vmax.f32 %v759_v1, 0.0 }
 0x147   : > { %v679_v16 = vadd.f32 %v3976_v12, %v4653_v42  ;;  %v673_v17 = vpop.f32.mrb[9].mxu0  ;;  %945 = vrot.lane.b32.xlu1 %v796_v9, %s4239_s14  ;;  %v764_v9 = vadd.f32 %v4653_v42, %v4668_v60  ;;  %v2042_v60 = vld [vmem:[%s6335_s4] sm:$0xff] }
 0x148   : > { %v4674_v3 = vpop.f32.mrb[4].mxu1  ;;  %v674_v18 = vadd.f32 %v4653_v42, %v673_v17  ;;  %949 = vrot.lane.b32.xlu0 %v798_v11, %s4239_s14 }
 0x149   : > { %v4676_v5 = vpop.f32.mrb[5].mxu1  ;;  %v801_v21 = vmax.f32 %v679_v16, 0.0  ;;  %v818_v11 = vmax.f32 %v764_v9, 0.0  ;;  %v779_v16 = vadd.f32 %v4674_v3, %v4653_v42 }
 0x14a   : > { %v800_v19 = vmax.f32 %v674_v18, 0.0  ;;  %v3979_v20 = vpop.f32.mrb[10].mxu0  ;;  %v774_v12 = vadd.f32 %v4653_v42, %v4676_v5  ;;  %v2043_v5 = vld [vmem:[%s6335_s4 + $0x8] sm:$0xff] }
 0x14b   : > { %v689_v22 = vadd.f32 %v3979_v20, %v4653_v42  ;;  %v683_v23 = vpop.f32.mrb[11].mxu0  ;;  %951 = vrot.lane.b32.xlu1 %v799_v15, %s4239_s14  ;;  %v4050_v18 = vpack.c.bf16 %v2043_v5, %v2042_v60 }
 0x14c   : > { %v4009_v10 = vpop.f32.mrb[6].mxu1  ;;  %v684_v24 = vadd.f32 %v4653_v42, %v683_v23  ;;  %953 = vrot.lane.b32.xlu0 %v800_v19, %s4239_s14  ;;  %v820_v17 = vmax.f32 %v774_v12, 0.0  ;;  %v821_v19 = vmax.f32 %v779_v16, 0.0  ;;  %v4757_v23 = vld [vmem:[#allocation6 + $0x1] ss:$0 sm:$0xff] }
 0x14d   : > { %v4683_v13 = vadd.f32 %v4009_v10, %v4653_v42  ;;  %v4685_v14 = vpop.f32.mrb[7].mxu1  ;;  %v803_v27 = vmax.f32 %v689_v22, 0.0  ;;  %v769_v10 = vadd.f32 %v4666_v58, %v4653_v42  ;;  %4051 = vmatprep.subr.bf16.mxu1 %v4050_v18  ;;  %v1334_v22 = vld [vmem:[#allocation4] sm:$0xff] }
 0x14e   : > { %v802_v25 = vmax.f32 %v684_v24, 0.0  ;;  %v3982_v26 = vpop.f32.mrb[12].mxu0  ;;  %v784_v58 = vadd.f32 %v4653_v42, %v4685_v14  ;;  %4053 = vmatpush3.bf16.msra.mxu1 %v4050_v18  ;;  %v1305_v14 = vld [vmem:[#allocation3] sm:$0xff]  ;;  %v1347_v24 = vmul.f32 %v4757_v23, %v1334_v22 }
 0x14f   : > { %v699_v28 = vadd.f32 %v3982_v26, %v4653_v42  ;;  %v693_v29 = vpop.f32.mrb[13].mxu0  ;;  %955 = vrot.lane.b32.xlu1 %v801_v21, %s4239_s14  ;;  %v819_v15 = vmax.f32 %v769_v10, 0.0  ;;  %v823_v20 = vmax.f32 %v4683_v13, 0.0  ;;  %v4755_v21 = vld [vmem:[#allocation6] ss:$0 sm:$0xff] }
 0x150   : > { %v694_v30 = vadd.f32 %v4653_v42, %v693_v29  ;;  %957 = vrot.lane.b32.xlu0 %v802_v25, %s4239_s14  ;;  %v822_v3 = vmax.f32 %v784_v58, 0.0  ;;  %v1318_v13 = vmul.f32 %v4755_v21, %v1305_v14  ;;  %v1363_v25 = vld [vmem:[#allocation3 + $0x1] sm:$0xff]  ;;  %v4761_v26 = vld [vmem:[#allocation6 + $0x2] ss:$0 sm:$0xff] }
 0x151   : > { %v805_v33 = vmax.f32 %v699_v28, 0.0  ;;  %v1376_v28 = vmul.f32 %v4761_v26, %v1363_v25  ;;  %v1138_v29 = vld [vmem:[#allocation2 + $0x1b0] ss:$2 sm:$0xff] }
 0x152   : > { %v804_v31 = vmax.f32 %v694_v30, 0.0  ;;  %v3985_v32 = vpop.f32.mrb[14].mxu0  ;;  %v1392_v30 = vld [vmem:[#allocation4 + $0x1] sm:$0xff]  ;;  %1181 = vst.msk [vmem:[#allocation3 + $0x120] sm:$0xff] %vm824_vm0, %v1138_v29 }
 0x153   : > { %v709_v34 = vadd.f32 %v3985_v32, %v4653_v42  ;;  %v703_v35 = vpop.f32.mrb[15].mxu0  ;;  %959 = vrot.lane.b32.xlu1 %v803_v27, %s4239_s14  ;;  %v1355_v27 = vadd.f32 %v1347_v24, %v1318_v13  ;;  %v1258_v32 = vld [vmem:[#allocation2 + $0x1b1] ss:$2 sm:$0xff] }
 0x154   : > { %v704_v36 = vadd.f32 %v4653_v42, %v703_v35  ;;  %961 = vrot.lane.b32.xlu0 %v804_v31, %s4239_s14  ;;  %v4764_v31 = vld [vmem:[#allocation6 + $0x3] ss:$0 sm:$0xff]  ;;  %1301 = vst.msk [vmem:[#allocation4 + $0x120] sm:$0xff] %vm824_vm0, %v1258_v32  ;;  %v1140_v35 = vld [vmem:[#allocation2 + $0x1c0] ss:$2 sm:$0x3] }
 0x155   : > { %v807_v39 = vmax.f32 %v709_v34, 0.0  ;;  %v1405_v34 = vmul.f32 %v4764_v31, %v1392_v30  ;;  %1182 = vst.msk [vmem:[#allocation3 + $0x128] sm:$0x3] %vm840_vm2, %v1140_v35 }
 0x156   : > { %v806_v37 = vmax.f32 %v704_v36, 0.0  ;;  %v3988_v38 = vpop.f32.mrb[16].mxu0  ;;  %v1421_v36 = vld [vmem:[#allocation3 + $0x2] sm:$0xff] }
 0x157   : > { %v719_v40 = vadd.f32 %v3988_v38, %v4653_v42  ;;  %v713_v41 = vpop.f32.mrb[17].mxu0  ;;  %963 = vrot.lane.b32.xlu1 %v805_v33, %s4239_s14  ;;  %v1384_v33 = vadd.f32 %v1376_v28, %v1355_v27  ;;  %v1260_v38 = vld [vmem:[#allocation2 + $0x1c1] ss:$2 sm:$0x3] }
 0x158   : > { %v714_v43 = vadd.f32 %v4653_v42, %v713_v41  ;;  %965 = vrot.lane.b32.xlu0 %v806_v37, %s4239_s14  ;;  %v4769_v37 = vld [vmem:[#allocation6 + $0x4] ss:$0 sm:$0xff]  ;;  %1302 = vst.msk [vmem:[#allocation4 + $0x128] sm:$0x3] %vm840_vm2, %v1260_v38  ;;  %v4813_v28 = vld [vmem:[#allocation6 + $0x11] ss:$0 sm:$0xff] }
 0x159   : > { %v809_v46 = vmax.f32 %v719_v40, 0.0  ;;  %v1434_v40 = vmul.f32 %v4769_v37, %v1421_v36  ;;  %v1451_v41 = vld [vmem:[#allocation3 + $0x10] sm:$0xff] }
 0x15a   : > { %v808_v44 = vmax.f32 %v714_v43, 0.0  ;;  %v3991_v45 = vpop.f32.mrb[18].mxu0  ;;  %v4774_v43 = vld [vmem:[#allocation6 + $0x8] ss:$0 sm:$0xff] }
 0x15b   : > { %v729_v47 = vadd.f32 %v3991_v45, %v4653_v42  ;;  %v723_v48 = vpop.f32.mrb[19].mxu0  ;;  %967 = vrot.lane.b32.xlu1 %v807_v39, %s4239_s14  ;;  %v1413_v39 = vadd.f32 %v1405_v34, %v1384_v33  ;;  %v4818_v33 = vld [vmem:[#allocation6 + $0x12] ss:$0 sm:$0xff]  ;;  %v4820_v34 = vld [vmem:[#allocation6 + $0x13] ss:$0 sm:$0xff] }
 0x15c   : > { %v724_v49 = vadd.f32 %v4653_v42, %v723_v48  ;;  %969 = vrot.lane.b32.xlu0 %v808_v44, %s4239_s14  ;;  %v4778_v48 = vld [vmem:[#allocation6 + $0x9] ss:$0 sm:$0xff] }
 0x15d   : > { %v811_v54 = vmax.f32 %v729_v47, 0.0  ;;  %v1442_v45 = vadd.f32 %v1434_v40, %v1413_v39  ;;  %v1482_v47 = vld [vmem:[#allocation4 + $0x10] sm:$0xff] }
 0x15e   : > { %v810_v51 = vmax.f32 %v724_v49, 0.0  ;;  %v3994_v53 = vpop.f32.mrb[20].mxu0 }
 0x15f   : > { %v739_v55 = vadd.f32 %v3994_v53, %v4653_v42  ;;  %v733_v56 = vpop.f32.mrb[21].mxu0  ;;  %971 = vrot.lane.b32.xlu1 %v809_v46, %s4239_s14  ;;  %v1465_v46 = vmul.f32 %v4774_v43, %v1451_v41 }
 0x160   : > { %v734_v57 = vadd.f32 %v4653_v42, %v733_v56  ;;  %973 = vrot.lane.b32.xlu0 %v810_v51, %s4239_s14  ;;  %v4783_v56 = vld [vmem:[#allocation6 + $0xa] ss:$0 sm:$0xff] }
 0x161   : > { %v813_v63 = vmax.f32 %v739_v55, 0.0  ;;  %v1473_v53 = vadd.f32 %v1465_v46, %v1442_v45  ;;  %v1511_v55 = vld [vmem:[#allocation3 + $0x11] sm:$0xff] }
 0x162   : > { %v812_v61 = vmax.f32 %v734_v57, 0.0  ;;  %v3997_v62 = vpop.f32.mrb[22].mxu0  ;;  %v1524_v1 = vmul.f32 %v4783_v56, %v1511_v55 }
 0x163   : > { %975 = vrot.lane.b32.xlu1 %v811_v54, %s4239_s14  ;;  %v743_v2 = vpop.f32.mrb[23].mxu0  ;;  %v749_v7 = vadd.f32 %v3997_v62, %v4653_v42  ;;  %v1495_v54 = vmul.f32 %v4778_v48, %v1482_v47 }
 0x164   : > { %977 = vrot.lane.b32.xlu0 %v812_v61, %s4239_s14  ;;  %v744_v6 = vadd.f32 %v4653_v42, %v743_v2  ;;  %v3864_v42 = vld [vmem:[%s6337_s6] ss:$0 sm:$0xff]  ;;  %v1540_v2 = vld [vmem:[#allocation4 + $0x11] sm:$0xff] }
 0x165   : > { %v815_v50 = vmax.f32 %v749_v7, 0.0 }
 0x166   : > { %v814_v52 = vmax.f32 %v744_v6, 0.0  ;;  %v1569_v6 = vld [vmem:[#allocation3 + $0x12] sm:$0xff] }
 0x167   : > { %979 = vrot.lane.b32.xlu1 %v813_v63, %s4239_s14  ;;  %v1503_v63 = vadd.f32 %v1495_v54, %v1473_v53 }
 0x168   : > { %985 = vrot.lane.b32.xlu0 %v816_v4, %s4239_s14  ;;  %v4790_v4 = vld [vmem:[#allocation6 + $0xb] ss:$0 sm:$0xff] }
 0x169   : > { %v1532_v9 = vadd.f32 %v1524_v1, %v1503_v63 }
 0x16b   : > { %987 = vrot.lane.b32.xlu1 %v817_v8, %s4239_s14 }
 0x16c   : > { %981 = vrot.lane.b32.xlu0 %v814_v52, %s4239_s14 }
 0x16f   : > { %983 = vrot.lane.b32.xlu1 %v815_v50, %s4239_s14  ;;  %v1553_v50 = vmul.f32 %v4790_v4, %v1540_v2 }
 0x170   : > { %989 = vrot.lane.b32.xlu0 %v818_v11, %s4239_s14 }
 0x171   : > { %v1561_v60 = vadd.f32 %v1553_v50, %v1532_v9 }
 0x173   : > { %991 = vrot.lane.b32.xlu1 %v819_v15, %s4239_s14  ;;  %v4796_v15 = vld [vmem:[#allocation6 + $0xc] ss:$0 sm:$0xff] }
 0x174   : > { %993 = vrot.lane.b32.xlu0 %v820_v17, %s4239_s14  ;;  %v1582_v5 = vmul.f32 %v4796_v15, %v1569_v6 }
 0x176   : > { %v1590_v13 = vadd.f32 %v1582_v5, %v1561_v60  ;;  %v4850_v5 = vld [vmem:[#allocation6 + $0x19] ss:$0 sm:$0xff] }
 0x177   : > { %995 = vrot.lane.b32.xlu1 %v821_v19, %s4239_s14 }
 0x178   : > { %997 = vrot.lane.b32.xlu0 %v822_v3, %s4239_s14 }
 0x17b   : > { %999 = vrot.lane.b32.xlu1 %v823_v20, %s4239_s14  ;;  %v4808_v20 = vld [vmem:[#allocation6 + $0x10] ss:$0 sm:$0xff] }
 0x17c   : > { %2194 = vrot.lane.b32.xlu0 %v3864_v42, %s4239_s14  ;;  %s4242_s14 = smov 64  }
 0x1ad   : > { %v940_v44 = vpop.permute.xlu0 %939 }
 0x1ae   : > { %1035 = vst.msk [vmem:[#allocation2 + $0x3a] sm:$0xff] %vm1033_vm4, %v940_v44 }
 0x1b1   : > { %v944_v49 = vpop.permute.xlu1 %943  ;;  %v938_v51 = vpop.permute.xlu0 %937 }
 0x1b2   : > { %1037 = vst.msk [vmem:[#allocation2 + $0x52] sm:$0xff] %vm1033_vm4, %v944_v49  ;;  %1034 = vst.msk [vmem:[#allocation2 + $0x32] sm:$0xff] %vm1033_vm4, %v938_v51 }
 0x1b5   : > { %v1076_v57 = vld [vmem:[#allocation2 + $0x40] ss:$2 sm:$0x3]  ;;  %v1196_v59 = vld [vmem:[#allocation2 + $0x41] ss:$2 sm:$0x3]  ;;  %v948_v61 = vpop.permute.xlu1 %947  ;;  %v942_v62 = vpop.permute.xlu0 %941 }
 0x1b6   : > { %1150 = vst.msk [vmem:[#allocation3 + $0x28] sm:$0x3] %vm840_vm2, %v1076_v57  ;;  %1270 = vst.msk [vmem:[#allocation4 + $0x28] sm:$0x3] %vm840_vm2, %v1196_v59  ;;  %v4832_v57 = vld [vmem:[#allocation6 + $0x14] ss:$0 sm:$0xff] }
 0x1b7   : > { %1039 = vst.msk [vmem:[#allocation2 + $0x6a] sm:$0xff] %vm1033_vm4, %v948_v61  ;;  %1036 = vst.msk [vmem:[#allocation2 + $0x4a] sm:$0xff] %vm1033_vm4, %v942_v62  ;;  %v4834_v59 = vld [vmem:[#allocation6 + $0x18] ss:$0 sm:$0xff] }
 0x1b9   : > { %v1080_v7 = vld [vmem:[#allocation2 + $0x58] ss:$2 sm:$0x3]  ;;  %v1200_v8 = vld [vmem:[#allocation2 + $0x59] ss:$2 sm:$0x3]  ;;  %v946_v52 = vpop.permute.xlu1 %945 }
 0x1ba   : > { %1152 = vst.msk [vmem:[#allocation3 + $0x38] sm:$0x3] %vm840_vm2, %v1080_v7  ;;  %1272 = vst.msk [vmem:[#allocation4 + $0x38] sm:$0x3] %vm840_vm2, %v1200_v8  ;;  %v1074_v10 = vld [vmem:[#allocation2 + $0x30] ss:$2 sm:$0xff]  ;;  %v950_v12 = vpop.permute.xlu0 %949 }
 0x1bb   : > { %v1194_v11 = vld [vmem:[#allocation2 + $0x31] ss:$2 sm:$0xff]  ;;  %1038 = vst.msk [vmem:[#allocation2 + $0x62] sm:$0xff] %vm1033_vm4, %v946_v52  ;;  %1040 = vst.msk [vmem:[#allocation2 + $0x7a] sm:$0xff] %vm1033_vm4, %v950_v12 }
 0x1bc   : > { %1149 = vst.msk [vmem:[#allocation3 + $0x20] sm:$0xff] %vm824_vm0, %v1074_v10  ;;  %1269 = vst.msk [vmem:[#allocation4 + $0x20] sm:$0xff] %vm824_vm0, %v1194_v11 }
 0x1bd   : > { %v952_v58 = vpop.permute.xlu1 %951 }
 0x1be   : > { %v1084_v16 = vld [vmem:[#allocation2 + $0x70] ss:$2 sm:$0x3]  ;;  %v1204_v17 = vld [vmem:[#allocation2 + $0x71] ss:$2 sm:$0x3]  ;;  %v954_v3 = vpop.permute.xlu0 %953 }
 0x1bf   : > { %1154 = vst.msk [vmem:[#allocation3 + $0x48] sm:$0x3] %vm840_vm2, %v1084_v16  ;;  %1274 = vst.msk [vmem:[#allocation4 + $0x48] sm:$0x3] %vm840_vm2, %v1204_v17  ;;  %v1078_v18 = vld [vmem:[#allocation2 + $0x48] ss:$2 sm:$0xff] }
 0x1c0   : > { %v1198_v19 = vld [vmem:[#allocation2 + $0x49] ss:$2 sm:$0xff]  ;;  %1041 = vst.msk [vmem:[#allocation2 + $0x82] sm:$0xff] %vm1033_vm4, %v952_v58  ;;  %1042 = vst.msk [vmem:[#allocation2 + $0x92] sm:$0xff] %vm1033_vm4, %v954_v3 }
 0x1c1   : > { %1151 = vst.msk [vmem:[#allocation3 + $0x30] sm:$0xff] %vm824_vm0, %v1078_v18  ;;  %1271 = vst.msk [vmem:[#allocation4 + $0x30] sm:$0xff] %vm824_vm0, %v1198_v19  ;;  %v956_v22 = vpop.permute.xlu1 %955  ;;  %v4852_v18 = vld [vmem:[#allocation6 + $0x1a] ss:$0 sm:$0xff] }
 0x1c2   : > { %v1082_v42 = vld [vmem:[#allocation2 + $0x60] ss:$2 sm:$0xff]  ;;  %v1202_v14 = vld [vmem:[#allocation2 + $0x61] ss:$2 sm:$0xff]  ;;  %1043 = vst.msk [vmem:[#allocation2 + $0x9a] sm:$0xff] %vm1033_vm4, %v956_v22  ;;  %v958_v24 = vpop.permute.xlu0 %957 }
 0x1c3   : > { %1153 = vst.msk [vmem:[#allocation3 + $0x40] sm:$0xff] %vm824_vm0, %v1082_v42  ;;  %1273 = vst.msk [vmem:[#allocation4 + $0x40] sm:$0xff] %vm824_vm0, %v1202_v14  ;;  %v1599_v25 = vld [vmem:[#allocation3 + $0x20] sm:$0xff] }
 0x1c4   : > { %v1630_v27 = vld [vmem:[#allocation4 + $0x20] sm:$0xff]  ;;  %1044 = vst.msk [vmem:[#allocation2 + $0xaa] sm:$0xff] %vm1033_vm4, %v958_v24  ;;  %v1613_v29 = vmul.f32 %v4808_v20, %v1599_v25  ;;  %v1319_v32 = vmul.f32 %v4755_v21, %v1599_v25 }
 0x1c5   : > { %v1659_v30 = vld [vmem:[#allocation3 + $0x21] sm:$0xff]  ;;  %v1348_v35 = vmul.f32 %v4757_v23, %v1630_v27  ;;  %v960_v39 = vpop.permute.xlu1 %959  ;;  %v1643_v41 = vmul.f32 %v4813_v28, %v1630_v27 }
 0x1c6   : > { %v1621_v40 = vadd.f32 %v1613_v29, %v1590_v13  ;;  %v1688_v44 = vld [vmem:[#allocation4 + $0x21] sm:$0xff]  ;;  %1045 = vst.msk [vmem:[#allocation2 + $0xb2] sm:$0xff] %vm1033_vm4, %v960_v39  ;;  %v962_v47 = vpop.permute.xlu0 %961  ;;  %v1377_v51 = vmul.f32 %v4761_v26, %v1659_v30  ;;  %v1672_v54 = vmul.f32 %v4818_v33, %v1659_v30 }
 0x1c7   : > { %v1086_v36 = vld [vmem:[#allocation2 + $0x78] ss:$2 sm:$0xff]  ;;  %v1088_v38 = vld [vmem:[#allocation2 + $0x88] ss:$2 sm:$0x3]  ;;  %v1356_v49 = vadd.f32 %v1348_v35, %v1319_v32  ;;  %1046 = vst.msk [vmem:[#allocation2 + $0xc2] sm:$0xff] %vm1033_vm4, %v962_v47  ;;  %v1406_v62 = vmul.f32 %v4764_v31, %v1688_v44  ;;  %v1701_v7 = vmul.f32 %v4820_v34, %v1688_v44 }
 0x1c8   : > { %1155 = vst.msk [vmem:[#allocation3 + $0x50] sm:$0xff] %vm824_vm0, %v1086_v36  ;;  %v1206_v45 = vld [vmem:[#allocation2 + $0x79] ss:$2 sm:$0xff]  ;;  %v1208_v46 = vld [vmem:[#allocation2 + $0x89] ss:$2 sm:$0x3]  ;;  %v1651_v53 = vadd.f32 %v1643_v41, %v1621_v40 }
 0x1c9   : > { %1156 = vst.msk [vmem:[#allocation3 + $0x58] sm:$0x3] %vm840_vm2, %v1088_v38  ;;  %1276 = vst.msk [vmem:[#allocation4 + $0x58] sm:$0x3] %vm840_vm2, %v1208_v46  ;;  %v1717_v55 = vld [vmem:[#allocation3 + $0x22] sm:$0xff]  ;;  %v1385_v61 = vadd.f32 %v1377_v51, %v1356_v49  ;;  %v964_v2 = vpop.permute.xlu1 %963  ;;  %v1747_v8 = vld [vmem:[#allocation3 + $0x30] sm:$0xff] }
 0x1ca   : > { %1275 = vst.msk [vmem:[#allocation4 + $0x50] sm:$0xff] %vm824_vm0, %v1206_v45  ;;  %v1090_v63 = vld [vmem:[#allocation2 + $0x90] ss:$2 sm:$0xff]  ;;  %v1092_v1 = vld [vmem:[#allocation2 + $0xa0] ss:$2 sm:$0x3]  ;;  %v1680_v6 = vadd.f32 %v1672_v54, %v1651_v53  ;;  %v966_v50 = vpop.permute.xlu0 %965  ;;  %v1435_v11 = vmul.f32 %v4769_v37, %v1717_v55  ;;  %v1730_v16 = vmul.f32 %v4832_v57, %v1717_v55  ;;  %v1466_v3 = vmul.f32 %v4774_v43, %v1747_v8 }
 0x1cb   : > { %1157 = vst.msk [vmem:[#allocation3 + $0x60] sm:$0xff] %vm824_vm0, %v1090_v63  ;;  %v1210_v52 = vld [vmem:[#allocation2 + $0x91] ss:$2 sm:$0xff]  ;;  %v1212_v9 = vld [vmem:[#allocation2 + $0xa1] ss:$2 sm:$0x3]  ;;  %v1414_v10 = vadd.f32 %v1406_v62, %v1385_v61  ;;  %v1761_v24 = vmul.f32 %v4834_v59, %v1747_v8 }
 0x1cc   : > { %1158 = vst.msk [vmem:[#allocation3 + $0x68] sm:$0x3] %vm840_vm2, %v1092_v1  ;;  %1278 = vst.msk [vmem:[#allocation4 + $0x68] sm:$0x3] %vm840_vm2, %v1212_v9  ;;  %v1709_v12 = vadd.f32 %v1701_v7, %v1680_v6  ;;  %v1778_v17 = vld [vmem:[#allocation4 + $0x30] sm:$0xff]  ;;  %v4846_v58 = vld [vmem:[#allocation3 + $0x40] sm:$0xff] }
 0x1cd   : > { %1047 = vst.msk [vmem:[#allocation2 + $0xca] sm:$0xff] %vm1033_vm4, %v964_v2  ;;  %1048 = vst.msk [vmem:[#allocation2 + $0xda] sm:$0xff] %vm1033_vm4, %v966_v50  ;;  %v4848_v60 = vld [vmem:[#allocation4 + $0x40] sm:$0xff]  ;;  %v1443_v19 = vadd.f32 %v1435_v11, %v1414_v10  ;;  %v1094_v42 = vld [vmem:[#allocation2 + $0xa8] ss:$2 sm:$0xff]  ;;  %v968_v22 = vpop.permute.xlu1 %967  ;;  %v1496_v36 = vmul.f32 %v4778_v48, %v1778_v17  ;;  %v1320_v38 = vmul.f32 %v4755_v21, %v4846_v58 }
 0x1ce   : > { %1277 = vst.msk [vmem:[#allocation4 + $0x60] sm:$0xff] %vm824_vm0, %v1210_v52  ;;  %v1096_v14 = vld [vmem:[#allocation2 + $0xb8] ss:$2 sm:$0x3]  ;;  %v1738_v13 = vadd.f32 %v1730_v16, %v1709_v12  ;;  %1159 = vst.msk [vmem:[#allocation3 + $0x70] sm:$0xff] %vm824_vm0, %v1094_v42  ;;  %v970_v30 = vpop.permute.xlu0 %969  ;;  %v4859_v32 = vld [vmem:[#allocation3 + $0x41] sm:$0xff]  ;;  %v1349_v39 = vmul.f32 %v4757_v23, %v4848_v60  ;;  %v1791_v41 = vmul.f32 %v4850_v5, %v1778_v17 }
 0x1cf   : > { %v1807_v25 = vld [vmem:[#allocation3 + $0x31] sm:$0xff]  ;;  %1160 = vst.msk [vmem:[#allocation3 + $0x78] sm:$0x3] %vm840_vm2, %v1096_v14  ;;  %v1216_v29 = vld [vmem:[#allocation2 + $0xb9] ss:$2 sm:$0x3]  ;;  %v1474_v35 = vadd.f32 %v1466_v3, %v1443_v19  ;;  %v1378_v2 = vmul.f32 %v4761_v26, %v4859_v32 }
 0x1d0   : > { %v1214_v27 = vld [vmem:[#allocation2 + $0xa9] ss:$2 sm:$0xff]  ;;  %1049 = vst.msk [vmem:[#allocation2 + $0xe2] sm:$0xff] %vm1033_vm4, %v968_v22  ;;  %1050 = vst.msk [vmem:[#allocation2 + $0xf2] sm:$0xff] %vm1033_vm4, %v970_v30  ;;  %v1769_v40 = vadd.f32 %v1761_v24, %v1738_v13  ;;  %v4872_v46 = vld [vmem:[#allocation6 + $0x1c] ss:$0 sm:$0xff]  ;;  %v1525_v51 = vmul.f32 %v4783_v56, %v1807_v25  ;;  %v1820_v62 = vmul.f32 %v4852_v18, %v1807_v25 }
 0x1d1   : > { %1279 = vst.msk [vmem:[#allocation4 + $0x70] sm:$0xff] %vm824_vm0, %v1214_v27  ;;  %v1836_v44 = vld [vmem:[#allocation4 + $0x31] sm:$0xff]  ;;  %v4870_v45 = vld [vmem:[#allocation6 + $0x1b] ss:$0 sm:$0xff]  ;;  %v4874_v47 = vld [vmem:[#allocation4 + $0x41] sm:$0xff]  ;;  %v1504_v49 = vadd.f32 %v1496_v36, %v1474_v35  ;;  %v972_v55 = vpop.permute.xlu1 %971  ;;  %v1357_v1 = vadd.f32 %v1349_v39, %v1320_v38 }
 0x1d2   : > { %1280 = vst.msk [vmem:[#allocation4 + $0x78] sm:$0x3] %vm840_vm2, %v1216_v29  ;;  %v1799_v61 = vadd.f32 %v1791_v41, %v1769_v40  ;;  %v1865_v63 = vld [vmem:[#allocation3 + $0x32] sm:$0xff]  ;;  %v974_v8 = vpop.permute.xlu0 %973  ;;  %v4883_v52 = vld [vmem:[#allocation3 + $0x42] sm:$0xff]  ;;  %v1554_v50 = vmul.f32 %v4790_v4, %v1836_v44  ;;  %v1849_v11 = vmul.f32 %v4870_v45, %v1836_v44  ;;  %v1407_v16 = vmul.f32 %v4764_v31, %v4874_v47  ;;  %v4892_v17 = vld [vmem:[#allocation6 + $0x20] ss:$0 sm:$0xff] }
 0x1d3   : > { %1051 = vst.msk [vmem:[#allocation2 + $0xfa] sm:$0xff] %vm1033_vm4, %v972_v55  ;;  %v1533_v9 = vadd.f32 %v1525_v51, %v1504_v49  ;;  %1052 = vst.msk [vmem:[#allocation2 + $0x10a] sm:$0xff] %vm1033_vm4, %v974_v8  ;;  %v1386_v12 = vadd.f32 %v1378_v2, %v1357_v1  ;;  %v4894_v19 = vld [vmem:[#allocation6 + $0x21] ss:$0 sm:$0xff]  ;;  %v1583_v42 = vmul.f32 %v4796_v15, %v1865_v63  ;;  %v4909_v44 = vld [vmem:[#allocation3 + $0x60] sm:$0xff] }
 0x1d4   : > { %v1098_v53 = vld [vmem:[#allocation2 + $0xc0] ss:$2 sm:$0xff]  ;;  %v1100_v54 = vld [vmem:[#allocation2 + $0xd0] ss:$2 sm:$0x3]  ;;  %v1828_v10 = vadd.f32 %v1820_v62, %v1799_v61  ;;  %v1878_v27 = vmul.f32 %v4872_v46, %v1865_v63  ;;  %v1436_v35 = vmul.f32 %v4769_v37, %v4883_v52  ;;  %v1614_v41 = vmul.f32 %v4808_v20, %v4846_v58 }
 0x1d5   : > { %1161 = vst.msk [vmem:[#allocation3 + $0x80] sm:$0xff] %vm824_vm0, %v1098_v53  ;;  %v1218_v6 = vld [vmem:[#allocation2 + $0xc1] ss:$2 sm:$0xff]  ;;  %v1220_v7 = vld [vmem:[#allocation2 + $0xd1] ss:$2 sm:$0x3]  ;;  %v1562_v3 = vadd.f32 %v1554_v50, %v1533_v9  ;;  %v976_v24 = vpop.permute.xlu1 %975  ;;  %v1415_v30 = vadd.f32 %v1407_v16, %v1386_v12  ;;  %v1909_v51 = vmul.f32 %v4892_v17, %v4846_v58  ;;  %v1939_v61 = vmul.f32 %v4894_v19, %v4848_v60 }
 0x1d6   : > { %1162 = vst.msk [vmem:[#allocation3 + $0x88] sm:$0x3] %vm840_vm2, %v1100_v54  ;;  %1282 = vst.msk [vmem:[#allocation4 + $0x88] sm:$0x3] %vm840_vm2, %v1220_v7  ;;  %v4897_v14 = vld [vmem:[#allocation3 + $0x50] sm:$0xff]  ;;  %v1857_v25 = vadd.f32 %v1849_v11, %v1828_v10  ;;  %v978_v39 = vpop.permute.xlu0 %977  ;;  %v4916_v53 = vld [vmem:[#allocation4 + $0x60] sm:$0xff]  ;;  %v1644_v2 = vmul.f32 %v4813_v28, %v4848_v60  ;;  %v1321_v12 = vmul.f32 %v4755_v21, %v4909_v44 }
 0x1d7   : > { %1281 = vst.msk [vmem:[#allocation4 + $0x80] sm:$0xff] %vm824_vm0, %v1218_v6  ;;  %v1102_v22 = vld [vmem:[#allocation2 + $0xd8] ss:$2 sm:$0xff]  ;;  %v1104_v13 = vld [vmem:[#allocation2 + $0xe8] ss:$2 sm:$0x3]  ;;  %v1591_v40 = vadd.f32 %v1583_v42, %v1562_v3  ;;  %v1444_v54 = vadd.f32 %v1436_v35, %v1415_v30  ;;  %v1467_v55 = vmul.f32 %v4774_v43, %v4897_v14 }
 0x1d8   : > { %v4900_v29 = vld [vmem:[#allocation4 + $0x50] sm:$0xff]  ;;  %1163 = vst.msk [vmem:[#allocation3 + $0x90] sm:$0xff] %vm824_vm0, %v1102_v22  ;;  %v1222_v36 = vld [vmem:[#allocation2 + $0xd9] ss:$2 sm:$0xff]  ;;  %v1886_v49 = vadd.f32 %v1878_v27, %v1857_v25  ;;  %v1673_v22 = vmul.f32 %v4818_v33, %v4859_v32 }
 0x1d9   : > { %1164 = vst.msk [vmem:[#allocation3 + $0x98] sm:$0x3] %vm840_vm2, %v1104_v13  ;;  %v1224_v38 = vld [vmem:[#allocation2 + $0xe9] ss:$2 sm:$0x3]  ;;  %v1622_v1 = vadd.f32 %v1614_v41, %v1591_v40  ;;  %v4928_v6 = vld [vmem:[#allocation3 + $0x51] sm:$0xff]  ;;  %v980_v8 = vpop.permute.xlu1 %979  ;;  %v1475_v10 = vadd.f32 %v1467_v55, %v1444_v54  ;;  %v1497_v11 = vmul.f32 %v4778_v48, %v4900_v29  ;;  %v1702_v41 = vmul.f32 %v4820_v34, %v4874_v47 }
 0x1da   : > { %1053 = vst.msk [vmem:[#allocation2 + $0x112] sm:$0xff] %vm1033_vm4, %v976_v24  ;;  %1054 = vst.msk [vmem:[#allocation2 + $0x122] sm:$0xff] %vm1033_vm4, %v978_v39  ;;  %v4922_v62 = vld [vmem:[#allocation6 + $0x22] ss:$0 sm:$0xff]  ;;  %v4924_v63 = vld [vmem:[#allocation6 + $0x23] ss:$0 sm:$0xff]  ;;  %v1917_v9 = vadd.f32 %v1909_v51, %v1886_v49  ;;  %v986_v3 = vpop.permute.xlu0 %985  ;;  %v1350_v24 = vmul.f32 %v4757_v23, %v4916_v53 }
 0x1db   : > { %1283 = vst.msk [vmem:[#allocation4 + $0x90] sm:$0xff] %vm824_vm0, %v1222_v36  ;;  %v1106_v58 = vld [vmem:[#allocation2 + $0xf0] ss:$2 sm:$0xff]  ;;  %v1108_v7 = vld [vmem:[#allocation2 + $0x100] ss:$2 sm:$0x3]  ;;  %v1652_v42 = vadd.f32 %v1644_v2, %v1622_v1  ;;  %v1968_v27 = vmul.f32 %v4922_v62, %v4859_v32  ;;  %v1505_v36 = vadd.f32 %v1497_v11, %v1475_v10  ;;  %v1997_v39 = vmul.f32 %v4924_v63, %v4874_v47 }
 0x1dc   : > { %1284 = vst.msk [vmem:[#allocation4 + $0x98] sm:$0x3] %vm840_vm2, %v1224_v38  ;;  %v4930_v50 = vld [vmem:[#allocation4 + $0x51] sm:$0xff]  ;;  %1166 = vst.msk [vmem:[#allocation3 + $0xa8] sm:$0x3] %vm840_vm2, %v1108_v7  ;;  %v4941_v13 = vld [vmem:[#allocation3 + $0x61] sm:$0xff]  ;;  %v1947_v25 = vadd.f32 %v1939_v61, %v1917_v9  ;;  %v1526_v38 = vmul.f32 %v4783_v56, %v4928_v6  ;;  %v1358_v2 = vadd.f32 %v1350_v24, %v1321_v12 }
 0x1dd   : > { %1165 = vst.msk [vmem:[#allocation3 + $0xa0] sm:$0xff] %vm824_vm0, %v1106_v58  ;;  %v1226_v60 = vld [vmem:[#allocation2 + $0xf1] ss:$2 sm:$0xff]  ;;  %v1228_v16 = vld [vmem:[#allocation2 + $0x101] ss:$2 sm:$0x3]  ;;  %v1681_v40 = vadd.f32 %v1673_v22, %v1652_v42  ;;  %v1555_v51 = vmul.f32 %v4790_v4, %v4930_v50  ;;  %v988_v55 = vpop.permute.xlu1 %987  ;;  %v1379_v58 = vmul.f32 %v4761_v26, %v4941_v13  ;;  %v1731_v11 = vmul.f32 %v4832_v57, %v4883_v52 }
 0x1de   : > { %1055 = vst.msk [vmem:[#allocation2 + $0x12a] sm:$0xff] %vm1033_vm4, %v980_v8  ;;  %1058 = vst.msk [vmem:[#allocation2 + $0x152] sm:$0xff] %vm1033_vm4, %v986_v3  ;;  %v4950_v30 = vld [vmem:[#allocation6 + $0x24] ss:$0 sm:$0xff]  ;;  %v4958_v49 = vld [vmem:[#allocation4 + $0x61] sm:$0xff]  ;;  %v1976_v61 = vadd.f32 %v1968_v27, %v1947_v25  ;;  %v1534_v1 = vadd.f32 %v1526_v38, %v1505_v36  ;;  %v982_v8 = vpop.permute.xlu0 %981  ;;  %v1792_v25 = vmul.f32 %v4850_v5, %v4900_v29 }
 0x1df   : > { %1285 = vst.msk [vmem:[#allocation4 + $0xa0] sm:$0xff] %vm824_vm0, %v1226_v60  ;;  %v1866_v35 = vld [vmem:[#allocation3 + $0x52] sm:$0xff]  ;;  %v2026_v9 = vmul.f32 %v4950_v30, %v4883_v52  ;;  %v1710_v10 = vadd.f32 %v1702_v41, %v1681_v40  ;;  %v4971_v12 = vld [vmem:[#allocation3 + $0x62] sm:$0xff]  ;;  %v1387_v42 = vadd.f32 %v1379_v58, %v1358_v2  ;;  %v1408_v22 = vmul.f32 %v4764_v31, %v4958_v49 }
 0x1e0   : > { %1286 = vst.msk [vmem:[#allocation4 + $0xa8] sm:$0x3] %vm840_vm2, %v1228_v16  ;;  %v1584_v60 = vmul.f32 %v4796_v15, %v1866_v35  ;;  %v2005_v16 = vadd.f32 %v1997_v39, %v1976_v61  ;;  %v1563_v3 = vadd.f32 %v1555_v51, %v1534_v1  ;;  %v1762_v52 = vmul.f32 %v4834_v59, %v4897_v14  ;;  %v4985_v36 = vld [vmem:[#allocation3 + $0x70] sm:$0xff] }
 0x1e1   : > { %v1110_v32 = vld [vmem:[#allocation2 + $0x108] ss:$2 sm:$0xff]  ;;  %v1112_v54 = vld [vmem:[#allocation2 + $0x118] ss:$2 sm:$0x3]  ;;  %1059 = vst.msk [vmem:[#allocation2 + $0x15a] sm:$0xff] %vm1033_vm4, %v988_v55  ;;  %v1739_v24 = vadd.f32 %v1731_v11, %v1710_v10  ;;  %v1615_v27 = vmul.f32 %v4808_v20, %v4909_v44  ;;  %v984_v39 = vpop.permute.xlu1 %983  ;;  %v1821_v1 = vmul.f32 %v4852_v18, %v4928_v6  ;;  %v1850_v2 = vmul.f32 %v4870_v45, %v4930_v50 }
 0x1e2   : > { %1167 = vst.msk [vmem:[#allocation3 + $0xb0] sm:$0xff] %vm824_vm0, %v1110_v32  ;;  %v1230_v7 = vld [vmem:[#allocation2 + $0x109] ss:$2 sm:$0xff]  ;;  %v1232_v47 = vld [vmem:[#allocation2 + $0x119] ss:$2 sm:$0x3]  ;;  %v4987_v41 = vadd.f32 %v2026_v9, %v2005_v16  ;;  %v1592_v51 = vadd.f32 %v1584_v60, %v1563_v3  ;;  %v1416_v32 = vadd.f32 %v1408_v22, %v1387_v42  ;;  %v990_v55 = vpop.permute.xlu0 %989  ;;  %v1879_v58 = vmul.f32 %v4872_v46, %v1866_v35 }
 0x1e3   : > { %1168 = vst.msk [vmem:[#allocation3 + $0xb8] sm:$0x3] %vm840_vm2, %v1112_v54  ;;  %1288 = vst.msk [vmem:[#allocation4 + $0xb8] sm:$0x3] %vm840_vm2, %v1232_v47  ;;  %v1437_v54 = vmul.f32 %v4769_v37, %v4971_v12  ;;  %v1770_v61 = vadd.f32 %v1762_v52, %v1739_v24  ;;  %v1645_v6 = vmul.f32 %v4813_v28, %v4916_v53  ;;  %v1809_v16 = vld [vmem:[#allocation3 + $0x71] sm:$0xff]  ;;  %v5024_v3 = vld [vmem:[#allocation4 + $0x80] sm:$0xff] }
 0x1e4   : > { %1287 = vst.msk [vmem:[#allocation4 + $0xb0] sm:$0xff] %vm824_vm0, %v1230_v7  ;;  %v4999_v7 = vld [vmem:[#allocation4 + $0x70] sm:$0xff]  ;;  %4014 = vmatprep.mubr.msk.f32.mxu1 %vm470_vm1, %v4987_v41  ;;  %v1623_v47 = vadd.f32 %v1615_v27, %v1592_v51  ;;  %v1468_v35 = vmul.f32 %v4774_v43, %v4985_v36  ;;  %v5014_v10 = vmul.f32 %v4892_v17, %v4909_v44 }
 0x1e5   : > { %1056 = vst.msk [vmem:[#allocation2 + $0x13a] sm:$0xff] %vm1033_vm4, %v982_v8  ;;  %v1114_v38 = vld [vmem:[#allocation2 + $0x120] ss:$2 sm:$0xff]  ;;  %v1116_v40 = vld [vmem:[#allocation2 + $0x130] ss:$2 sm:$0x3]  ;;  %v1445_v50 = vadd.f32 %v1437_v54, %v1416_v32  ;;  %v1800_v9 = vadd.f32 %v1792_v25, %v1770_v61  ;;  %v5018_v11 = vmul.f32 %v4894_v19, %v4916_v53  ;;  %v5022_v60 = vmul.f32 %v4922_v62, %v4941_v13  ;;  %v992_v24 = vpop.permute.xlu1 %991 }
 0x1e6   : > { %1169 = vst.msk [vmem:[#allocation3 + $0xc0] sm:$0xff] %vm824_vm0, %v1114_v38  ;;  %v1234_v14 = vld [vmem:[#allocation2 + $0x121] ss:$2 sm:$0xff]  ;;  %v1236_v29 = vld [vmem:[#allocation2 + $0x131] ss:$2 sm:$0x3]  ;;  %v1653_v52 = vadd.f32 %v1645_v6, %v1623_v47  ;;  %v1674_v25 = vmul.f32 %v4818_v33, %v4941_v13  ;;  %v1498_v53 = vmul.f32 %v4778_v48, %v4999_v7  ;;  %v5035_v32 = vmul.f32 %v4924_v63, %v4958_v49 }
 0x1e7   : > { %1170 = vst.msk [vmem:[#allocation3 + $0xc8] sm:$0x3] %vm840_vm2, %v1116_v40  ;;  %1290 = vst.msk [vmem:[#allocation4 + $0xc8] sm:$0x3] %vm840_vm2, %v1236_v29  ;;  %v5008_v8 = vld [vmem:[#allocation3 + $0x80] sm:$0xff]  ;;  %v1838_v44 = vld [vmem:[#allocation4 + $0x71] sm:$0xff]  ;;  %v1476_v27 = vadd.f32 %v1468_v35, %v1445_v50  ;;  %v1829_v51 = vadd.f32 %v1821_v1, %v1800_v9  ;;  %v1703_v13 = vmul.f32 %v4820_v34, %v4958_v49 }
 0x1e8   : > { %1057 = vst.msk [vmem:[#allocation2 + $0x142] sm:$0xff] %vm1033_vm4, %v984_v39  ;;  %1060 = vst.msk [vmem:[#allocation2 + $0x16a] sm:$0xff] %vm1033_vm4, %v990_v55  ;;  %v1122_v42 = vld [vmem:[#allocation2 + $0x150] ss:$2 sm:$0xff]  ;;  %v1242_v38 = vld [vmem:[#allocation2 + $0x151] ss:$2 sm:$0xff]  ;;  %v994_v39 = vpop.permute.xlu0 %993  ;;  %v1682_v29 = vadd.f32 %v1674_v25, %v1653_v52  ;;  %v1527_v1 = vmul.f32 %v4783_v56, %v1809_v16  ;;  %v1351_v47 = vmul.f32 %v4757_v23, %v5024_v3 }
 0x1e9   : > { %1289 = vst.msk [vmem:[#allocation4 + $0xc0] sm:$0xff] %vm824_vm0, %v1234_v14  ;;  %v1124_v22 = vld [vmem:[#allocation2 + $0x160] ss:$2 sm:$0x3]  ;;  %1173 = vst.msk [vmem:[#allocation3 + $0xe0] sm:$0xff] %vm824_vm0, %v1122_v42  ;;  %v1322_v14 = vmul.f32 %v4755_v21, %v5008_v8  ;;  %v1867_v55 = vld [vmem:[#allocation3 + $0x72] sm:$0xff]  ;;  %v1506_v61 = vadd.f32 %v1498_v53, %v1476_v27  ;;  %v1858_v49 = vadd.f32 %v1850_v2, %v1829_v51 }
 0x1ea   : > { %1174 = vst.msk [vmem:[#allocation3 + $0xe8] sm:$0x3] %vm840_vm2, %v1124_v22  ;;  %v1244_v40 = vld [vmem:[#allocation2 + $0x161] ss:$2 sm:$0x3]  ;;  %v5051_v6 = vmul.f32 %v4950_v30, %v4971_v12  ;;  %v1732_v50 = vmul.f32 %v4832_v57, %v4971_v12  ;;  %v1556_v9 = vmul.f32 %v4790_v4, %v1838_v44  ;;  %v1711_v52 = vadd.f32 %v1703_v13, %v1682_v29 }
 0x1eb   : > { %1061 = vst.msk [vmem:[#allocation2 + $0x172] sm:$0xff] %vm1033_vm4, %v992_v24  ;;  %v5039_v54 = vld [vmem:[#allocation3 + $0x81] sm:$0xff]  ;;  %1062 = vst.msk [vmem:[#allocation2 + $0x182] sm:$0xff] %vm1033_vm4, %v994_v39  ;;  %v996_v24 = vpop.permute.xlu1 %995  ;;  %v1535_v25 = vadd.f32 %v1527_v1, %v1506_v61  ;;  %v1359_v27 = vadd.f32 %v1351_v47, %v1322_v14  ;;  %v1763_v39 = vmul.f32 %v4834_v59, %v4985_v36  ;;  %v5073_v1 = vld [vmem:[#allocation3 + $0x90] sm:$0xff] }
 0x1ec   : > { %1293 = vst.msk [vmem:[#allocation4 + $0xe0] sm:$0xff] %vm824_vm0, %v1242_v38  ;;  %v5055_v35 = vld [vmem:[#allocation4 + $0x81] sm:$0xff]  ;;  %v1380_v2 = vmul.f32 %v4761_v26, %v5039_v54  ;;  %v998_v12 = vpop.permute.xlu0 %997  ;;  %v1793_v51 = vmul.f32 %v4850_v5, %v4999_v7  ;;  %v1585_v14 = vmul.f32 %v4796_v15, %v1867_v55  ;;  %v1740_v29 = vadd.f32 %v1732_v50, %v1711_v52 }
 0x1ed   : > { %1294 = vst.msk [vmem:[#allocation4 + $0xe8] sm:$0x3] %vm840_vm2, %v1244_v40  ;;  %v1887_v40 = vadd.f32 %v1879_v58, %v1858_v49  ;;  %v5067_v13 = vld [vmem:[#allocation3 + $0x82] sm:$0xff]  ;;  %v1564_v61 = vadd.f32 %v1556_v9, %v1535_v25  ;;  %v1409_v36 = vmul.f32 %v4764_v31, %v5055_v35  ;;  %v1822_v47 = vmul.f32 %v4852_v18, %v1809_v16 }
 0x1ee   : > { %1063 = vst.msk [vmem:[#allocation2 + $0x18a] sm:$0xff] %vm1033_vm4, %v996_v24  ;;  %1064 = vst.msk [vmem:[#allocation2 + $0x19a] sm:$0xff] %vm1033_vm4, %v998_v12  ;;  %v1388_v58 = vadd.f32 %v1380_v2, %v1359_v27  ;;  %v1851_v49 = vmul.f32 %v4870_v45, %v1838_v44  ;;  %v1771_v50 = vadd.f32 %v1763_v39, %v1740_v29  ;;  %v5093_v12 = vld [vmem:[#allocation4 + $0x90] sm:$0xff] }
 0x1ef   : > { %v1118_v42 = vld [vmem:[#allocation2 + $0x138] ss:$2 sm:$0xff]  ;;  %v1120_v22 = vld [vmem:[#allocation2 + $0x148] ss:$2 sm:$0x3]  ;;  %v1918_v7 = vadd.f32 %v5014_v10, %v1887_v40  ;;  %v1593_v9 = vadd.f32 %v1585_v14, %v1564_v61  ;;  %v1438_v25 = vmul.f32 %v4769_v37, %v5067_v13  ;;  %v1880_v2 = vmul.f32 %v4872_v46, %v1867_v55 }
 0x1f0   : > { %1171 = vst.msk [vmem:[#allocation3 + $0xd0] sm:$0xff] %vm824_vm0, %v1118_v42  ;;  %v1238_v53 = vld [vmem:[#allocation2 + $0x139] ss:$2 sm:$0xff]  ;;  %v1240_v38 = vld [vmem:[#allocation2 + $0x149] ss:$2 sm:$0x3]  ;;  %v1616_v42 = vmul.f32 %v4808_v20, %v5008_v8  ;;  %v1417_v52 = vadd.f32 %v1409_v36, %v1388_v58  ;;  %v5086_v27 = vpop.permute.xlu0 %2194  ;;  %v1469_v40 = vmul.f32 %v4774_v43, %v5073_v1  ;;  %v1911_v58 = vmul.f32 %v4892_v17, %v5008_v8 }
 0x1f1   : > { %1172 = vst.msk [vmem:[#allocation3 + $0xd8] sm:$0x3] %vm840_vm2, %v1120_v22  ;;  %1292 = vst.msk [vmem:[#allocation4 + $0xd8] sm:$0x3] %vm840_vm2, %v1240_v38  ;;  %v1948_v44 = vadd.f32 %v5018_v11, %v1918_v7  ;;  %v1646_v38 = vmul.f32 %v4813_v28, %v5024_v3  ;;  %v2197_v39 = vadd.f32 %v5086_v27, %v4987_v41  ;;  %v5101_v29 = vld [vmem:[#allocation3 + $0x91] sm:$0xff] }
 0x1f2   : > { %1291 = vst.msk [vmem:[#allocation4 + $0xd0] sm:$0xff] %vm824_vm0, %v1238_v53  ;;  %v1126_v22 = vld [vmem:[#allocation2 + $0x168] ss:$2 sm:$0xff]  ;;  %v1128_v24 = vld [vmem:[#allocation2 + $0x178] ss:$2 sm:$0x3]  ;;  %v1000_v53 = vpop.permute.xlu1 %999  ;;  %v1801_v11 = vadd.f32 %v1793_v51, %v1771_v50  ;;  %v1624_v14 = vadd.f32 %v1616_v42, %v1593_v9  ;;  %v1446_v55 = vadd.f32 %v1438_v25, %v1417_v52  ;;  %v1941_v36 = vmul.f32 %v4894_v19, %v5024_v3 }
 0x1f3   : > { %1175 = vst.msk [vmem:[#allocation3 + $0xf0] sm:$0xff] %vm824_vm0, %v1126_v22  ;;  %v1246_v10 = vld [vmem:[#allocation2 + $0x169] ss:$2 sm:$0xff]  ;;  %v1248_v16 = vld [vmem:[#allocation2 + $0x179] ss:$2 sm:$0x3]  ;;  %v1977_v61 = vadd.f32 %v5022_v60, %v1948_v44  ;;  %v1675_v7 = vmul.f32 %v4818_v33, %v5039_v54  ;;  %2213 = vrot.lane.b32.xlu1 %v2197_v39, %s4240_s19  ;;  %v1499_v8 = vmul.f32 %v4778_v48, %v5093_v12 }
 0x1f4   : > { %1176 = vst.msk [vmem:[#allocation3 + $0xf8] sm:$0x3] %vm840_vm2, %v1128_v24  ;;  %1296 = vst.msk [vmem:[#allocation4 + $0xf8] sm:$0x3] %vm840_vm2, %v1248_v16  ;;  %v5110_v22 = vld [vmem:[#allocation3 + $0xa0] sm:$0xff]  ;;  %v1830_v51 = vadd.f32 %v1822_v47, %v1801_v11  ;;  %v1654_v42 = vadd.f32 %v1646_v38, %v1624_v14  ;;  %v1477_v60 = vadd.f32 %v1469_v40, %v1446_v55  ;;  %v1839_v25 = vld [vmem:[#allocation4 + $0x91] sm:$0xff] }
 0x1f5   : > { %1065 = vst.msk [vmem:[#allocation2 + $0x1a2] sm:$0xff] %vm1033_vm4, %v1000_v53  ;;  %v1130_v24 = vld [vmem:[#allocation2 + $0x180] ss:$2 sm:$0xff]  ;;  %v1132_v41 = vld [vmem:[#allocation2 + $0x190] ss:$2 sm:$0x3]  ;;  %v2006_v9 = vadd.f32 %v5035_v32, %v1977_v61  ;;  %v1970_v52 = vmul.f32 %v4922_v62, %v5039_v54  ;;  %v1704_v47 = vmul.f32 %v4820_v34, %v5055_v35  ;;  %v1323_v32 = vmul.f32 %v4755_v21, %v5110_v22 }
 0x1f6   : > { %1295 = vst.msk [vmem:[#allocation4 + $0xf0] sm:$0xff] %vm824_vm0, %v1246_v10  ;;  %v5113_v53 = vld [vmem:[#allocation4 + $0xa0] sm:$0xff]  ;;  %1177 = vst.msk [vmem:[#allocation3 + $0x100] sm:$0xff] %vm824_vm0, %v1130_v24  ;;  %v1252_v50 = vld [vmem:[#allocation2 + $0x191] ss:$2 sm:$0x3]  ;;  %v1528_v10 = vmul.f32 %v4783_v56, %v5101_v29  ;;  %v1859_v16 = vadd.f32 %v1851_v49, %v1830_v51  ;;  %v1683_v44 = vadd.f32 %v1675_v7, %v1654_v42 }
 0x1f7   : > { %1178 = vst.msk [vmem:[#allocation3 + $0x108] sm:$0x3] %vm840_vm2, %v1132_v41  ;;  %v1250_v3 = vld [vmem:[#allocation2 + $0x181] ss:$2 sm:$0xff]  ;;  %1298 = vst.msk [vmem:[#allocation4 + $0x108] sm:$0x3] %vm840_vm2, %v1252_v50  ;;  %v1507_v40 = vadd.f32 %v1499_v8, %v1477_v60  ;;  %v2035_v54 = vadd.f32 %v5051_v6, %v2006_v9  ;;  %v1999_v39 = vmul.f32 %v4924_v63, %v5055_v35 }
 0x1f8   : > { %1297 = vst.msk [vmem:[#allocation4 + $0x100] sm:$0xff] %vm824_vm0, %v1250_v3  ;;  %v5128_v38 = vld [vmem:[#allocation3 + $0xa1] sm:$0xff]  ;;  %v1733_v11 = vmul.f32 %v4832_v57, %v5067_v13  ;;  %v1868_v14 = vld [vmem:[#allocation3 + $0x92] sm:$0xff]  ;;  %v1352_v55 = vmul.f32 %v4757_v23, %v5113_v53  ;;  %v1888_v7 = vadd.f32 %v1880_v2, %v1859_v16  ;;  %v1712_v24 = vadd.f32 %v1704_v47, %v1683_v44 }
 0x1f9   : > { %v5139_v41 = vld [vmem:[#allocation4 + $0xa1] sm:$0xff]  ;;  %v1536_v51 = vadd.f32 %v1528_v10, %v1507_v40  ;;  %v1557_v21 = vmul.f32 %v4790_v4, %v1839_v25  ;;  %4015 = vmatmul.mubr.msk.f32.vlgmr.msra.gmra.mrb[8].mxu1 %vm470_vm1, %v2035_v54  ;;  %v2198_v6 = vadd.f32 %v5086_v27, %v2035_v54  ;;  %v1764_v23 = vmul.f32 %v4834_v59, %v5073_v1  ;;  %v5155_v10 = vld [vmem:[#allocation3 + $0xb0] sm:$0xff] }
 0x1fa   : > { %v1360_v2 = vadd.f32 %v1352_v55, %v1323_v32  ;;  %v1381_v60 = vmul.f32 %v4761_v26, %v5128_v38  ;;  %v1919_v8 = vadd.f32 %v1911_v58, %v1888_v7  ;;  %v1741_v3 = vadd.f32 %v1733_v11, %v1712_v24  ;;  %v5152_v50 = vld [vmem:[#allocation3 + $0xa2] sm:$0xff] }
 0x1fb   : > { %v1565_v9 = vadd.f32 %v1557_v21, %v1536_v51  ;;  %v1586_v47 = vmul.f32 %v4796_v15, %v1868_v14  ;;  %2215 = vrot.lane.b32.xlu0 %v2198_v6, %s4240_s19  ;;  %v2028_v1 = vmul.f32 %v4950_v30, %v5067_v13  ;;  %v1794_v26 = vmul.f32 %v4850_v5, %v5093_v12 }
 0x1fc   : > { %v1134_v49 = vld [vmem:[#allocation2 + $0x198] ss:$2 sm:$0xff]  ;;  %v1136_v61 = vld [vmem:[#allocation2 + $0x1a8] ss:$2 sm:$0x3]  ;;  %v1389_v16 = vadd.f32 %v1381_v60, %v1360_v2  ;;  %v1410_v58 = vmul.f32 %v4764_v31, %v5139_v41  ;;  %v1949_v44 = vadd.f32 %v1941_v36, %v1919_v8  ;;  %v1772_v40 = vadd.f32 %v1764_v23, %v1741_v3  ;;  %v1782_v36 = vld [vmem:[#allocation4 + $0xb0] sm:$0xff] }
 0x1fd   : > { %1179 = vst.msk [vmem:[#allocation3 + $0x110] sm:$0xff] %vm824_vm0, %v1134_v49  ;;  %v1254_v35 = vld [vmem:[#allocation2 + $0x199] ss:$2 sm:$0xff]  ;;  %v1256_v42 = vld [vmem:[#allocation2 + $0x1a9] ss:$2 sm:$0x3]  ;;  %v1594_v32 = vadd.f32 %v1586_v47, %v1565_v9  ;;  %v1617_v54 = vmul.f32 %v4808_v20, %v5110_v22  ;;  %v1823_v11 = vmul.f32 %v4852_v18, %v5101_v29  ;;  %v1439_v13 = vmul.f32 %v4769_v37, %v5152_v50 }
 0x1fe   : > { %1180 = vst.msk [vmem:[#allocation3 + $0x118] sm:$0x3] %vm840_vm2, %v1136_v61  ;;  %1300 = vst.msk [vmem:[#allocation4 + $0x118] sm:$0x3] %vm840_vm2, %v1256_v42  ;;  %v1418_v55 = vadd.f32 %v1410_v58, %v1389_v16  ;;  %v1470_v12 = vmul.f32 %v4774_v43, %v5155_v10  ;;  %v1978_v49 = vadd.f32 %v1970_v52, %v1949_v44  ;;  %v1811_v52 = vld [vmem:[#allocation3 + $0xb1] sm:$0xff]  ;;  %v5180_v42 = vld [vmem:[#allocation3 + $0xc0] sm:$0xff] }
 0x1ff   : > { %1299 = vst.msk [vmem:[#allocation4 + $0x110] sm:$0xff] %vm824_vm0, %v1254_v35  ;;  %v1802_v61 = vadd.f32 %v1794_v26, %v1772_v40  ;;  %v1625_v7 = vadd.f32 %v1617_v54, %v1594_v32  ;;  %v1647_v31 = vmul.f32 %v4813_v28, %v5113_v53  ;;  %v1852_v24 = vmul.f32 %v4870_v45, %v1839_v25  ;;  %v5182_v23 = vld [vmem:[#allocation4 + $0xc0] sm:$0xff]  ;;  %v1840_v47 = vld [vmem:[#allocation4 + $0xb1] sm:$0xff]  ;;  %v5196_v44 = vld [vmem:[#allocation6] ss:$0 sm:$0xff] }
 0x200   : > { %v1881_v51 = vmul.f32 %v4872_v46, %v1868_v14  ;;  %v1912_v29 = vmul.f32 %v4892_v17, %v5110_v22  ;;  %v1447_v21 = vadd.f32 %v1439_v13, %v1418_v55  ;;  %v2007_v6 = vadd.f32 %v1999_v39, %v1978_v49  ;;  %v5188_v2 = vld [vmem:[#allocation3 + $0xc1] sm:$0xff]  ;;  %v1869_v16 = vld [vmem:[#allocation3 + $0xb2] sm:$0xff]  ;;  %v5200_v32 = vld [vmem:[#allocation6 + $0x1] ss:$0 sm:$0xff] }
 0x201   : > { %v1831_v37 = vadd.f32 %v1823_v11, %v1802_v61  ;;  %v1655_v35 = vadd.f32 %v1647_v31, %v1625_v7  ;;  %v1676_v43 = vmul.f32 %v4818_v33, %v5128_v38  ;;  %v1942_v25 = vmul.f32 %v4894_v19, %v5113_v53  ;;  %v5193_v26 = vld [vmem:[#allocation4 + $0xc1] sm:$0xff]  ;;  %v5208_v13 = vld [vmem:[#allocation6 + $0x2] ss:$0 sm:$0xff]  ;;  %v5213_v7 = vld [vmem:[#allocation6 + $0x3] ss:$0 sm:$0xff] }
 0x202   : > { %v1705_v14 = vmul.f32 %v4820_v34, %v5139_v41  ;;  %v1478_v22 = vadd.f32 %v1470_v12, %v1447_v21  ;;  %v1500_v39 = vmul.f32 %v4778_v48, %v1782_v36  ;;  %v2036_v60 = vadd.f32 %v2028_v1, %v2007_v6  ;;  %v5206_v55 = vld [vmem:[#allocation3 + $0xc2] sm:$0xff] }
 0x203   : > { %v1860_v8 = vadd.f32 %v1852_v24, %v1831_v37  ;;  %v1684_v3 = vadd.f32 %v1676_v43, %v1655_v35  ;;  %v1734_v9 = vmul.f32 %v4832_v57, %v5152_v50  ;;  %v1529_v53 = vmul.f32 %v4783_v56, %v1811_v52  ;;  %v5221_v37 = vld [vmem:[#allocation3 + $0xd0] sm:$0xff] }
 0x204   : > { %v1508_v58 = vadd.f32 %v1500_v39, %v1478_v22  ;;  %v1324_v40 = vmul.f32 %v5196_v44, %v5180_v42  ;;  %v1353_v48 = vmul.f32 %v5200_v32, %v5182_v23  ;;  %4017 = vmatprep.mubr.msk.f32.mxu1 %vm470_vm1, %v2036_v60  ;;  %v2199_v1 = vadd.f32 %v5086_v27, %v2036_v60 }
 0x205   : > { %v1889_v54 = vadd.f32 %v1881_v51, %v1860_v8  ;;  %v1713_v11 = vadd.f32 %v1705_v14, %v1684_v3  ;;  %v1382_v56 = vmul.f32 %v5208_v13, %v5188_v2  ;;  %v1558_v49 = vmul.f32 %v4790_v4, %v1840_v47  ;;  %v5225_v14 = vld [vmem:[#allocation6 + $0x4] ss:$0 sm:$0xff] }
 0x206   : > { %v1537_v12 = vadd.f32 %v1529_v53, %v1508_v58  ;;  %v1361_v61 = vadd.f32 %v1353_v48, %v1324_v40  ;;  %v1411_v31 = vmul.f32 %v5213_v7, %v5193_v26  ;;  %2217 = vrot.lane.b32.xlu1 %v2199_v1, %s4240_s19  ;;  %v1765_v21 = vmul.f32 %v4834_v59, %v5155_v10 }
 0x207   : > { %v1920_v24 = vadd.f32 %v1912_v29, %v1889_v54  ;;  %v1742_v51 = vadd.f32 %v1734_v9, %v1713_v11  ;;  %v1587_v6 = vmul.f32 %v4796_v15, %v1869_v16  ;;  %v1618_v4 = vmul.f32 %v4808_v20, %v5180_v42  ;;  %v5232_v15 = vld [vmem:[#allocation4 + $0xd0] sm:$0xff]  ;;  %v5236_v9 = vld [vmem:[#allocation6 + $0x8] ss:$0 sm:$0xff]  ;;  %v5247_v54 = vld [vmem:[#allocation6 + $0x9] ss:$0 sm:$0xff] }
 0x208   : > { %v1566_v35 = vadd.f32 %v1558_v49, %v1537_v12  ;;  %v1390_v43 = vadd.f32 %v1382_v56, %v1361_v61  ;;  %v1440_v22 = vmul.f32 %v5225_v14, %v5206_v55  ;;  %v1971_v29 = vmul.f32 %v4922_v62, %v5128_v38  ;;  %v5253_v61 = vld [vmem:[#allocation4 + $0xd1] sm:$0xff] }
 0x209   : > { %v1950_v39 = vadd.f32 %v1942_v25, %v1920_v24  ;;  %v1773_v60 = vadd.f32 %v1765_v21, %v1742_v51  ;;  %v1795_v10 = vmul.f32 %v4850_v5, %v1782_v36  ;;  %v2000_v8 = vmul.f32 %v4924_v63, %v5139_v41  ;;  %v5243_v36 = vld [vmem:[#allocation3 + $0xd1] sm:$0xff]  ;;  %v5257_v24 = vld [vmem:[#allocation3 + $0xe0] sm:$0xff]  ;;  %v5261_v21 = vld [vmem:[#allocation6 + $0xa] ss:$0 sm:$0xff] }
 0x20a   : > { %v1595_v3 = vadd.f32 %v1587_v6, %v1566_v35  ;;  %v1419_v20 = vadd.f32 %v1411_v31, %v1390_v43  ;;  %v1471_v58 = vmul.f32 %v5236_v9, %v5221_v37  ;;  %v2029_v25 = vmul.f32 %v4950_v30, %v5152_v50  ;;  %v1870_v43 = vld [vmem:[#allocation3 + $0xd2] sm:$0xff] }
 0x20b   : > { %v1979_v53 = vadd.f32 %v1971_v29, %v1950_v39  ;;  %v1803_v38 = vadd.f32 %v1795_v10, %v1773_v60  ;;  %v1824_v40 = vmul.f32 %v4852_v18, %v1811_v52  ;;  %v1648_v41 = vmul.f32 %v4813_v28, %v5182_v23  ;;  %v5259_v28 = vld [vmem:[#allocation4 + $0xe0] sm:$0xff]  ;;  %v5275_v10 = vld [vmem:[#allocation6 + $0xb] ss:$0 sm:$0xff] }
 0x20c   : > { %v1626_v48 = vadd.f32 %v1618_v4, %v1595_v3  ;;  %v1448_v1 = vadd.f32 %v1440_v22, %v1419_v20  ;;  %v1501_v11 = vmul.f32 %v5247_v54, %v5232_v15  ;;  %v1853_v49 = vmul.f32 %v4870_v45, %v1840_v47  ;;  %v5273_v29 = vld [vmem:[#allocation4 + $0xe1] sm:$0xff] }
 0x20d   : > { %v2008_v56 = vadd.f32 %v2000_v8, %v1979_v53  ;;  %v1832_v12 = vadd.f32 %v1824_v40, %v1803_v38  ;;  %v1882_v50 = vmul.f32 %v4872_v46, %v1869_v16  ;;  %v1677_v31 = vmul.f32 %v4818_v33, %v5188_v2  ;;  %v5269_v33 = vld [vmem:[#allocation3 + $0xe1] sm:$0xff] }
 0x20e   : > { %v1656_v52 = vadd.f32 %v1648_v41, %v1626_v48  ;;  %v1479_v51 = vadd.f32 %v1471_v58, %v1448_v1  ;;  %v1530_v6 = vmul.f32 %v5261_v21, %v5243_v36  ;;  %v1913_v16 = vmul.f32 %v4892_v17, %v5180_v42  ;;  %v5285_v58 = vld [vmem:[#allocation3 + $0xe2] sm:$0xff] }
 0x20f   : > { %v2037_v35 = vadd.f32 %v2029_v25, %v2008_v56  ;;  %v1861_v47 = vadd.f32 %v1853_v49, %v1832_v12  ;;  %v1706_v4 = vmul.f32 %v4820_v34, %v5193_v26  ;;  %v1735_v39 = vmul.f32 %v4832_v57, %v5206_v55  ;;  %v5287_v25 = vld [vmem:[#allocation6 + $0xc] ss:$0 sm:$0xff]  ;;  %v1753_v12 = vld [vmem:[#allocation3 + $0xf0] sm:$0xff] }
 0x210   : > { %v1685_v22 = vadd.f32 %v1677_v31, %v1656_v52  ;;  %v1509_v60 = vadd.f32 %v1501_v11, %v1479_v51  ;;  %v1559_v8 = vmul.f32 %v5275_v10, %v5253_v61  ;;  %v1325_v3 = vmul.f32 %v5196_v44, %v5257_v24 }
 0x211   : > { %4018 = vmatmul.mubr.msk.f32.gmra.mrb[10].mxu1 %vm470_vm1, %v2037_v35  ;;  %v2200_v42 = vadd.f32 %v5086_v27, %v2037_v35  ;;  %v1890_v34 = vadd.f32 %v1882_v50, %v1861_v47  ;;  %v1354_v20 = vmul.f32 %v5200_v32, %v5259_v28  ;;  %v1588_v38 = vmul.f32 %v5287_v25, %v1870_v43  ;;  %v1784_v35 = vld [vmem:[#allocation4 + $0xf0] sm:$0xff] }
 0x212   : > { %v1714_v57 = vadd.f32 %v1706_v4, %v1685_v22  ;;  %v1538_v53 = vadd.f32 %v1530_v6, %v1509_v60  ;;  %v1383_v40 = vmul.f32 %v5208_v13, %v5269_v33  ;;  %v1943_v44 = vmul.f32 %v4894_v19, %v5182_v23  ;;  %v4122_v22 = vld [vmem:[#allocation6 + $0x11] ss:$0 sm:$0xff] }
 0x213   : > { %2219 = vrot.lane.b32.xlu0 %v2200_v42, %s4240_s19  ;;  %v1921_v48 = vadd.f32 %v1913_v16, %v1890_v34  ;;  %v1362_v41 = vadd.f32 %v1354_v20, %v1325_v3  ;;  %v1412_v32 = vmul.f32 %v5213_v7, %v5273_v29  ;;  %v1766_v11 = vmul.f32 %v4834_v59, %v5221_v37  ;;  %v4121_v7 = vld [vmem:[#allocation6 + $0x10] ss:$0 sm:$0xff]  ;;  %v4123_v3 = vld [vmem:[#allocation6 + $0x12] ss:$0 sm:$0xff] }
 0x214   : > { %v1743_v1 = vadd.f32 %v1735_v39, %v1714_v57  ;;  %v1567_v56 = vadd.f32 %v1559_v8, %v1538_v53  ;;  %v1972_v13 = vmul.f32 %v4922_v62, %v5188_v2  ;;  %v1441_v52 = vmul.f32 %v5225_v14, %v5285_v58 }
 0x215   : > { %v1951_v49 = vadd.f32 %v1943_v44, %v1921_v48  ;;  %v1391_v50 = vadd.f32 %v1383_v40, %v1362_v41  ;;  %v1796_v23 = vmul.f32 %v4850_v5, %v5232_v15  ;;  %v1619_v6 = vmul.f32 %v4121_v7, %v5257_v24  ;;  %v1813_v15 = vld [vmem:[#allocation3 + $0xf1] sm:$0xff]  ;;  %v4124_v48 = vld [vmem:[#allocation6 + $0x13] ss:$0 sm:$0xff] }
 0x216   : > { %v1774_v31 = vadd.f32 %v1766_v11, %v1743_v1  ;;  %v1596_v51 = vadd.f32 %v1588_v38, %v1567_v56  ;;  %v2001_v37 = vmul.f32 %v4924_v63, %v5193_v26  ;;  %v1472_v2 = vmul.f32 %v5236_v9, %v1753_v12  ;;  %v1871_v44 = vld [vmem:[#allocation3 + $0xf2] sm:$0xff]  ;;  %v4125_v56 = vld [vmem:[#allocation6 + $0x14] ss:$0 sm:$0xff] }
 0x217   : > { %v1980_v59 = vadd.f32 %v1972_v13, %v1951_v49  ;;  %v1420_v47 = vadd.f32 %v1412_v32, %v1391_v50  ;;  %v1825_v14 = vmul.f32 %v4852_v18, %v5243_v36  ;;  %v1649_v5 = vmul.f32 %v4122_v22, %v5259_v28  ;;  %v1842_v36 = vld [vmem:[#allocation4 + $0xf1] sm:$0xff]  ;;  %v1901_v49 = vld [vmem:[#allocation3 + $0x100] sm:$0xff] }
 0x218   : > { %v1804_v16 = vadd.f32 %v1796_v23, %v1774_v31  ;;  %v1627_v4 = vadd.f32 %v1619_v6, %v1596_v51  ;;  %v2030_v60 = vmul.f32 %v4950_v30, %v5206_v55  ;;  %v1502_v42 = vmul.f32 %v5247_v54, %v1784_v35  ;;  %v1932_v6 = vld [vmem:[#allocation4 + $0x100] sm:$0xff] }
 0x219   : > { %v2009_v39 = vadd.f32 %v2001_v37, %v1980_v59  ;;  %v1449_v8 = vadd.f32 %v1441_v52, %v1420_v47  ;;  %v1854_v9 = vmul.f32 %v4870_v45, %v5253_v61  ;;  %v1678_v18 = vmul.f32 %v4123_v3, %v5269_v33 }
 0x21a   : > { %v1833_v26 = vadd.f32 %v1825_v14, %v1804_v16  ;;  %v1657_v34 = vadd.f32 %v1649_v5, %v1627_v4  ;;  %v1531_v53 = vmul.f32 %v5261_v21, %v1813_v15  ;;  %v1883_v40 = vmul.f32 %v4872_v46, %v1870_v43  ;;  %v4127_v16 = vld [vmem:[#allocation6 + $0x19] ss:$0 sm:$0xff]  ;;  %v1961_v4 = vld [vmem:[#allocation3 + $0x101] sm:$0xff] }
 0x21b   : > { %v2038_v20 = vadd.f32 %v2030_v60, %v2009_v39  ;;  %v1480_v57 = vadd.f32 %v1472_v2, %v1449_v8  ;;  %v1707_v54 = vmul.f32 %v4124_v48, %v5273_v29  ;;  %v1560_v32 = vmul.f32 %v5275_v10, %v1842_v36  ;;  %v4126_v10 = vld [vmem:[#allocation6 + $0x18] ss:$0 sm:$0xff]  ;;  %v4128_v8 = vld [vmem:[#allocation6 + $0x1a] ss:$0 sm:$0xff] }
 0x21c   : > { %v1862_v38 = vadd.f32 %v1854_v9, %v1833_v26  ;;  %v1686_v55 = vadd.f32 %v1678_v18, %v1657_v34  ;;  %v1914_v11 = vmul.f32 %v4892_v17, %v5257_v24  ;;  %v1736_v43 = vmul.f32 %v4125_v56, %v5285_v58  ;;  %v2019_v18 = vld [vmem:[#allocation3 + $0x102] sm:$0xff] }
 0x21d   : > { %4020 = vmatprep.mubr.msk.f32.mxu1 %vm470_vm1, %v2038_v20  ;;  %v2201_v61 = vadd.f32 %v5086_v27, %v2038_v20  ;;  %v1510_v41 = vadd.f32 %v1502_v42, %v1480_v57  ;;  %v1589_v50 = vmul.f32 %v5287_v25, %v1871_v44  ;;  %v1944_v31 = vmul.f32 %v4894_v19, %v5259_v28  ;;  %v1990_v42 = vld [vmem:[#allocation4 + $0x101] sm:$0xff] }
 0x21e   : > { %v1891_v1 = vadd.f32 %v1883_v40, %v1862_v38  ;;  %v1715_v21 = vadd.f32 %v1707_v54, %v1686_v55  ;;  %v1767_v51 = vmul.f32 %v4126_v10, %v1753_v12  ;;  %v1620_v24 = vmul.f32 %v4121_v7, %v1901_v49  ;;  %v1754_v38 = vld [vmem:[#allocation3 + $0x110] sm:$0xff] }
 0x21f   : > { %2221 = vrot.lane.b32.xlu1 %v2201_v61, %s4240_s19  ;;  %v1539_v13 = vadd.f32 %v1531_v53, %v1510_v41  ;;  %v1973_v47 = vmul.f32 %v4922_v62, %v5269_v33  ;;  %v1797_v14 = vmul.f32 %v4127_v16, %v1784_v35  ;;  %v1650_v25 = vmul.f32 %v4122_v22, %v1932_v6  ;;  %v1785_v54 = vld [vmem:[#allocation4 + $0x110] sm:$0xff] }
 0x220   : > { %v1922_v52 = vadd.f32 %v1914_v11, %v1891_v1  ;;  %v1744_v23 = vadd.f32 %v1736_v43, %v1715_v21  ;;  %v2002_v28 = vmul.f32 %v4924_v63, %v5273_v29  ;;  %v1826_v12 = vmul.f32 %v4128_v8, %v1813_v15  ;;  %v1814_v41 = vld [vmem:[#allocation3 + $0x111] sm:$0xff] }
 0x221   : > { %v1568_v59 = vadd.f32 %v1560_v32, %v1539_v13  ;;  %v1679_v7 = vmul.f32 %v4123_v3, %v1961_v4  ;;  %v2031_v33 = vmul.f32 %v4950_v30, %v5285_v58  ;;  %v1855_v35 = vmul.f32 %v4870_v45, %v1842_v36  ;;  %v1843_v11 = vld [vmem:[#allocation4 + $0x111] sm:$0xff] }
 0x222   : > { %v1952_v37 = vadd.f32 %v1944_v31, %v1922_v52  ;;  %v1775_v2 = vadd.f32 %v1767_v51, %v1744_v23  ;;  %v1708_v22 = vmul.f32 %v4124_v48, %v1990_v42  ;;  %v1884_v29 = vmul.f32 %v4872_v46, %v1871_v44  ;;  %v4130_v51 = vld [vmem:[#allocation6 + $0x1c] ss:$0 sm:$0xff] }
 0x223   : > { %v1597_v5 = vadd.f32 %v1589_v50, %v1568_v59  ;;  %v1737_v15 = vmul.f32 %v4125_v56, %v2019_v18  ;;  %v1915_v58 = vmul.f32 %v4892_v17, %v1901_v49  ;;  %v1768_v45 = vmul.f32 %v4126_v10, %v1754_v38  ;;  %v1872_v49 = vld [vmem:[#allocation3 + $0x112] sm:$0xff]  ;;  %v4129_v50 = vld [vmem:[#allocation6 + $0x1b] ss:$0 sm:$0xff]  ;;  %v3855_v38 = vld [vmem:[%s6336_s5] ss:$0 sm:$0xff] }
 0x224   : > { %v1981_v39 = vadd.f32 %v1973_v47, %v1952_v37  ;;  %v1805_v60 = vadd.f32 %v1797_v14, %v1775_v2  ;;  %v1945_v48 = vmul.f32 %v4894_v19, %v1932_v6  ;;  %v1798_v44 = vmul.f32 %v4127_v16, %v1785_v54  ;;  %v1902_v19 = vld [vmem:[#allocation3 + $0x120] sm:$0xff]  ;;  %v4131_v47 = vld [vmem:[#allocation6 + $0x20] ss:$0 sm:$0xff] }
 0x225   : > { %v1628_v26 = vadd.f32 %v1620_v24, %v1597_v5  ;;  %v1974_v1 = vmul.f32 %v4922_v62, %v1961_v4  ;;  %v1827_v56 = vmul.f32 %v4128_v8, %v1814_v41  ;;  %v2003_v17 = vmul.f32 %v4924_v63, %v1990_v42  ;;  %v1933_v24 = vld [vmem:[#allocation4 + $0x120] sm:$0xff]  ;;  %v4132_v5 = vld [vmem:[#allocation6 + $0x21] ss:$0 sm:$0xff] }
 0x226   : > { %v2010_v9 = vadd.f32 %v2002_v28, %v1981_v39  ;;  %v1834_v34 = vadd.f32 %v1826_v12, %v1805_v60  ;;  %v1856_v52 = vmul.f32 %v4129_v50, %v1843_v11  ;;  %v2032_v23 = vmul.f32 %v4950_v30, %v2019_v18  ;;  %v1962_v14 = vld [vmem:[#allocation3 + $0x121] sm:$0xff] }
 0x227   : > { %v1658_v20 = vadd.f32 %v1650_v25, %v1628_v26  ;;  %v1885_v6 = vmul.f32 %v4130_v51, %v1872_v49  ;;  %v1916_v2 = vmul.f32 %v4131_v47, %v1902_v19  ;;  %v1946_v25 = vmul.f32 %v4132_v5, %v1933_v24  ;;  %v1991_v39 = vld [vmem:[#allocation4 + $0x121] sm:$0xff] }
 0x228   : > { %v2039_v57 = vadd.f32 %v2031_v33, %v2010_v9  ;;  %v1863_v53 = vadd.f32 %v1855_v35, %v1834_v34  ;;  %v1975_v60 = vmul.f32 %v4922_v62, %v1962_v14  ;;  %v2020_v8 = vld [vmem:[#allocation3 + $0x122] sm:$0xff]  ;;  %v2004_v42 = vmul.f32 %v4924_v63, %v1991_v39  ;;  %v2245_v35 = vld [vmem:[#allocation8] sm:$0xff]  ;;  %v2248_v62 = vld [vmem:[#allocation8 + $0x18] sm:$0xff] }
 0x229   : > { %v1687_v40 = vadd.f32 %v1679_v7, %v1658_v20  ;;  %v2033_v7 = vmul.f32 %v4950_v30, %v2020_v8  ;;  %v2246_v18 = vld [vmem:[#allocation8 + $0x8] sm:$0xff]  ;;  %v2247_v20 = vld [vmem:[#allocation8 + $0x10] sm:$0xff]  ;;  %v2386_v63 = vlaneseq  ;;  %vm2427_vm0 = vcmask 517120  }
 0x22a   : > { %4021 = vmatmul.mubr.msk.f32.gmra.mrb[12].mxu1 %vm470_vm1, %v2039_v57  ;;  %v2202_v3 = vadd.f32 %v5086_v27, %v2039_v57  ;;  %v1892_v55 = vadd.f32 %v1884_v29, %v1863_v53  ;;  %v4058_v57 = vpack.c.bf16 %v2248_v62, %v2247_v20  ;;  %v5360_v53 = vld [vmem:[%s6340_s9 + $0x1] ss:$8 sm:$0x3]  ;;  %v3876_v8 = vld [vmem:[%s6340_s9 + $0x3] ss:$8 sm:$0x3] }
 0x22b   : > { %v1716_v61 = vadd.f32 %v1708_v22, %v1687_v40  ;;  %v4054_v22 = vpack.c.bf16 %v2246_v18, %v2245_v35  ;;  %v2620_v30 = vshrl.u32 %v2386_v63, 7  ;;  %v3884_v62 = vld [vmem:[%s6340_s9 + $0x21] ss:$8 sm:$0x3]  ;;  %2428 = vst.msk [vmem:[#allocation5 + $0x18] sm:$0x3] %vm2427_vm0, %v4238_v0 }
 0x22c   : > { %2223 = vrot.lane.b32.xlu0 %v2202_v3, %s4240_s19  ;;  %v1923_v36 = vadd.f32 %v1915_v58, %v1892_v55  ;;  %vm2510_vm2 = vcmask 254976   ;;  %vm2531_vm4 = vcmask 523522  }
 0x22d   : > { %v1745_v46 = vadd.f32 %v1737_v15, %v1716_v61  ;;  %4055 = vmatprep.subr.bf16.mxu1 %v4054_v22  ;;  %v5378_v39 = vsub.s32 1, %v2620_v30 }
 0x22e   : > { %v1953_v32 = vadd.f32 %v1945_v48, %v1923_v36  ;;  %4057 = vmatpush3.bf16.msra.mxu1 %v4054_v22  ;;  %v3881_v22 = vld [vmem:[%s6340_s9 + $0x13] ss:$8 sm:$0x3] }
 0x22f   : > { %v1776_v21 = vadd.f32 %v1768_v45, %v1745_v46  ;;  %4059 = vmatprep.subr.bf16.mxu1 %v4058_v57  ;;  %6393 = vst [vmem:[#allocation14_spill] sm:$0xff] %v5378_v39 }
 0x230   : > { %v1982_v43 = vadd.f32 %v1974_v1, %v1953_v32 }
 0x231   : > { %v1806_v13 = vadd.f32 %v1798_v44, %v1776_v21 }
 0x232   : > { %v2011_v31 = vadd.f32 %v2003_v17, %v1982_v43  ;;  %4061 = vmatpush3.bf16.msra.mxu1 %v4058_v57 }
 0x233   : > { %v1835_v10 = vadd.f32 %v1827_v56, %v1806_v13 }
 0x234   : > { %v2040_v59 = vadd.f32 %v2032_v23, %v2011_v31 }
 0x235   : > { %v1864_v37 = vadd.f32 %v1856_v52, %v1835_v10 }
 0x236   : > { %4023 = vmatprep.mubr.msk.f32.mxu1 %vm470_vm1, %v2040_v59  ;;  %v2203_v16 = vadd.f32 %v5086_v27, %v2040_v59 }
 0x237   : > { %v1893_v4 = vadd.f32 %v1885_v6, %v1864_v37 }
 0x238   : > { %2225 = vrot.lane.b32.xlu1 %v2203_v16, %s4240_s19 }
 0x239   : > { %v1924_v28 = vadd.f32 %v1916_v2, %v1893_v4 }
 0x23b   : > { %v1954_v12 = vadd.f32 %v1946_v25, %v1924_v28  ;;  %v3875_v28 = vld [vmem:[%s6340_s9 + $0x2] ss:$8 sm:$0x3] }
 0x23d   : > { %v1983_v26 = vadd.f32 %v1975_v60, %v1954_v12  ;;  %v2644_v12 = vrot.slane %v5360_v53, %v5378_v39 }
 0x23f   : > { %v2012_v9 = vadd.f32 %v2004_v42, %v1983_v26  ;;  %v2682_v26 = vrot.slane %v3875_v28, %v5378_v39 }
 0x241   : > { %v2041_v33 = vadd.f32 %v2033_v7, %v2012_v9  ;;  %v3879_v7 = vld [vmem:[%s6340_s9 + $0x11] ss:$8 sm:$0x3] }
 0x242   : > { %v2812_v18 = vrot.slane %v3879_v7, %v5378_v39 }
 0x243   : > { %4024 = vmatmul.mubr.msk.f32.gmra.mrb[14].mxu1 %vm470_vm1, %v2041_v33  ;;  %v2204_v34 = vadd.f32 %v5086_v27, %v2041_v33  ;;  %v5362_v27 = vsub.s32 0, %v2620_v30  ;;  %v2720_v33 = vrot.slane %v3876_v8, %v5378_v39  ;;  %v2916_v30 = vrot.slane %v3881_v22, %v5378_v39 }
 0x244   : > { %vm2458_vm1 = vcmask 1041409  }
 0x245   : > { %2227 = vrot.lane.b32.xlu0 %v2204_v34, %s4240_s19  ;;  %6392 = vst [vmem:[#allocation13_spill] sm:$0xff] %v5362_v27  ;;  %v2640_v29 = vrot.slane %v5360_v53, %v5362_v27  ;;  %v2678_v60 = vrot.slane %v3875_v28, %v5362_v27  ;;  %v2716_v42 = vrot.slane %v3876_v8, %v5362_v27  ;;  %v3880_v34 = vld [vmem:[%s6340_s9 + $0x12] ss:$8 sm:$0x3] }
 0x246   : > { %v2808_v9 = vrot.slane %v3879_v7, %v5362_v27  ;;  %v2860_v35 = vrot.slane %v3880_v34, %v5362_v27  ;;  %v2864_v20 = vrot.slane %v3880_v34, %v5378_v39  ;;  %v2912_v57 = vrot.slane %v3881_v22, %v5362_v27 }
 0x247   : > { %2645 = vrot.lane.b32.xlu1 %v2640_v29, %s4241_s13  ;;  %v3033_v53 = vrot.slane %v3884_v62, %v5362_v27  ;;  %v3885_v29 = vld [vmem:[%s6340_s9 + $0x22] ss:$8 sm:$0x3] }
 0x249   : > { %2647 = vrot.lane.b32.xlu0 %v2644_v12, %s4241_s13 }
 0x24b   : > { %2683 = vrot.lane.b32.xlu1 %v2678_v60, %s4242_s14 }
 0x24d   : > { %2685 = vrot.lane.b32.xlu0 %v2682_v26, %s4242_s14 }
 0x24f   : > { %2721 = vrot.lane.b32.xlu1 %v2716_v42, %s4243_s23 }
 0x251   : > { %2723 = vrot.lane.b32.xlu0 %v2720_v33, %s4243_s23 }
 0x253   : > { %2813 = vrot.lane.b32.xlu1 %v2808_v9, %s4241_s13 }
 0x255   : > { %2815 = vrot.lane.b32.xlu0 %v2812_v18, %s4241_s13 }
 0x257   : > { %2865 = vrot.lane.b32.xlu1 %v2860_v35, %s4242_s14 }
 0x259   : > { %2867 = vrot.lane.b32.xlu0 %v2864_v20, %s4242_s14 }
 0x25b   : > { %2917 = vrot.lane.b32.xlu1 %v2912_v57, %s4243_s23 }
 0x25d   : > { %2919 = vrot.lane.b32.xlu0 %v2916_v30, %s4243_s23 }
 0x25f   : > { %3038 = vrot.lane.b32.xlu1 %v3033_v53, %s4241_s13 }
 0x265   : > { %v2214_v61 = vpop.permute.xlu1 %2213 }
 0x26d   : > { %v2216_v45 = vpop.permute.xlu0 %2215 }
 0x278   : > { %v2218_v21 = vpop.permute.xlu1 %2217 }
 0x285   : > { %v2220_v56 = vpop.permute.xlu0 %2219 }
 0x291   : > { %v2222_v19 = vpop.permute.xlu1 %2221 }
 0x29e   : > { %v2224_v10 = vpop.permute.xlu0 %2223 }
 0x2aa   : > { %v2226_v14 = vpop.permute.xlu1 %2225 }
 0x2b7   : > { %v2228_v4 = vpop.permute.xlu0 %2227 }
 0x2cc   : > { %v4016_v40 = vpop.f32.mrb[8].mxu1 }
 0x2cd   : > { %v2147_v15 = vadd.f32 %v4016_v40, %v3855_v38  ;;  %v2141_v3 = vpop.f32.mrb[9].mxu1  ;;  %v3085_v40 = vrot.slane %v3885_v29, %v5362_v27 }
 0x2ce   : > { %v2142_v55 = vadd.f32 %v3855_v38, %v2141_v3  ;;  %v3089_v3 = vrot.slane %v3885_v29, %v5378_v39 }
 0x2cf   : > { %v2181_v58 = vmax.f32 %v2147_v15, 0.0  ;;  %v3886_v15 = vld [vmem:[%s6340_s9 + $0x23] ss:$8 sm:$0x3]  ;;  %3090 = vrot.lane.b32.xlu1 %v3085_v40, %s4242_s14 }
 0x2d0   : > { %v2180_v54 = vmax.f32 %v2142_v55, 0.0  ;;  %v3137_v55 = vrot.slane %v3886_v15, %v5362_v27 }
 0x2d1   : > { %v2238_v48 = vadd.f32 %v2216_v45, %v2181_v58  ;;  %v3141_v58 = vrot.slane %v3886_v15, %v5378_v39 }
 0x2d2   : > { %v2237_v36 = vadd.f32 %v2214_v61, %v2180_v54  ;;  %v3889_v54 = vld [vmem:[%s6340_s9 + $0x31] ss:$8 sm:$0x3]  ;;  %v5444_v61 = vld [vmem:[%s6340_s9 + $0x32] ss:$8 sm:$0x3] }
 0x2d3   : > { %3142 = vrot.lane.b32.xlu1 %v3137_v55, %s4243_s23  ;;  %v3258_v45 = vrot.slane %v3889_v54, %v5362_v27 }
 0x2d4   : > { %4034 = vmatprep.mubr.msk.f32.mxu1 %vm2256_vm5, %v2237_v36  ;;  %v3262_v36 = vrot.slane %v3889_v54, %v5378_v39 }
 0x2d5   : > { %4035 = vmatmul.mubr.msk.f32.vlgmr.msra.gmra.mrb[16].mxu1 %vm2256_vm5, %v2238_v48  ;;  %v3310_v48 = vrot.slane %v5444_v61, %v5362_v27 }
 0x2d7   : > { %3263 = vrot.lane.b32.xlu1 %v3258_v45, %s4241_s13 }
 0x2db   : > { %3315 = vrot.lane.b32.xlu1 %v3310_v48, %s4242_s14 }
 0x2e4   : > { %v4019_v41 = vpop.f32.mrb[10].mxu1 }
 0x2e5   : > { %v2157_v46 = vadd.f32 %v4019_v41, %v3855_v38  ;;  %v2151_v44 = vpop.f32.mrb[11].mxu1  ;;  %v2387_v41 = vand.u32 127, %v2386_v63 }
 0x2e6   : > { %v2152_v32 = vadd.f32 %v3855_v38, %v2151_v44 }
 0x2e7   : > { %v2183_v1 = vmax.f32 %v2157_v46, 0.0  ;;  %v5458_v46 = vld [vmem:[#allocation10] ss:$0 sm:$0xff]  ;;  %v2392_v44 = vand.u32 1, %v2387_v41 }
 0x2e8   : > { %v2182_v11 = vmax.f32 %v2152_v32, 0.0 }
 0x2e9   : > { %v2240_v17 = vadd.f32 %v2220_v56, %v2183_v1  ;;  %vm5461_vm9 = vcmp.eq.s32.totalorder %v2392_v44, 1 }
 0x2ea   : > { %v2239_v43 = vadd.f32 %v2218_v21, %v2182_v11 }
 0x2ec   : > { %4037 = vmatprep.mubr.msk.f32.mxu1 %vm2256_vm5, %v2239_v43 }
 0x2ed   : > { %4038 = vmatmul.mubr.msk.f32.gmra.mrb[18].mxu1 %vm2256_vm5, %v2240_v17 }
 0x2fd   : > { %v4022_v49 = vpop.f32.mrb[12].mxu1 }
 0x2fe   : > { %v2167_v13 = vadd.f32 %v4022_v49, %v3855_v38  ;;  %v2161_v50 = vpop.f32.mrb[13].mxu1 }
 0x2ff   : > { %v2162_v52 = vadd.f32 %v3855_v38, %v2161_v50 }
 0x300   : > { %v2185_v31 = vmax.f32 %v2167_v13, 0.0 }
 0x301   : > { %v2184_v23 = vmax.f32 %v2162_v52, 0.0 }
 0x302   : > { %v2242_v6 = vadd.f32 %v2224_v10, %v2185_v31 }
 0x303   : > { %v2241_v51 = vadd.f32 %v2222_v19, %v2184_v23 }
 0x305   : > { %4040 = vmatprep.mubr.msk.f32.mxu1 %vm2256_vm5, %v2241_v51 }
 0x306   : > { %4041 = vmatmul.mubr.msk.f32.gmra.mrb[20].mxu1 %vm2256_vm5, %v2242_v6 }
 0x316   : > { %v4025_v59 = vpop.f32.mrb[14].mxu1 }
 0x317   : > { %v2177_v24 = vadd.f32 %v4025_v59, %v3855_v38  ;;  %v2171_v37 = vpop.f32.mrb[15].mxu1 }
 0x318   : > { %v2172_v47 = vadd.f32 %v3855_v38, %v2171_v37  ;;  %v3037_v38 = vrot.slane %v3884_v62, %v5378_v39 }
 0x319   : > { %v2187_v2 = vmax.f32 %v2177_v24, 0.0 }
 0x31a   : > { %v2186_v16 = vmax.f32 %v2172_v47, 0.0  ;;  %3040 = vrot.lane.b32.xlu0 %v3037_v38, %s4241_s13 }
 0x31b   : > { %v2244_v25 = vadd.f32 %v2228_v4, %v2187_v2 }
 0x31c   : > { %v2243_v5 = vadd.f32 %v2226_v14, %v2186_v16 }
 0x31e   : > { %4043 = vmatprep.mubr.msk.f32.mxu1 %vm2256_vm5, %v2243_v5  ;;  %3092 = vrot.lane.b32.xlu0 %v3089_v3, %s4242_s14 }
 0x31f   : > { %4044 = vmatmul.mubr.msk.f32.gmra.mrb[22].mxu1 %vm2256_vm5, %v2244_v25 }
 0x322   : > { %3144 = vrot.lane.b32.xlu0 %v3141_v58, %s4243_s23 }
 0x326   : > { %3265 = vrot.lane.b32.xlu0 %v3262_v36, %s4241_s13 }
 0x3a8   : > { %v4036_v32 = vpop.f32.mrb[16].mxu1 }
 0x3a9   : > { %v2353_v1 = vadd.f32 %v4036_v32, %v5458_v46  ;;  %v2347_v11 = vpop.f32.mrb[17].mxu1 }
 0x3aa   : > { %v2348_v56 = vadd.f32 %v5458_v46, %v2347_v11 }
 0x3ab   : > { %v2402_v43 = vmax.f32 %v2353_v1, 0.0 }
 0x3ac   : > { %v2401_v17 = vmax.f32 %v2348_v56, 0.0 }
 0x3ad   : > { %v2412_v49 = vsel %vm5461_vm9, %v2402_v43, %v2353_v1 }
 0x3ae   : > { %v2493_v63 = vrot.slane %v2412_v49, 7  ;;  %v2578_v13 = vrot.slane %v2412_v49, 3  ;;  %v2411_v50 = vsel %vm5461_vm9, %v2401_v17, %v2348_v56  ;;  %v2442_v52 = vrot.slane %v2412_v49, 5 }
 0x3af   : > { %v2577_v31 = vrot.slane %v2411_v50, 4  ;;  %v2512_v23 = vrot.slane %v2411_v50, 1  ;;  %v2441_v19 = vrot.slane %v2411_v50, 6  ;;  %v2535_v10 = vrot.slane %v2411_v50, 2 }
 0x3b0   : > { %v2536_v51 = vrot.slane %v2412_v49, 1  ;;  %v2470_v6 = vrot.slane %v2411_v50, 7  ;;  %v2471_v59 = vrot.slane %v2412_v49, 6  ;;  %v2556_v24 = vrot.slane %v2411_v50, 3 }
 0x3b1   : > { %v2513_v37 = vsel %vm2443_vm10, %v2412_v49, %v2512_v23  ;;  %v2444_v47 = vsel %vm2443_vm10, %v2442_v52, %v2441_v19  ;;  %v2557_v2 = vrot.slane %v2412_v49, 2  ;;  %v2594_v16 = vrot.slane %v2411_v50, 5 }
 0x3b2   : > { %v2537_v14 = vsel %vm2443_vm10, %v2536_v51, %v2535_v10  ;;  %v2472_v4 = vsel %vm2443_vm10, %v2471_v59, %v2470_v6  ;;  %v2595_v5 = vrot.slane %v2412_v49, 4  ;;  %v2494_v28 = vsel %vm2443_vm10, %v2493_v63, %v2411_v50 }
 0x3b3   : > { %v2558_v25 = vsel %vm2443_vm10, %v2557_v2, %v2556_v24  ;;  %v2579_v60 = vsel %vm2443_vm10, %v2578_v13, %v2577_v31 }
 0x3b4   : > { %v2596_v8 = vsel %vm2443_vm10, %v2595_v5, %v2594_v16  ;;  %vm2491_vm10 = vcmask 1042176  }
 0x3c0   : > { %v4039_v12 = vpop.f32.mrb[18].mxu1 }
 0x3c1   : > { %v2363_v42 = vadd.f32 %v4039_v12, %v5458_v46  ;;  %v2357_v26 = vpop.f32.mrb[19].mxu1 }
 0x3c2   : > { %v2358_v7 = vadd.f32 %v5458_v46, %v2357_v26 }
 0x3c3   : > { %v2404_v9 = vmax.f32 %v2363_v42, 0.0 }
 0x3c4   : > { %v2403_v33 = vmax.f32 %v2358_v7, 0.0 }
 0x3c5   : > { %v2414_v34 = vsel %vm5461_vm9, %v2404_v9, %v2363_v42 }
 0x3c6   : > { %v2413_v35 = vsel %vm5461_vm9, %v2403_v33, %v2358_v7  ;;  %v2516_v18 = vrot.slane %v2414_v34, 6  ;;  %v2448_v20 = vrot.slane %v2414_v34, 3  ;;  %v2539_v22 = vrot.slane %v2414_v34, 7 }
 0x3c7   : > { %v2580_v62 = vrot.slane %v2413_v35, 2  ;;  %v2514_v57 = vrot.slane %v2413_v35, 7  ;;  %v2445_v30 = vrot.slane %v2413_v35, 4  ;;  %v2538_v53 = vsel %vm2446_vm11, %v2413_v35, %v2537_v14 }
 0x3c8   : > { %v2540_v29 = vsel %vm2449_vm12, %v2539_v22, %v2538_v53  ;;  %v2473_v38 = vrot.slane %v2413_v35, 5  ;;  %v2475_v40 = vrot.slane %v2414_v34, 4  ;;  %v2559_v15 = vrot.slane %v2413_v35, 1 }
 0x3c9   : > { %v2515_v3 = vsel %vm2446_vm11, %v2514_v57, %v2513_v37  ;;  %v2447_v55 = vsel %vm2446_vm11, %v2445_v30, %v2444_v47  ;;  %v2597_v58 = vrot.slane %v2413_v35, 3  ;;  %v2599_v54 = vrot.slane %v2414_v34, 2 }
 0x3ca   : > { %v2517_v45 = vsel %vm2449_vm12, %v2516_v18, %v2515_v3  ;;  %v2450_v36 = vsel %vm2449_vm12, %v2448_v20, %v2447_v55  ;;  %v2474_v48 = vsel %vm2446_vm11, %v2473_v38, %v2472_v4  ;;  %v2560_v41 = vsel %vm2446_vm11, %v2559_v15, %v2558_v25 }
 0x3cb   : > { %v2476_v44 = vsel %vm2449_vm12, %v2475_v40, %v2474_v48  ;;  %v2561_v32 = vsel %vm2449_vm12, %v2414_v34, %v2560_v41  ;;  %v2598_v1 = vsel %vm2446_vm11, %v2597_v58, %v2596_v8  ;;  %v2495_v56 = vrot.slane %v2413_v35, 6 }
 0x3cc   : > { %v2600_v11 = vsel %vm2449_vm12, %v2599_v54, %v2598_v1  ;;  %v2581_v43 = vsel %vm2446_vm11, %v2580_v62, %v2579_v60  ;;  %v2497_v17 = vrot.slane %v2414_v34, 5  ;;  %v2582_v49 = vrot.slane %v2414_v34, 1 }
 0x3cd   : > { %v2496_v63 = vsel %vm2446_vm11, %v2495_v56, %v2494_v28  ;;  %vm2687_vm11 = vcmask 523264  }
 0x3ce   : > { %v2498_v13 = vsel %vm2449_vm12, %v2497_v17, %v2496_v63  ;;  %v2583_v50 = vsel %vm2449_vm12, %v2582_v49, %v2581_v43  ;;  %vm2789_vm12 = vcmask 1046528  }
 0x3d9   : > { %v4042_v52 = vpop.f32.mrb[20].mxu1 }
 0x3da   : > { %v2373_v31 = vadd.f32 %v4042_v52, %v5458_v46  ;;  %v2367_v23 = vpop.f32.mrb[21].mxu1 }
 0x3db   : > { %v2368_v19 = vadd.f32 %v5458_v46, %v2367_v23 }
 0x3dc   : > { %v2406_v10 = vmax.f32 %v2373_v31, 0.0 }
 0x3dd   : > { %v2405_v51 = vmax.f32 %v2368_v19, 0.0 }
 0x3de   : > { %v2416_v6 = vsel %vm5461_vm9, %v2406_v10, %v2373_v31 }
 0x3df   : > { %v2415_v59 = vsel %vm5461_vm9, %v2405_v51, %v2368_v19  ;;  %v2520_v24 = vrot.slane %v2416_v6, 4  ;;  %v2454_v37 = vrot.slane %v2416_v6, 1  ;;  %v2543_v47 = vrot.slane %v2416_v6, 5 }
 0x3e0   : > { %v2518_v2 = vrot.slane %v2415_v59, 5  ;;  %v2451_v16 = vrot.slane %v2415_v59, 2  ;;  %v2541_v14 = vrot.slane %v2415_v59, 6  ;;  %v2477_v4 = vrot.slane %v2415_v59, 3 }
 0x3e1   : > { %v2479_v5 = vrot.slane %v2416_v6, 2  ;;  %v2562_v25 = vrot.slane %v2415_v59, 7  ;;  %v2564_v28 = vrot.slane %v2416_v6, 6  ;;  %v2601_v60 = vrot.slane %v2415_v59, 1 }
 0x3e2   : > { %v2519_v8 = vsel %vm2452_vm13, %v2518_v2, %v2517_v45  ;;  %v2453_v12 = vsel %vm2452_vm13, %v2451_v16, %v2450_v36  ;;  %v2542_v42 = vsel %vm2452_vm13, %v2541_v14, %v2540_v29  ;;  %v2478_v26 = vsel %vm2452_vm13, %v2477_v4, %v2476_v44 }
 0x3e3   : > { %v2521_v7 = vsel %vm2455_vm14, %v2520_v24, %v2519_v8  ;;  %v2456_v9 = vsel %vm2455_vm14, %v2454_v37, %v2453_v12  ;;  %v2544_v33 = vsel %vm2455_vm14, %v2543_v47, %v2542_v42  ;;  %v2480_v34 = vsel %vm2455_vm14, %v2479_v5, %v2478_v26  ;;  %v3894_v47 = vld [vmem:[%s6340_s9 + $0x41] ss:$8 sm:$0x3]  ;;  %v3896_v5 = vld [vmem:[%s6340_s9 + $0x43] ss:$8 sm:$0x3]  ;;  %v2646_v8 = vpop.permute.xlu1 %2645  ;;  %v2648_v12 = vpop.permute.xlu0 %2647 }
 0x3e4   : > { %2525 = vrot.lane.b32.xlu1 %v2521_v7, %s4241_s13  ;;  %2460 = vrot.lane.b32.xlu0 %v2456_v9, %s4242_s14  ;;  %v2563_v35 = vsel %vm2452_vm13, %v2562_v25, %v2561_v32  ;;  %v2602_v18 = vsel %vm2452_vm13, %v2601_v60, %v2600_v11  ;;  %v2499_v20 = vrot.slane %v2415_v59, 4  ;;  %v2501_v22 = vrot.slane %v2416_v6, 3 }
 0x3e5   : > { %v2565_v62 = vsel %vm2455_vm14, %v2564_v28, %v2563_v35  ;;  %v2603_v57 = vsel %vm2455_vm14, %v2416_v6, %v2602_v18  ;;  %v2584_v30 = vsel %vm2452_vm13, %v2415_v59, %v2583_v50  ;;  %v2585_v53 = vrot.slane %v2416_v6, 7  ;;  %v3891_v59 = vld [vmem:[%s6340_s9 + $0x33] ss:$8 sm:$0x3] }
 0x3e6   : > { %v2500_v29 = vsel %vm2452_vm13, %v2499_v20, %v2498_v13  ;;  %v3314_v24 = vrot.slane %v5444_v61, %v5378_v39  ;;  %v3362_v37 = vrot.slane %v3891_v59, %v5362_v27  ;;  %v3366_v2 = vrot.slane %v3891_v59, %v5378_v39  ;;  %v3895_v61 = vld [vmem:[%s6340_s9 + $0x42] ss:$8 sm:$0x3]  ;;  %v3882_v59 = vld [vmem:[%s6340_s9 + $0x14] ss:$8 sm:$0x3] }
 0x3e7   : > { %v2502_v38 = vsel %vm2455_vm14, %v2501_v22, %v2500_v29  ;;  %v2586_v40 = vsel %vm2455_vm14, %v2585_v53, %v2584_v30  ;;  %v3483_v16 = vrot.slane %v3894_v47, %v5362_v27  ;;  %v3487_v14 = vrot.slane %v3894_v47, %v5378_v39  ;;  %v5584_v42 = vpop.permute.xlu1 %2683  ;;  %v5586_v26 = vpop.permute.xlu0 %2685  ;;  %v3887_v47 = vld [vmem:[%s6340_s9 + $0x24] ss:$8 sm:$0x3] }
 0x3e8   : > { %2548 = vrot.lane.b32.xlu1 %v2544_v33, %s4242_s14  ;;  %2483 = vrot.lane.b32.xlu0 %v2480_v34, %s4243_s23  ;;  %2509 = vst.msk [vmem:[#allocation5 + $0x8] sm:$0xfc] %vm2508_vm15, %v2502_v38  ;;  %2592 = vst.msk [vmem:[#allocation5 + $0x10] sm:$0xfc] %vm2508_vm15, %v2586_v40  ;;  %v3535_v4 = vrot.slane %v3895_v61, %v5362_v27  ;;  %v3539_v25 = vrot.slane %v3895_v61, %v5378_v39  ;;  %vm3014_vm13 = vcmask 1045504   ;;  %vm3239_vm14 = vcmask 1044480  }
 0x3e9   : > { %v3587_v28 = vrot.slane %v3896_v5, %v5362_v27  ;;  %v3591_v60 = vrot.slane %v3896_v5, %v5378_v39  ;;  %vm3464_vm15 = vcmask 1043456  }
 0x3eb   : > { %v2722_v7 = vpop.permute.xlu1 %2721  ;;  %v2724_v9 = vpop.permute.xlu0 %2723 }
 0x3ec   : > { %2569 = vrot.lane.b32.xlu1 %v2565_v62, %s4243_s23  ;;  %2607 = vrot.lane.b32.xlu0 %v2603_v57, %s4241_s13 }
 0x3ef   : > { %v5588_v33 = vpop.permute.xlu1 %2813  ;;  %v5590_v34 = vpop.permute.xlu0 %2815 }
 0x3f2   : > { %v4045_v15 = vpop.f32.mrb[22].mxu1 }
 0x3f3   : > { %v2383_v3 = vadd.f32 %v4045_v15, %v5458_v46  ;;  %v2377_v55 = vpop.f32.mrb[23].mxu1  ;;  %v5592_v35 = vpop.permute.xlu1 %2865 }
 0x3f4   : > { %v2378_v58 = vadd.f32 %v5458_v46, %v2377_v55  ;;  %v5594_v18 = vpop.permute.xlu0 %2867 }
 0x3f5   : > { %v2408_v54 = vmax.f32 %v2383_v3, 0.0  ;;  %v5680_v61 = vsel %vm2687_vm11, %v5592_v35, %v5594_v18 }
 0x3f6   : > { %v2407_v0 = vmax.f32 %v2378_v58, 0.0 }
 0x3f7   : > { %v2418_v45 = vsel %vm5461_vm9, %v2408_v54, %v2383_v3  ;;  %v5596_v20 = vpop.permute.xlu1 %2917 }
 0x3f8   : > { %v2417_v36 = vsel %vm5461_vm9, %v2407_v0, %v2378_v58  ;;  %v2523_v48 = vrot.slane %v2418_v45, 2  ;;  %v2457_v41 = vrot.slane %v2418_v45, 7  ;;  %v2546_v44 = vrot.slane %v2418_v45, 3  ;;  %v5598_v22 = vpop.permute.xlu0 %2919 }
 0x3f9   : > { %v2522_v32 = vrot.slane %v2417_v36, 3  ;;  %v2545_v1 = vrot.slane %v2417_v36, 4  ;;  %v2481_v11 = vrot.slane %v2417_v36, 1  ;;  %v2566_v56 = vrot.slane %v2417_v36, 5 }
 0x3fa   : > { %v2459_v43 = vsel %vm2458_vm1, %v2457_v41, %v2417_v36  ;;  %v2567_v46 = vrot.slane %v2418_v45, 4  ;;  %v2604_v17 = vrot.slane %v2417_v36, 7  ;;  %v2605_v49 = vrot.slane %v2418_v45, 6 }
 0x3fb   : > { %v2524_v63 = vsel %vm2458_vm1, %v2523_v48, %v2522_v32  ;;  %2462 = vrot.lane.b32.xlu0 %v2459_v43, %s4242_s14  ;;  %v2547_v13 = vsel %vm2458_vm1, %v2546_v44, %v2545_v1  ;;  %v2482_v21 = vsel %vm2458_vm1, %v2418_v45, %v2481_v11  ;;  %v2503_v50 = vrot.slane %v2417_v36, 2  ;;  %v5600_v62 = vpop.permute.xlu1 %3038 }
 0x3fc   : > { %2527 = vrot.lane.b32.xlu1 %v2524_v63, %s4241_s13  ;;  %v2568_v52 = vsel %vm2458_vm1, %v2567_v46, %v2566_v56  ;;  %v2606_v31 = vsel %vm2458_vm1, %v2605_v49, %v2604_v17  ;;  %v2504_v23 = vrot.slane %v2418_v45, 1  ;;  %v2587_v19 = vrot.slane %v2417_v36, 6  ;;  %v5602_v57 = vpop.permute.xlu0 %3040 }
 0x3fd   : > { %v2588_v10 = vrot.slane %v2418_v45, 5  ;;  %v2649_v46 = vsel %vm2256_vm5, %v2646_v8, %v2648_v12  ;;  %vm2665_vm9 = vcmask 785408  }
 0x3fe   : > { %v2505_v51 = vsel %vm2458_vm1, %v2504_v23, %v2503_v50 }
 0x3ff   : > { %2485 = vrot.lane.b32.xlu0 %v2482_v21, %s4243_s23  ;;  %2511 = vst.msk [vmem:[#allocation5 + $0x20] sm:$0x3] %vm2510_vm2, %v2505_v51  ;;  %v2589_v6 = vsel %vm2458_vm1, %v2588_v10, %v2587_v19  ;;  %v5604_v30 = vpop.permute.xlu1 %3090  ;;  %v2725_v21 = vsel %vm2665_vm9, %v2722_v7, %v2724_v9  ;;  %v3878_v19 = vld [vmem:[%s6340_s9 + $0x10] ss:$8 sm:$0x3]  ;;  %v2688_v51 = vsel %vm2687_vm11, %v5584_v42, %v5586_v26 }
 0x400   : > { %2550 = vrot.lane.b32.xlu1 %v2547_v13, %s4242_s14  ;;  %2593 = vst.msk [vmem:[#allocation5 + $0x28] sm:$0x3] %vm2510_vm2, %v2589_v6  ;;  %6396 = vst [vmem:[#allocation15_spill] sm:$0xff] %v5604_v30  ;;  %v5606_v53 = vpop.permute.xlu0 %3092  ;;  %v3883_v10 = vld [vmem:[%s6340_s9 + $0x20] ss:$8 sm:$0x3] }
 0x401   : > { %6397 = vst [vmem:[#allocation16_spill] sm:$0xff] %v5606_v53 }
 0x403   : > { %2609 = vrot.lane.b32.xlu0 %v2606_v31, %s4241_s13  ;;  %v5608_v29 = vpop.permute.xlu1 %3142 }
 0x404   : > { %2571 = vrot.lane.b32.xlu1 %v2568_v52, %s4243_s23  ;;  %6398 = vst [vmem:[#allocation17_spill] sm:$0xff] %v5608_v29  ;;  %v5610_v38 = vpop.permute.xlu0 %3144 }
 0x405   : > { %6399 = vst [vmem:[#allocation18_spill] sm:$0xff] %v5610_v38 }
 0x407   : > { %3317 = vrot.lane.b32.xlu0 %v3314_v24, %s4242_s14  ;;  %v5612_v40 = vpop.permute.xlu1 %3263  ;;  %v3888_v24 = vld [vmem:[%s6340_s9 + $0x30] ss:$8 sm:$0x3] }
 0x408   : > { %3367 = vrot.lane.b32.xlu1 %v3362_v37, %s4243_s23  ;;  %6400 = vst [vmem:[#allocation19_spill] sm:$0xff] %v5612_v40  ;;  %v5614_v15 = vpop.permute.xlu0 %3265 }
 0x409   : > { %6401 = vst [vmem:[#allocation20_spill] sm:$0xff] %v5614_v15 }
 0x40b   : > { %3369 = vrot.lane.b32.xlu0 %v3366_v2, %s4243_s23  ;;  %v5616_v3 = vpop.permute.xlu1 %3315  ;;  %v3893_v2 = vld [vmem:[%s6340_s9 + $0x40] ss:$8 sm:$0x3] }
 0x40c   : > { %3488 = vrot.lane.b32.xlu1 %v3483_v16, %s4241_s13  ;;  %6402 = vst [vmem:[#allocation21_spill] sm:$0xff] %v5616_v3  ;;  %v5675_v16 = vsel %vm2256_vm5, %v5588_v33, %v5590_v34 }
 0x40f   : > { %3490 = vrot.lane.b32.xlu0 %v3487_v14, %s4241_s13  ;;  %v5685_v14 = vsel %vm2665_vm9, %v5596_v20, %v5598_v22 }
 0x410   : > { %3540 = vrot.lane.b32.xlu1 %v3535_v4, %s4242_s14  ;;  %6406 = vst [vmem:[#allocation25_spill] sm:$0xff] %v5685_v14  ;;  %v5690_v4 = vsel %vm2256_vm5, %v5600_v62, %v5602_v57 }
 0x411   : > { %6407 = vst [vmem:[#allocation26_spill] sm:$0xff] %v5690_v4 }
 0x413   : > { %3542 = vrot.lane.b32.xlu0 %v3539_v25, %s4242_s14 }
 0x414   : > { %3592 = vrot.lane.b32.xlu1 %v3587_v28, %s4243_s23 }
 0x417   : > { %3594 = vrot.lane.b32.xlu0 %v3591_v60, %s4243_s23  ;;  %v5698_v60 = vrot.slane %v3878_v19, %v5362_v27 }
 0x419   : > { %6409 = vst [vmem:[#allocation28_spill] sm:$0xff] %v5698_v60 }
 0x456   : > { %v2461_v55 = vpop.permute.xlu0 %2460  ;;  %v2526_v58 = vpop.permute.xlu1 %2525 }
 0x457   : > { %2467 = vst.msk [vmem:[#allocation5] sm:$0xfc] %vm2466_vm3, %v2461_v55  ;;  %v5719_v55 = vrot.slane %v3883_v10, %v5378_v39 }
 0x458   : > { %2532 = vst.msk [vmem:[#allocation5 + $0x8] sm:$0xfc] %vm2531_vm4, %v2526_v58  ;;  %v5722_v58 = vrot.slane %v3887_v47, %v5362_v27 }
 0x45a   : > { %v2484_v54 = vpop.permute.xlu0 %2483  ;;  %v2549_v0 = vpop.permute.xlu1 %2548 }
 0x45b   : > { %2490 = vst.msk [vmem:[#allocation5] sm:$0xfc] %vm2489_vm6, %v2484_v54  ;;  %v3897_v54 = vld [vmem:[%s6340_s9 + $0x44] ss:$8 sm:$0x3] }
 0x45c   : > { %2554 = vst.msk [vmem:[#allocation5 + $0x8] sm:$0xfc] %vm2466_vm3, %v2549_v0 }
 0x45e   : > { %v2608_v45 = vpop.permute.xlu0 %2607  ;;  %v2570_v36 = vpop.permute.xlu1 %2569 }
 0x45f   : > { %2613 = vst.msk [vmem:[#allocation5 + $0x10] sm:$0xfc] %vm2531_vm4, %v2608_v45 }
 0x460   : > { %2575 = vst.msk [vmem:[#allocation5 + $0x8] sm:$0xfc] %vm2489_vm6, %v2570_v36 }
 0x462   : > { %v5623_v32 = vld [vmem:[#allocation5] sm:$0xff] }
 0x463   : > { %6404 = vst [vmem:[#allocation23_spill] sm:$0xff] %v5623_v32  ;;  %v2692_v11 = vmul.f32 %v5584_v42, %v5623_v32  ;;  %v2653_v49 = vmul.f32 %v2646_v8, %v5623_v32  ;;  %v2729_v52 = vmul.f32 %v2722_v7, %v5623_v32  ;;  %v5692_v5 = vld [vmem:[#allocation5] sm:$0xf8]  ;;  %v5701_v8 = vrot.slane %v3878_v19, %v5378_v39 }
 0x464   : > { %v2764_v25 = vld [vmem:[#allocation5] sm:$0xfe]  ;;  %v5707_v42 = vrot.slane %v3888_v24, %v5362_v27  ;;  %v5713_v7 = vrot.slane %v3882_v59, %v5362_v27  ;;  %v5730_v36 = vmul.f32 %v5612_v40, %v5692_v5 }
 0x465   : > { %6410 = vst [vmem:[#allocation29_spill] sm:$0xff] %v5701_v8  ;;  %v2821_v0 = vmul.f32 %v5588_v33, %v2764_v25  ;;  %v2989_v45 = vld [vmem:[#allocation5] sm:$0xfc] }
 0x466   : > { %v5618_v48 = vld [vmem:[#allocation5 + $0x10] sm:$0xff]  ;;  %6412 = vst [vmem:[#allocation31_spill] sm:$0xff] %v5707_v42 }
 0x467   : > { %6403 = vst [vmem:[#allocation22_spill] sm:$0xff] %v5618_v48  ;;  %v2655_v41 = vmul.f32 %v2648_v12, %v5618_v48  ;;  %v2694_v44 = vmul.f32 %v5586_v26, %v5618_v48  ;;  %v2731_v1 = vmul.f32 %v2724_v9, %v5618_v48  ;;  %v5630_v56 = vld [vmem:[#allocation5 + $0x8] sm:$0xff]  ;;  %v5704_v12 = vrot.slane %v3883_v10, %v5362_v27  ;;  %v3892_v26 = vld [vmem:[%s6340_s9 + $0x34] ss:$8 sm:$0x3] }
 0x468   : > { %6405 = vst [vmem:[#allocation24_spill] sm:$0xff] %v5630_v56  ;;  %v2654_v63 = vmul.f32 %v2649_v46, %v5630_v56  ;;  %v2730_v31 = vmul.f32 %v2725_v21, %v5630_v56  ;;  %v2693_v37 = vmul.f32 %v2688_v51, %v5630_v56  ;;  %v5716_v9 = vrot.slane %v3882_v59, %v5378_v39 }
 0x469   : > { %2663 = vrot.lane.b32.xlu1 %v2655_v41, %s4243_s23  ;;  %2702 = vrot.lane.b32.xlu0 %v2694_v44, %s4242_s14  ;;  %6411 = vst [vmem:[#allocation30_spill] sm:$0xff] %v5704_v12  ;;  %v5733_v41 = vrot.slane %v3887_v47, %v5378_v39  ;;  %v5736_v44 = vrot.slane %v3888_v24, %v5378_v39  ;;  %v2833_v19 = vrot.slane %v2821_v0, 1  ;;  %v2765_v0 = vld [vmem:[#allocation5 + $0x8] sm:$0xfe] }
 0x46a   : > { %v5746_v46 = vrot.slane %v3893_v2, %v5362_v27  ;;  %v2873_v21 = vmul.f32 %v5592_v35, %v2764_v25  ;;  %v5773_v10 = vmul.f32 %v5608_v29, %v2989_v45  ;;  %v5784_v47 = vmul.f32 %v5698_v60, %v2764_v25 }
 0x46b   : > { %6413 = vst [vmem:[#allocation32_spill] sm:$0xff] %v5736_v44  ;;  %v5797_v51 = vmul.f32 %v5704_v12, %v2989_v45  ;;  %v5820_v4 = vmul.f32 %v5675_v16, %v2765_v0  ;;  %v5828_v60 = vmul.f32 %v5680_v61, %v2765_v0  ;;  %v5844_v12 = vmul.f32 %v5685_v14, %v2765_v0 }
 0x46c   : > { %6414 = vst [vmem:[#allocation33_spill] sm:$0xff] %v5746_v46 }
 0x46d   : > { %v2463_v43 = vpop.permute.xlu0 %2462  ;;  %2739 = vrot.lane.b32.xlu1 %v2731_v1, %s4241_s13  ;;  %2698 = vrot.lane.b32.xlu0 %v2692_v11, %s4242_s14  ;;  %6416 = vst [vmem:[#allocation35_spill] sm:$0xff] %v5820_v4  ;;  %6417 = vst [vmem:[#allocation36_spill] sm:$0xff] %v5828_v60 }
 0x46e   : > { %2469 = vst.msk [vmem:[#allocation5 + $0x18] sm:$0x3] %vm2468_vm7, %v2463_v43  ;;  %v2528_v17 = vpop.permute.xlu1 %2527  ;;  %v5743_v43 = vrot.slane %v3892_v26, %v5362_v27  ;;  %6418 = vst [vmem:[#allocation37_spill] sm:$0xff] %v5844_v12 }
 0x46f   : > { %2534 = vst.msk [vmem:[#allocation5 + $0x20] sm:$0x3] %vm2533_vm8, %v2528_v17  ;;  %v2800_v17 = vld [vmem:[#allocation5 + $0x10] sm:$0xfe] }
 0x470   : > { %v5861_v12 = vmul.f32 %v5716_v9, %v2800_v17 }
 0x471   : > { %v2486_v13 = vpop.permute.xlu0 %2485  ;;  %2659 = vrot.lane.b32.xlu1 %v2653_v49, %s4243_s23  ;;  %2661 = vrot.lane.b32.xlu0 %v2654_v63, %s4243_s23  ;;  %v5749_v49 = vrot.slane %v3892_v26, %v5378_v39  ;;  %v5752_v63 = vrot.slane %v3893_v2, %v5378_v39  ;;  %v5787_v2 = vmul.f32 %v5594_v18, %v2800_v17 }
 0x472   : > { %2492 = vst.msk [vmem:[#allocation5 + $0x18] sm:$0x3] %vm2491_vm10, %v2486_v13  ;;  %v2551_v50 = vpop.permute.xlu1 %2550  ;;  %v5755_v13 = vrot.slane %v3897_v54, %v5362_v27  ;;  %v5790_v26 = vmul.f32 %v5598_v22, %v2800_v17 }
 0x473   : > { %2555 = vst.msk [vmem:[#allocation5 + $0x20] sm:$0x3] %vm2468_vm7, %v2551_v50  ;;  %6415 = vst [vmem:[#allocation34_spill] sm:$0xff] %v5752_v63  ;;  %v5762_v50 = vmul.f32 %v5596_v20, %v2764_v25  ;;  %v2891_v27 = vrot.slane %v5787_v2, 1  ;;  %v5838_v2 = vmul.f32 %v5701_v8, %v2765_v0  ;;  %v5852_v8 = vmul.f32 %v5713_v7, %v2765_v0 }
 0x475   : > { %v2610_v23 = vpop.permute.xlu0 %2609  ;;  %2735 = vrot.lane.b32.xlu1 %v2729_v52, %s4241_s13  ;;  %2737 = vrot.lane.b32.xlu0 %v2730_v31, %s4241_s13  ;;  %v5765_v52 = vmul.f32 %v5600_v62, %v2989_v45  ;;  %v5767_v31 = vld [vmem:[#allocation5 + $0x10] sm:$0xfc] }
 0x476   : > { %2614 = vst.msk [vmem:[#allocation5 + $0x28] sm:$0x3] %vm2533_vm8, %v2610_v23  ;;  %v2572_v6 = vpop.permute.xlu1 %2571  ;;  %v5770_v23 = vmul.f32 %v5604_v30, %v2989_v45  ;;  %v5803_v48 = vmul.f32 %v5606_v53, %v5767_v31 }
 0x477   : > { %2576 = vst.msk [vmem:[#allocation5 + $0x20] sm:$0x3] %vm2491_vm10, %v2572_v6  ;;  %v5780_v6 = vld [vmem:[#allocation5 + $0x10] sm:$0xf8] }
 0x478   : > { %v5815_v45 = vmul.f32 %v5614_v15, %v5780_v6 }
 0x479   : > { %2700 = vrot.lane.b32.xlu1 %v2693_v37, %s4242_s14  ;;  %v5695_v28 = vld [vmem:[#allocation5 + $0x18] sm:$0x1]  ;;  %v2823_v37 = vmul.f32 %v5590_v34, %v2800_v17  ;;  %v5878_v17 = vmul.f32 %v5733_v41, %v5767_v31  ;;  %v5892_v0 = vpop.permute.xlu0 %3317 }
 0x47a   : > { %6408 = vst [vmem:[#allocation27_spill] sm:$0xff] %v5695_v28  ;;  %v2824_v1 = vmul.f32 %v5588_v33, %v5695_v28  ;;  %v2876_v11 = vmul.f32 %v5592_v35, %v5695_v28  ;;  %v5758_v33 = vrot.slane %v3897_v54, %v5378_v39  ;;  %v5778_v35 = vmul.f32 %v5616_v3, %v5692_v5 }
 0x47b   : > { %v5794_v54 = vmul.f32 %v5602_v57, %v5767_v31  ;;  %v5811_v39 = vmul.f32 %v5610_v38, %v5767_v31  ;;  %v2839_v25 = vrot.slane %v2823_v37, 1  ;;  %6423 = vst [vmem:[#allocation42_spill] sm:$0xff] %v5892_v0  ;;  %v5896_v31 = vld [vmem:[#allocation5 + $0x8] sm:$0xf0] }
 0x47c   : > { %v2834_v59 = vrot.slane %v2824_v1, 1  ;;  %v2886_v24 = vrot.slane %v2876_v11, 1  ;;  %v2885_v1 = vrot.slane %v2873_v21, 1  ;;  %v2937_v11 = vrot.slane %v5762_v50, 1  ;;  %6424 = vst [vmem:[#allocation43_spill] sm:$0xff] %v5896_v31 }
 0x47d   : > { %v5805_v32 = vld [vmem:[#allocation5 + $0x28] sm:$0x1] }
 0x47e   : > { %v2835_v21 = vsel %vm2789_vm12, %v2833_v19, %v2834_v59  ;;  %v2887_v50 = vsel %vm2789_vm12, %v2885_v1, %v2886_v24  ;;  %v2826_v19 = vmul.f32 %v5590_v34, %v5805_v32  ;;  %v2928_v59 = vmul.f32 %v5596_v20, %v5695_v28  ;;  %v5834_v24 = vld [vmem:[#allocation5 + $0x18] sm:$0x3]  ;;  %v5846_v34 = vld [vmem:[#allocation5 + $0x8] sm:$0xfc]  ;;  %v5864_v14 = vld [vmem:[#allocation5 + $0x28] sm:$0x3] }
 0x47f   : > { %2842 = vrot.lane.b32.xlu0 %v2835_v21, %s4243_s23  ;;  %2894 = vrot.lane.b32.xlu1 %v2887_v50, %s4242_s14  ;;  %6419 = vst [vmem:[#allocation38_spill] sm:$0xff] %v5846_v34  ;;  %v2878_v56 = vmul.f32 %v5594_v18, %v5805_v32  ;;  %v5854_v28 = vld [vmem:[#allocation5 + $0x8] sm:$0xf8]  ;;  %v3049_v21 = vmul.f32 %v5600_v62, %v5834_v24  ;;  %v5894_v1 = vld [vmem:[#allocation5] sm:$0xf0] }
 0x480   : > { %v2840_v20 = vrot.slane %v2826_v19, 1  ;;  %6420 = vst [vmem:[#allocation39_spill] sm:$0xff] %v5854_v28  ;;  %v2938_v18 = vrot.slane %v2928_v59, 1  ;;  %v5869_v37 = vmul.f32 %v5719_v55, %v5846_v34  ;;  %v5874_v50 = vmul.f32 %v5722_v58, %v5846_v34 }
 0x481   : > { %v2892_v62 = vrot.slane %v2878_v56, 1  ;;  %v2930_v59 = vmul.f32 %v5598_v22, %v5805_v32  ;;  %v5890_v56 = vmul.f32 %v5736_v44, %v5854_v28  ;;  %v3059_v60 = vrot.slane %v3049_v21, 2  ;;  %v5934_v21 = vld [vmem:[#allocation5 + $0x10] sm:$0xf0] }
 0x482   : > { %v2841_v19 = vsel %vm2789_vm12, %v2839_v25, %v2840_v20  ;;  %v5882_v25 = vmul.f32 %v5707_v42, %v5692_v5  ;;  %v3051_v22 = vmul.f32 %v5602_v57, %v5864_v14  ;;  %v5903_v20 = vmul.f32 %v5743_v43, %v5854_v28  ;;  %v5915_v28 = vld [vmem:[#allocation5 + $0x28] sm:$0x7]  ;;  %6426 = vst [vmem:[#allocation45_spill] sm:$0xff] %v5934_v21 }
 0x483   : > { %2846 = vrot.lane.b32.xlu0 %v2841_v19, %s4243_s23  ;;  %6422 = vst [vmem:[#allocation41_spill] sm:$0xff] %v5890_v56  ;;  %v2893_v34 = vsel %vm2789_vm12, %v2891_v27, %v2892_v62  ;;  %v2939_v19 = vsel %vm2789_vm12, %v2937_v11, %v2938_v18  ;;  %v2944_v4 = vrot.slane %v2930_v59, 1  ;;  %v3101_v44 = vmul.f32 %v5604_v30, %v5834_v24  ;;  %v5932_v62 = vpop.permute.xlu1 %3367 }
 0x484   : > { %6421 = vst [vmem:[#allocation40_spill] sm:$0xff] %v5882_v25  ;;  %2898 = vrot.lane.b32.xlu1 %v2893_v34, %s4242_s14  ;;  %v5917_v34 = vld [vmem:[#allocation5 + $0x18] sm:$0x7]  ;;  %v5922_v18 = vmul.f32 %v5749_v49, %v5780_v6  ;;  %v5926_v59 = vmul.f32 %v5746_v46, %v5894_v1  ;;  %6425 = vst [vmem:[#allocation44_spill] sm:$0xff] %v5932_v62  ;;  %v6427_v57 = vrot.slane %v5765_v52, 2  ;;  %v3065_v27 = vrot.slane %v3051_v22, 2  ;;  %v5954_v22 = vpop.permute.xlu0 %3369 }
 0x485   : > { %v3153_v42 = vmul.f32 %v5608_v29, %v5834_v24  ;;  %v6428_v56 = vrot.slane %v5790_v26, 1  ;;  %v3103_v46 = vmul.f32 %v5606_v53, %v5864_v14  ;;  %v5950_v52 = vmul.f32 %v5755_v13, %v5896_v31  ;;  %v2767_v29 = vld [vmem:[#allocation5 + $0x20] sm:$0x1] }
 0x486   : > { %v3060_v11 = vsel %vm3014_vm13, %v6427_v57, %v3059_v60  ;;  %v3328_v60 = vmul.f32 %v5892_v0, %v5915_v28  ;;  %v3155_v26 = vmul.f32 %v5610_v38, %v5864_v14  ;;  %v3378_v57 = vmul.f32 %v5932_v62, %v5917_v34 }
 0x487   : > { %2946 = vrot.lane.b32.xlu0 %v2939_v19, %s4241_s13  ;;  %v5930_v19 = vmul.f32 %v5752_v63, %v5896_v31  ;;  %v2945_v25 = vsel %vm2789_vm12, %v6428_v56, %v2944_v4  ;;  %v3111_v63 = vrot.slane %v3101_v44, 2  ;;  %v3274_v4 = vmul.f32 %v5612_v40, %v5917_v34  ;;  %v5988_v53 = vpop.permute.xlu1 %3488 }
 0x488   : > { %3067 = vrot.lane.b32.xlu1 %v3060_v11, %s4243_s23  ;;  %v3326_v44 = vmul.f32 %v5616_v3, %v5917_v34  ;;  %v3375_v56 = vmul.f32 %v5932_v62, %v5692_v5  ;;  %v3276_v11 = vmul.f32 %v5614_v15, %v5915_v28  ;;  %v3325_v30 = vmul.f32 %v5892_v0, %v5780_v6 }
 0x489   : > { %v6430_v31 = vrot.slane %v5794_v54, 2  ;;  %v3163_v40 = vrot.slane %v3153_v42, 2  ;;  %v5981_v62 = vmul.f32 %v5954_v22, %v5780_v6  ;;  %v6431_v15 = vrot.slane %v5770_v23, 2 }
 0x48a   : > { %v3117_v38 = vrot.slane %v3103_v46, 2  ;;  %v3465_v0 = vrot.slane %v5926_v59, 4  ;;  %v3342_v54 = vrot.slane %v3328_v60, 3  ;;  %v3169_v42 = vrot.slane %v3155_v26, 2 }
 0x48b   : > { %2950 = vrot.lane.b32.xlu0 %v2945_v25, %s4241_s13  ;;  %v5971_v25 = vmul.f32 %v5758_v33, %v5934_v21  ;;  %v3066_v3 = vsel %vm3014_vm13, %v6430_v31, %v3065_v27  ;;  %v3112_v21 = vsel %vm3014_vm13, %v6431_v15, %v3111_v63  ;;  %v3284_v31 = vrot.slane %v3274_v4, 3 }
 0x48c   : > { %3071 = vrot.lane.b32.xlu1 %v3066_v3, %s4243_s23  ;;  %v3336_v27 = vrot.slane %v3326_v44, 3  ;;  %v3387_v5 = vrot.slane %v3375_v56, 3  ;;  %v3388_v6 = vrot.slane %v3378_v57, 3  ;;  %v5992_v3 = vmul.f32 %v5675_v16, %v2767_v29 }
 0x48d   : > { %6429 = vst [vmem:[#allocation46_spill] sm:$0xff] %v5971_v25  ;;  %v3290_v25 = vrot.slane %v3276_v11, 3  ;;  %v3341_v23 = vrot.slane %v3325_v30, 3  ;;  %v5996_v15 = vmul.f32 %v5954_v22, %v5915_v28  ;;  %v6432_v46 = vrot.slane %v5773_v10, 2 }
 0x48e   : > { %v3393_v60 = vrot.slane %v5981_v62, 3  ;;  %v6005_v26 = vmul.f32 %v5988_v53, %v5894_v1  ;;  %v6433_v30 = vrot.slane %v5803_v48, 2  ;;  %v6012_v4 = vmul.f32 %v5680_v61, %v2767_v29 }
 0x48f   : > { %3119 = vrot.lane.b32.xlu0 %v3112_v21, %s4242_s14  ;;  %v3164_v63 = vsel %vm3014_vm13, %v6432_v46, %v3163_v40  ;;  %v3468_v21 = vrot.slane %v5930_v19, 4  ;;  %v6434_v40 = vrot.slane %v5811_v39, 2  ;;  %v6435_v44 = vrot.slane %v5730_v36, 3 }
 0x490   : > { %3171 = vrot.lane.b32.xlu1 %v3164_v63, %s4241_s13  ;;  %v3118_v16 = vsel %vm3014_vm13, %v6433_v30, %v3117_v38  ;;  %v6436_v57 = vrot.slane %v5778_v35, 3  ;;  %v3343_v48 = vsel %vm3239_vm14, %v3341_v23, %v3342_v54  ;;  %v6025_v38 = vld [vmem:[#allocation5 + $0x20] sm:$0x3]  ;;  %v6437_v61 = vrot.slane %v5815_v45, 3  ;;  %v6440_v35 = vld [vmem:[#allocation28_spill] sm:$0xff] }
 0x491   : > { %v3170_v10 = vsel %vm3014_vm13, %v6434_v40, %v3169_v42  ;;  %v3285_v56 = vsel %vm3239_vm14, %v6435_v44, %v3284_v31  ;;  %v3389_v39 = vsel %vm3239_vm14, %v3387_v5, %v3388_v6  ;;  %v2837_v42 = vrot.slane %v5992_v3, 1  ;;  %v6438_v63 = vld [vmem:[#allocation25_spill] sm:$0xff]  ;;  %v6439_v31 = vld [vmem:[#allocation27_spill] sm:$0xff]  ;;  %v6442_v5 = vld [vmem:[#allocation30_spill] sm:$0xff] }
 0x492   : > { %v3337_v11 = vsel %vm3239_vm14, %v6436_v57, %v3336_v27  ;;  %v3291_v46 = vsel %vm3239_vm14, %v6437_v61, %v3290_v25  ;;  %v6033_v36 = vmul.f32 %v6438_v63, %v2767_v29  ;;  %v2783_v30 = vmul.f32 %v6440_v35, %v6439_v31  ;;  %v6441_v27 = vld [vmem:[#allocation29_spill] sm:$0xff] }
 0x493   : > { %3123 = vrot.lane.b32.xlu0 %v3118_v16, %s4242_s14  ;;  %v2784_v16 = vmul.f32 %v6441_v27, %v2767_v29  ;;  %v2973_v54 = vmul.f32 %v5713_v7, %v2767_v29  ;;  %v2974_v45 = vmul.f32 %v5716_v9, %v5805_v32  ;;  %v2889_v25 = vrot.slane %v6012_v4, 1  ;;  %v6050_v32 = vld [vmem:[#allocation5 + $0x20] sm:$0x7]  ;;  %v6054_v61 = vld [vmem:[#allocation5 + $0x18] sm:$0xf] }
 0x494   : > { %3175 = vrot.lane.b32.xlu1 %v3170_v10, %s4241_s13  ;;  %v3008_v6 = vmul.f32 %v6442_v5, %v5834_v24  ;;  %v3009_v23 = vmul.f32 %v5719_v55, %v6025_v38  ;;  %v3198_v40 = vmul.f32 %v5722_v58, %v6025_v38  ;;  %v2791_v44 = vrot.slane %v2783_v30, 1  ;;  %v6056_v55 = vld [vmem:[#allocation5 + $0x20] sm:$0xf] }
 0x495   : > { %v2794_v29 = vrot.slane %v2784_v16, 1  ;;  %v2980_v7 = vrot.slane %v2973_v54, 1  ;;  %v2983_v57 = vrot.slane %v2974_v45, 1  ;;  %v3199_v4 = vmul.f32 %v5733_v41, %v5864_v14  ;;  %v6467_v3 = vld [vmem:[#allocation37_spill] sm:$0xff] }
 0x496   : > { %v3016_v9 = vrot.slane %v3008_v6, 2  ;;  %v3019_v10 = vrot.slane %v3009_v23, 2  ;;  %v3205_v24 = vrot.slane %v3198_v40, 2  ;;  %v6443_v58 = vrot.slane %v5784_v47, 1  ;;  %v6453_v40 = vld [vmem:[#allocation33_spill] sm:$0xff] }
 0x497   : > { %3292 = vrot.lane.b32.xlu0 %v3285_v56, %s4243_s23  ;;  %v6444_v63 = vrot.slane %v5838_v2, 1  ;;  %v6445_v35 = vrot.slane %v5852_v8, 1  ;;  %v6446_v14 = vrot.slane %v5861_v12, 1  ;;  %v6447_v47 = vrot.slane %v5797_v51, 2  ;;  %v6451_v51 = vld [vmem:[#allocation32_spill] sm:$0xff] }
 0x498   : > { %v6061_v56 = vsel %vm2789_vm12, %v6443_v58, %v2791_v44  ;;  %3344 = vrot.lane.b32.xlu1 %v3337_v11, %s4242_s14  ;;  %v6448_v2 = vrot.slane %v5869_v37, 2  ;;  %v6449_v8 = vrot.slane %v5874_v50, 2  ;;  %v3208_v12 = vrot.slane %v3199_v4, 2  ;;  %v6450_v11 = vld [vmem:[#allocation31_spill] sm:$0xff]  ;;  %v6454_v44 = vld [vmem:[#allocation34_spill] sm:$0xff] }
 0x499   : > { %v6066_v31 = vsel %vm2789_vm12, %v6444_v63, %v2794_v29  ;;  %v6071_v30 = vsel %vm2789_vm12, %v6445_v35, %v2980_v7  ;;  %v6076_v41 = vsel %vm2789_vm12, %v6446_v14, %v2983_v57  ;;  %v6082_v27 = vsel %vm3014_vm13, %v6447_v47, %v3016_v9  ;;  %v6114_v7 = vld [vmem:[#allocation5 + $0x28] sm:$0xf] }
 0x49a   : > { %v6087_v16 = vsel %vm3014_vm13, %v6448_v2, %v3019_v10  ;;  %v6092_v54 = vsel %vm3014_vm13, %v6449_v8, %v3205_v24  ;;  %v3233_v45 = vmul.f32 %v6450_v11, %v5917_v34  ;;  %v3234_v5 = vmul.f32 %v6451_v51, %v6050_v32  ;;  %v6455_v24 = vld [vmem:[#allocation40_spill] sm:$0xff] }
 0x49b   : > { %3296 = vrot.lane.b32.xlu0 %v3291_v46, %s4243_s23  ;;  %v3423_v37 = vmul.f32 %v5743_v43, %v6050_v32  ;;  %v3424_v6 = vmul.f32 %v5749_v49, %v5915_v28  ;;  %v6452_v50 = vrot.slane %v5878_v17, 2  ;;  %v3458_v46 = vmul.f32 %v6453_v40, %v6054_v61 }
 0x49c   : > { %v3459_v34 = vmul.f32 %v6454_v44, %v6056_v55  ;;  %v3648_v29 = vmul.f32 %v5755_v13, %v6056_v55  ;;  %v3241_v43 = vrot.slane %v3233_v45, 3  ;;  %v3244_v57 = vrot.slane %v3234_v5, 3  ;;  %3348 = vrot.lane.b32.xlu1 %v3343_v48, %s4242_s14  ;;  %v6457_v13 = vld [vmem:[#allocation41_spill] sm:$0xff]  ;;  %v6463_v45 = vld [vmem:[#allocation36_spill] sm:$0xff]  ;;  %v6470_v44 = vld [vmem:[#allocation18_spill] sm:$0xff] }
 0x49d   : > { %v6106_v23 = vsel %vm3014_vm13, %v6452_v50, %v3208_v12  ;;  %v3430_v9 = vrot.slane %v3423_v37, 3  ;;  %v3433_v28 = vrot.slane %v3424_v6, 3  ;;  %v3466_v49 = vrot.slane %v3458_v46, 4  ;;  %v6466_v37 = vld [vmem:[#allocation46_spill] sm:$0xff]  ;;  %v6468_v46 = vld [vmem:[#allocation16_spill] sm:$0xff] }
 0x49e   : > { %v3469_v17 = vrot.slane %v3459_v34, 4  ;;  %v3654_v10 = vrot.slane %v5950_v52, 4  ;;  %v3655_v4 = vrot.slane %v3648_v29, 4  ;;  %v6456_v58 = vrot.slane %v6455_v24, 3  ;;  %v6471_v34 = vld [vmem:[#allocation17_spill] sm:$0xff] }
 0x49f   : > { %3396 = vrot.lane.b32.xlu0 %v3389_v39, %s4241_s13  ;;  %v6458_v35 = vrot.slane %v6457_v13, 3  ;;  %v6459_v47 = vrot.slane %v5903_v20, 3  ;;  %v6460_v52 = vrot.slane %v5922_v18, 3  ;;  %v6142_v39 = vsel %vm3464_vm15, %v3465_v0, %v3466_v49  ;;  %v6461_v0 = vld [vmem:[#allocation35_spill] sm:$0xff]  ;;  %v3541_v13 = vpop.permute.xlu1 %3540 }
 0x4a0   : > { %v6122_v63 = vsel %vm3239_vm14, %v6456_v58, %v3241_v43  ;;  %v6147_v8 = vsel %vm3464_vm15, %v3468_v21, %v3469_v17  ;;  %v6150_v20 = vsel %vm3464_vm15, %v3654_v10, %v3655_v4  ;;  %v3649_v12 = vmul.f32 %v5758_v33, %v6114_v7  ;;  %v6465_v33 = vld [vmem:[#allocation26_spill] sm:$0xff]  ;;  %v3491_v10 = vpop.permute.xlu0 %3490 }
 0x4a1   : > { %v6127_v14 = vsel %vm3239_vm14, %v6458_v35, %v3244_v57  ;;  %v6132_v48 = vsel %vm3239_vm14, %v6459_v47, %v3430_v9  ;;  %v6137_v2 = vsel %vm3239_vm14, %v6460_v52, %v3433_v28  ;;  %v3394_v18 = vrot.slane %v5996_v15, 3  ;;  %v6472_v43 = vld [vmem:[#allocation38_spill] sm:$0xff]  ;;  %v6473_v52 = vld [vmem:[#allocation45_spill] sm:$0xff] }
 0x4a2   : > { %v3499_v11 = vmul.f32 %v5988_v53, %v6054_v61  ;;  %v6462_v59 = vrot.slane %v6461_v0, 1  ;;  %v2941_v21 = vrot.slane %v6033_v36, 1  ;;  %v6464_v51 = vrot.slane %v6463_v45, 1  ;;  %v6475_v45 = vld [vmem:[#allocation19_spill] sm:$0xff] }
 0x4a3   : > { %v3050_v15 = vmul.f32 %v6465_v33, %v6025_v38  ;;  %v3657_v6 = vrot.slane %v6466_v37, 4  ;;  %v3658_v50 = vrot.slane %v3649_v12, 4  ;;  %v2940_v40 = vrot.slane %v6467_v3, 1  ;;  %v6478_v37 = vld [vmem:[#allocation44_spill] sm:$0xff] }
 0x4a4   : > { %v2838_v19 = vsel %vm2789_vm12, %v6462_v59, %v2837_v42  ;;  %v2890_v5 = vsel %vm2789_vm12, %v6464_v51, %v2889_v25  ;;  %v6469_v42 = vld [vmem:[#allocation15_spill] sm:$0xff]  ;;  %v3146_v29 = vsel %vm2665_vm9, %v6471_v34, %v6470_v44  ;;  %v3047_v25 = vmul.f32 %v6465_v33, %v6472_v43  ;;  %v6477_v33 = vld [vmem:[#allocation21_spill] sm:$0xff] }
 0x4a5   : > { %2844 = vrot.lane.b32.xlu1 %v2838_v19, %s4243_s23  ;;  %2896 = vrot.lane.b32.xlu0 %v2890_v5, %s4242_s14  ;;  %v3094_v36 = vsel %vm2687_vm11, %v6469_v42, %v6468_v46  ;;  %v6181_v57 = vsel %vm3464_vm15, %v3657_v6, %v3658_v50  ;;  %v3508_v9 = vrot.slane %v6005_v26, 4  ;;  %v3509_v28 = vrot.slane %v3499_v11, 4  ;;  %v6476_v5 = vld [vmem:[#allocation42_spill] sm:$0xff] }
 0x4a6   : > { %v2942_v49 = vsel %vm2789_vm12, %v2940_v40, %v2941_v21  ;;  %v3102_v17 = vmul.f32 %v3094_v36, %v6025_v38  ;;  %v3395_v4 = vsel %vm3239_vm14, %v3393_v60, %v3394_v18  ;;  %v3062_v24 = vrot.slane %v3050_v15, 2  ;;  %v6474_v21 = vld [vmem:[#allocation20_spill] sm:$0xff] }
 0x4a7   : > { %v3154_v58 = vmul.f32 %v3146_v29, %v6025_v38  ;;  %v3099_v26 = vmul.f32 %v3094_v36, %v6472_v43  ;;  %v3061_v35 = vrot.slane %v3047_v25, 2  ;;  %v3151_v47 = vmul.f32 %v3146_v29, %v6472_v43  ;;  %v3543_v29 = vpop.permute.xlu0 %3542  ;;  %v6479_v25 = vld [vmem:[#allocation39_spill] sm:$0xff] }
 0x4a8   : > { %v3498_v12 = vmul.f32 %v3491_v10, %v6473_v52  ;;  %v3501_v11 = vmul.f32 %v3491_v10, %v6114_v7  ;;  %v3510_v0 = vsel %vm3464_vm15, %v3508_v9, %v3509_v28  ;;  %v3114_v62 = vrot.slane %v3102_v17, 2 }
 0x4a9   : > { %2948 = vrot.lane.b32.xlu1 %v2942_v49, %s4241_s13  ;;  %3400 = vrot.lane.b32.xlu0 %v3395_v4, %s4241_s13  ;;  %v3548_v60 = vmul.f32 %v3541_v13, %v5894_v1  ;;  %v3551_v18 = vmul.f32 %v3541_v13, %v6054_v61  ;;  %v3063_v38 = vsel %vm3014_vm13, %v3061_v35, %v3062_v24  ;;  %v3166_v59 = vrot.slane %v3154_v58, 2 }
 0x4aa   : > { %v3113_v19 = vrot.slane %v3099_v26, 2  ;;  %v3267_v51 = vsel %vm2256_vm5, %v6475_v45, %v6474_v21  ;;  %v3319_v15 = vsel %vm2687_vm11, %v6477_v33, %v6476_v5  ;;  %v3371_v6 = vsel %vm2665_vm9, %v6478_v37, %v5954_v22 }
 0x4ab   : > { %v3165_v50 = vrot.slane %v3151_v47, 2  ;;  %v3514_v3 = vrot.slane %v3498_v12, 4  ;;  %v3515_v40 = vrot.slane %v3501_v11, 4  ;;  %v3275_v42 = vmul.f32 %v3267_v51, %v6050_v32  ;;  %v3593_v47 = vpop.permute.xlu1 %3592 }
 0x4ac   : > { %v3115_v46 = vsel %vm3014_vm13, %v3113_v19, %v3114_v62  ;;  %v3327_v36 = vmul.f32 %v3319_v15, %v6050_v32  ;;  %v3560_v44 = vrot.slane %v3548_v60, 4  ;;  %v3561_v34 = vrot.slane %v3551_v18, 4  ;;  %v3595_v60 = vpop.permute.xlu0 %3594 }
 0x4ad   : > { %3517 = vrot.lane.b32.xlu1 %v3510_v0, %s4243_s23  ;;  %3069 = vrot.lane.b32.xlu0 %v3063_v38, %s4243_s23  ;;  %v3167_v43 = vsel %vm3014_vm13, %v3165_v50, %v3166_v59  ;;  %v3272_v22 = vmul.f32 %v3267_v51, %v6479_v25  ;;  %v3324_v9 = vmul.f32 %v3319_v15, %v6479_v25  ;;  %v3287_v24 = vrot.slane %v3275_v42, 3 }
 0x4ae   : > { %v3376_v28 = vmul.f32 %v3371_v6, %v6479_v25  ;;  %v3379_v49 = vmul.f32 %v3371_v6, %v6050_v32  ;;  %v3492_v17 = vsel %vm2256_vm5, %v5988_v53, %v3491_v10  ;;  %v3516_v4 = vsel %vm3464_vm15, %v3514_v3, %v3515_v40  ;;  %v6480_v53 = vld [vmem:[#allocation43_spill] sm:$0xff] }
 0x4af   : > { %v3339_v58 = vrot.slane %v3327_v36, 3  ;;  %v3550_v26 = vmul.f32 %v3543_v29, %v6473_v52  ;;  %v3553_v35 = vmul.f32 %v3543_v29, %v6114_v7  ;;  %v3562_v12 = vsel %vm3464_vm15, %v3560_v44, %v3561_v34 }
 0x4b0   : > { %v3286_v11 = vrot.slane %v3272_v22, 3  ;;  %v3338_v32 = vrot.slane %v3324_v9, 3  ;;  %v3390_v0 = vrot.slane %v3376_v28, 3  ;;  %v3391_v62 = vrot.slane %v3379_v49, 3 }
 0x4b1   : > { %3121 = vrot.lane.b32.xlu1 %v3115_v46, %s4242_s14  ;;  %3173 = vrot.lane.b32.xlu0 %v3167_v43, %s4241_s13  ;;  %v3497_v10 = vmul.f32 %v3492_v17, %v6480_v53  ;;  %v3544_v18 = vsel %vm2687_vm11, %v3541_v13, %v3543_v29  ;;  %v3600_v38 = vmul.f32 %v3593_v47, %v5894_v1  ;;  %v3566_v45 = vrot.slane %v3550_v26, 4 }
 0x4b2   : > { %v3603_v59 = vmul.f32 %v3593_v47, %v6054_v61  ;;  %v3288_v19 = vsel %vm3239_vm14, %v3286_v11, %v3287_v24  ;;  %v3500_v21 = vmul.f32 %v3492_v17, %v6056_v55  ;;  %v3567_v51 = vrot.slane %v3553_v35, 4  ;;  %v6481_v35 = vld [vmem:[#allocation14_spill] sm:$0xff]  ;;  %v6482_v11 = vld [vmem:[#allocation13_spill] sm:$0xff] }
 0x4b3   : > { %v3340_v5 = vsel %vm3239_vm14, %v3338_v32, %v3339_v58  ;;  %v3596_v33 = vsel %vm2665_vm9, %v3593_v47, %v3595_v60  ;;  %v3511_v15 = vrot.slane %v3497_v10, 4  ;;  %v3549_v13 = vmul.f32 %v3544_v18, %v6480_v53  ;;  %v2617_v58 = vld [vmem:[%s6340_s9] ss:$8 sm:$0x3] }
 0x4b4   : > { %v3552_v1 = vmul.f32 %v3544_v18, %v6056_v55  ;;  %v3612_v61 = vrot.slane %v3600_v38, 4  ;;  %v3613_v37 = vrot.slane %v3603_v59, 4  ;;  %v3392_v6 = vsel %vm3239_vm14, %v3390_v0, %v3391_v62  ;;  %v3877_v10 = vld [vmem:[%s6340_s9 + $0x4] ss:$8 sm:$0x3] }
 0x4b5   : > { %3521 = vrot.lane.b32.xlu1 %v3516_v4, %s4243_s23  ;;  %3569 = vrot.lane.b32.xlu0 %v3562_v12, %s4242_s14  ;;  %v3512_v50 = vrot.slane %v3500_v21, 4  ;;  %v3601_v3 = vmul.f32 %v3596_v33, %v6480_v53  ;;  %v3604_v40 = vmul.f32 %v3596_v33, %v6056_v55  ;;  %v3568_v46 = vsel %vm3464_vm15, %v3566_v45, %v3567_v51  ;;  %v6484_v38 = vld [vmem:[#allocation23_spill] sm:$0xff] }
 0x4b6   : > { %v3563_v42 = vrot.slane %v3549_v13, 4  ;;  %v3564_v36 = vrot.slane %v3552_v1, 4  ;;  %v3602_v44 = vmul.f32 %v3595_v60, %v6473_v52  ;;  %v3605_v34 = vmul.f32 %v3595_v60, %v6114_v7  ;;  %v6483_v60 = vld [vmem:[#allocation24_spill] sm:$0xff] }
 0x4b7   : > { %v3614_v29 = vsel %vm3464_vm15, %v3612_v61, %v3613_v37  ;;  %v3615_v43 = vrot.slane %v3601_v3, 4  ;;  %v3616_v25 = vrot.slane %v3604_v40, 4  ;;  %v3513_v22 = vsel %vm3464_vm15, %v3511_v15, %v3512_v50 }
 0x4b8   : > { %v3618_v55 = vrot.slane %v3602_v44, 4  ;;  %v3619_v9 = vrot.slane %v3605_v34, 4  ;;  %v3565_v28 = vsel %vm3464_vm15, %v3563_v42, %v3564_v36  ;;  %v2626_v47 = vrot.slane %v2617_v58, %v6481_v35 }
 0x4b9   : > { %3294 = vrot.lane.b32.xlu1 %v3288_v19, %s4243_s23  ;;  %3346 = vrot.lane.b32.xlu0 %v3340_v5, %s4242_s14  ;;  %v3617_v52 = vsel %vm3464_vm15, %v3615_v43, %v3616_v25  ;;  %v2622_v32 = vrot.slane %v2617_v58, %v6482_v11  ;;  %v2753_v5 = vrot.slane %v3877_v10, %v6482_v11 }
 0x4ba   : > { %v3620_v7 = vsel %vm3464_vm15, %v3618_v55, %v3619_v9  ;;  %v2630_v18 = vmul.f32 %v2626_v47, %v6483_v60  ;;  %v2757_v33 = vrot.slane %v3877_v10, %v6481_v35 }
 0x4bb   : > { %v2629_v59 = vmul.f32 %v2622_v32, %v6484_v38  ;;  %v2760_v40 = vmul.f32 %v2753_v5, %v6483_v60 }
 0x4bd   : > { %3398 = vrot.lane.b32.xlu1 %v3392_v6, %s4241_s13  ;;  %3573 = vrot.lane.b32.xlu0 %v3568_v46, %s4242_s14  ;;  %v6485_v46 = vld [vmem:[#allocation22_spill] sm:$0xff] }
 0x4be   : > { %v2761_v42 = vmul.f32 %v2757_v33, %v6485_v46 }
 0x4c1   : > { %3621 = vrot.lane.b32.xlu1 %v3614_v29, %s4241_s13  ;;  %3519 = vrot.lane.b32.xlu0 %v3513_v22, %s4243_s23 }
 0x4c5   : > { %3571 = vrot.lane.b32.xlu1 %v3565_v28, %s4242_s14  ;;  %3623 = vrot.lane.b32.xlu0 %v3617_v52, %s4241_s13 }
 0x4c9   : > { %3625 = vrot.lane.b32.xlu1 %v3620_v7, %s4241_s13 }
 0x4db   : > { %v2703_v49 = vpop.permute.xlu0 %2702  ;;  %v2664_v17 = vpop.permute.xlu1 %2663 }
 0x4df   : > { %v2699_v4 = vpop.permute.xlu0 %2698  ;;  %v2740_v24 = vpop.permute.xlu1 %2739 }
 0x4e3   : > { %v2660_v26 = vpop.permute.xlu1 %2659  ;;  %v2662_v12 = vpop.permute.xlu0 %2661 }
 0x4e4   : > { %v2667_v62 = vsel %vm2665_vm9, %v2662_v12, %v2664_v17  ;;  %v2666_v53 = vsel %vm2665_vm9, %v2660_v26, %v2662_v12 }
 0x4e5   : > { %v2671_v19 = vadd.f32 %v2667_v62, %v2630_v18  ;;  %v2670_v21 = vadd.f32 %v2666_v53, %v2629_v59 }
 0x4e7   : > { %v2736_v0 = vpop.permute.xlu1 %2735  ;;  %v2738_v45 = vpop.permute.xlu0 %2737 }
 0x4e8   : > { %v2742_v37 = vsel %vm2256_vm5, %v2738_v45, %v2740_v24  ;;  %v2741_v6 = vsel %vm2256_vm5, %v2736_v0, %v2738_v45 }
 0x4eb   : > { %v2701_v51 = vpop.permute.xlu1 %2700 }
 0x4ec   : > { %v2704_v15 = vsel %vm2687_vm11, %v2699_v4, %v2701_v51  ;;  %v2705_v13 = vsel %vm2687_vm11, %v2701_v51, %v2703_v49 }
 0x4ed   : > { %v2708_v1 = vadd.f32 %v2704_v15, %v2670_v21  ;;  %v2709_v61 = vadd.f32 %v2705_v13, %v2671_v19 }
 0x4ef   : > { %v2745_v50 = vadd.f32 %v2741_v6, %v2708_v1  ;;  %v2746_v3 = vadd.f32 %v2742_v37, %v2709_v61 }
 0x4f1   : > { %v2762_v36 = vadd.f32 %v2760_v40, %v2745_v50  ;;  %v2763_v44 = vadd.f32 %v2761_v42, %v2746_v3  ;;  %v2843_v43 = vpop.permute.xlu0 %2842  ;;  %v2895_v25 = vpop.permute.xlu1 %2894 }
 0x4f3   : > { %v2798_v34 = vadd.f32 %v6061_v56, %v2762_v36  ;;  %v2799_v29 = vadd.f32 %v6066_v31, %v2763_v44 }
 0x4f5   : > { %v2847_v22 = vpop.permute.xlu0 %2846 }
 0x4f6   : > { %v2899_v55 = vpop.permute.xlu1 %2898 }
 0x4f9   : > { %v2947_v9 = vpop.permute.xlu0 %2946 }
 0x4fa   : > { %v3068_v28 = vpop.permute.xlu1 %3067 }
 0x4fd   : > { %v2951_v52 = vpop.permute.xlu0 %2950 }
 0x4fe   : > { %v3072_v7 = vpop.permute.xlu1 %3071 }
 0x501   : > { %v3120_v49 = vpop.permute.xlu0 %3119 }
 0x502   : > { %v3172_v17 = vpop.permute.xlu1 %3171 }
 0x505   : > { %v3124_v4 = vpop.permute.xlu0 %3123 }
 0x506   : > { %v3176_v24 = vpop.permute.xlu1 %3175 }
 0x509   : > { %v3293_v58 = vpop.permute.xlu0 %3292 }
 0x50a   : > { %v3345_v26 = vpop.permute.xlu1 %3344 }
 0x50d   : > { %v3297_v47 = vpop.permute.xlu0 %3296 }
 0x50e   : > { %v3349_v12 = vpop.permute.xlu1 %3348 }
 0x511   : > { %v3397_v32 = vpop.permute.xlu0 %3396 }
 0x517   : > { %v2845_v56 = vpop.permute.xlu1 %2844  ;;  %v2897_v0 = vpop.permute.xlu0 %2896 }
 0x518   : > { %v2848_v31 = vsel %vm2665_vm9, %v2843_v43, %v2845_v56  ;;  %v2849_v62 = vsel %vm2665_vm9, %v2845_v56, %v2847_v22  ;;  %v2900_v60 = vsel %vm2687_vm11, %v2895_v25, %v2897_v0  ;;  %v2901_v18 = vsel %vm2687_vm11, %v2897_v0, %v2899_v55 }
 0x519   : > { %v2852_v53 = vadd.f32 %v2848_v31, %v2798_v34  ;;  %v2853_v10 = vadd.f32 %v2849_v62, %v2799_v29 }
 0x51b   : > { %v2904_v38 = vadd.f32 %v2900_v60, %v2852_v53  ;;  %v2905_v59 = vadd.f32 %v2901_v18, %v2853_v10  ;;  %v2949_v19 = vpop.permute.xlu1 %2948  ;;  %v3401_v21 = vpop.permute.xlu0 %3400 }
 0x51c   : > { %v2952_v45 = vsel %vm2256_vm5, %v2947_v9, %v2949_v19  ;;  %v2953_v51 = vsel %vm2256_vm5, %v2949_v19, %v2951_v52 }
 0x51d   : > { %v2956_v5 = vadd.f32 %v2952_v45, %v2904_v38  ;;  %v2957_v33 = vadd.f32 %v2953_v51, %v2905_v59 }
 0x51f   : > { %v2987_v15 = vadd.f32 %v6071_v30, %v2956_v5  ;;  %v2988_v13 = vadd.f32 %v6076_v41, %v2957_v33  ;;  %v3518_v1 = vpop.permute.xlu1 %3517  ;;  %v3070_v61 = vpop.permute.xlu0 %3069 }
 0x520   : > { %v3073_v50 = vsel %vm2665_vm9, %v3068_v28, %v3070_v61  ;;  %v3074_v3 = vsel %vm2665_vm9, %v3070_v61, %v3072_v7 }
 0x521   : > { %v3023_v37 = vadd.f32 %v6082_v27, %v2987_v15  ;;  %v3024_v6 = vadd.f32 %v6087_v16, %v2988_v13 }
 0x523   : > { %v3077_v40 = vadd.f32 %v3073_v50, %v3023_v37  ;;  %v3078_v46 = vadd.f32 %v3074_v3, %v3024_v6  ;;  %v3122_v42 = vpop.permute.xlu1 %3121  ;;  %v3174_v36 = vpop.permute.xlu0 %3173 }
 0x524   : > { %v3125_v44 = vsel %vm2687_vm11, %v3120_v49, %v3122_v42  ;;  %v3126_v30 = vsel %vm2687_vm11, %v3122_v42, %v3124_v4  ;;  %v3177_v29 = vsel %vm2256_vm5, %v3172_v17, %v3174_v36  ;;  %v3178_v27 = vsel %vm2256_vm5, %v3174_v36, %v3176_v24 }
 0x525   : > { %v3129_v34 = vadd.f32 %v3125_v44, %v3077_v40  ;;  %v3130_v41 = vadd.f32 %v3126_v30, %v3078_v46 }
 0x527   : > { %v3181_v43 = vadd.f32 %v3177_v29, %v3129_v34  ;;  %v3182_v16 = vadd.f32 %v3178_v27, %v3130_v41  ;;  %v3522_v25 = vpop.permute.xlu1 %3521  ;;  %v3570_v22 = vpop.permute.xlu0 %3569 }
 0x529   : > { %v3212_v55 = vadd.f32 %v6092_v54, %v3181_v43  ;;  %v3213_v9 = vadd.f32 %v6106_v23, %v3182_v16 }
 0x52b   : > { %v3248_v28 = vadd.f32 %v6122_v63, %v3212_v55  ;;  %v3249_v52 = vadd.f32 %v6127_v14, %v3213_v9  ;;  %v3295_v7 = vpop.permute.xlu1 %3294  ;;  %v3347_v49 = vpop.permute.xlu0 %3346 }
 0x52c   : > { %v3298_v4 = vsel %vm2665_vm9, %v3293_v58, %v3295_v7  ;;  %v3299_v17 = vsel %vm2665_vm9, %v3295_v7, %v3297_v47  ;;  %v3350_v0 = vsel %vm2687_vm11, %v3345_v26, %v3347_v49  ;;  %v3351_v31 = vsel %vm2687_vm11, %v3347_v49, %v3349_v12 }
 0x52d   : > { %v3302_v56 = vadd.f32 %v3298_v4, %v3248_v28  ;;  %v3303_v24 = vadd.f32 %v3299_v17, %v3249_v52 }
 0x52f   : > { %v3354_v62 = vadd.f32 %v3350_v0, %v3302_v56  ;;  %v3355_v54 = vadd.f32 %v3351_v31, %v3303_v24  ;;  %v3399_v53 = vpop.permute.xlu1 %3398  ;;  %v3574_v23 = vpop.permute.xlu0 %3573 }
 0x530   : > { %v3402_v63 = vsel %vm2256_vm5, %v3397_v32, %v3399_v53  ;;  %v3403_v14 = vsel %vm2256_vm5, %v3399_v53, %v3401_v21 }
 0x531   : > { %v3406_v10 = vadd.f32 %v3402_v63, %v3354_v62  ;;  %v3407_v60 = vadd.f32 %v3403_v14, %v3355_v54 }
 0x533   : > { %v3437_v58 = vadd.f32 %v6132_v48, %v3406_v10  ;;  %v3438_v47 = vadd.f32 %v6137_v2, %v3407_v60  ;;  %v3622_v18 = vpop.permute.xlu1 %3621  ;;  %v3520_v38 = vpop.permute.xlu0 %3519  ;;  %v3664_v48 = vld [vmem:[%s6341_s10] sm:$0x3] }
 0x534   : > { %v3523_v59 = vsel %vm2665_vm9, %v3518_v1, %v3520_v38  ;;  %v3524_v19 = vsel %vm2665_vm9, %v3520_v38, %v3522_v25  ;;  %v3673_v6 = vrot.slane %v3664_v48, %v6481_v35 }
 0x535   : > { %v3473_v26 = vadd.f32 %v6142_v39, %v3437_v58  ;;  %v3474_v12 = vadd.f32 %v6147_v8, %v3438_v47  ;;  %v3669_v8 = vrot.slane %v3664_v48, %v6482_v11 }
 0x537   : > { %v3527_v32 = vadd.f32 %v3523_v59, %v3473_v26  ;;  %v3528_v45 = vadd.f32 %v3524_v19, %v3474_v12  ;;  %v3572_v21 = vpop.permute.xlu1 %3571  ;;  %v3624_v51 = vpop.permute.xlu0 %3623 }
 0x538   : > { %v3575_v2 = vsel %vm2687_vm11, %v3570_v22, %v3572_v21  ;;  %v3576_v5 = vsel %vm2687_vm11, %v3572_v21, %v3574_v23  ;;  %v3627_v39 = vsel %vm2256_vm5, %v3622_v18, %v3624_v51 }
 0x539   : > { %v3579_v33 = vadd.f32 %v3575_v2, %v3527_v32  ;;  %v3580_v15 = vadd.f32 %v3576_v5, %v3528_v45 }
 0x53b   : > { %v3631_v13 = vadd.f32 %v3627_v39, %v3579_v33  ;;  %v3626_v1 = vpop.permute.xlu1 %3625 }
 0x53c   : > { %v3628_v61 = vsel %vm2256_vm5, %v3624_v51, %v3626_v1 }
 0x53d   : > { %v3662_v37 = vadd.f32 %v6150_v20, %v3631_v13  ;;  %v3632_v50 = vadd.f32 %v3628_v61, %v3580_v15 }
 0x53f   : > { %v3676_v3 = vadd.f32 %v3669_v8, %v3662_v37  ;;  %v3663_v40 = vadd.f32 %v6181_v57, %v3632_v50 }
 0x541   : > { %3678 = vst [vmem:[%s428_s21] sm:$0xff] %v3676_v3  ;;  %v3677_v46 = vadd.f32 %v3673_v6, %v3663_v40 }
 0x543   : > { %3679 = vst [vmem:[%s428_s21 + $0x8] sm:$0xff] %v3677_v46 }
 0x544 PF: > { %s23_s17 = sadd.s32 1, %s4231_s17  }
 0x545   : > { %p20_p5 = scmp.ge.s32.totalorder %s23_s17, 4  }
 0x547   :  { %22 = sbr.rel (!%p20_p5) target bundleno = 2 (0x2), region = 224 }
 0x54e   :  { %3701 = vsyncpa [#allocation7], 1 }
 0x54f   :  { %3703 = vsyncpa [#allocation7 + $0x1], 1 }
 0x550   :  { %3704 = vsyncpa [#allocation9], 1 }

</bundles_post_ra>
